<compile_context>
chip_gen: v7x
topology: tpu7x:2x2x1
jax: 0.10.0
libtpu: 0.0.40
codegen_flags: <defaults>
</compile_context>

<pallas_src>
import jax
import jax.numpy as jnp
import numpy as np
from jax import lax
from jax.experimental import pallas as pl
from jax.experimental.pallas import tpu as pltpu


# ---------------------------------------------------------------------------
# Generic tiled "matmul + bias" kernel:  out = x @ w + b  (bf16 MXU, f32 acc).
# Used for the time-parallel decoder (and any other big parallel matmul).
# ---------------------------------------------------------------------------
def _matmul_bias_kernel(x_ref, w_ref, b_ref, o_ref):
    x = x_ref[...].astype(jnp.bfloat16)
    w = w_ref[...].astype(jnp.bfloat16)
    acc = jnp.dot(x, w, preferred_element_type=jnp.float32) + b_ref[...]
    o_ref[...] = acc.astype(o_ref.dtype)


def matmul_bias(x, w, b, out_dtype=jnp.float32):
    """x: (M, K), w: (K, N), b: (N,) f32  ->  (M, N) out_dtype."""
    M, K = x.shape
    K2, N = w.shape
    assert K == K2

    def pick(n):
        for t in (512, 256, 128):
            if n % t == 0:
                return t
        return n  # TODO(synk): pad M/N to multiples of 8/128 for odd real shapes.

    tm, tn = pick(M), pick(N)
    grid = (M // tm, N // tn)
    # TODO(synk): for very large K add a K ('arbitrary') grid axis with an f32
    # accumulator scratch instead of full-K blocks.
    return pl.pallas_call(
        _matmul_bias_kernel,
        out_shape=jax.ShapeDtypeStruct((M, N), out_dtype),
        grid_spec=pltpu.PrefetchScalarGridSpec(
            num_scalar_prefetch=0,
            grid=grid,
            in_specs=[
                pl.BlockSpec((tm, K), lambda i, j: (i, 0)),   # x row tile
                pl.BlockSpec((K, tn), lambda i, j: (0, j)),   # w col tile
                pl.BlockSpec((1, tn), lambda i, j: (0, j)),   # bias col tile
            ],
            out_specs=pl.BlockSpec((tm, tn), lambda i, j: (i, j)),
        ),
        compiler_params=pltpu.CompilerParams(
            dimension_semantics=("parallel", "parallel"),
            vmem_limit_bytes=32 * 1024 * 1024),
        cost_estimate=pl.CostEstimate(
            flops=2 * M * K * N,
            transcendentals=0,
            bytes_accessed=4 * M * K + 2 * K * N + 4 * M * N),
    )(x, w, b.reshape(1, N))


# ---------------------------------------------------------------------------
# Fused LSTM kernel: per grid step (a) one time-parallel bf16 input projection
# for Tb timesteps into VMEM scratch, then (b) the serial recurrence over those
# Tb steps, carrying h/c in f32 VMEM scratch across grid steps.
# ---------------------------------------------------------------------------
def _lstm_fused_kernel(emb_ref, w_ih_ref, b_ref, h0_ref, c0_ref, w_hh_ref,
                       hseq_ref, h_out_ref, c_out_ref,
                       pre_scr, h_scr, c_scr):
    tb = pl.program_id(0)
    Tb = hseq_ref.shape[0]
    B, H = h_scr.shape

    # Initialize recurrent state from (h0, c0) on the first time block.
    @pl.when(tb == 0)
    def _():
        h_scr[...] = h0_ref[...]
        c_scr[...] = c0_ref[...]

    # Time-parallel (within the block) input projection:
    #   pre = emb @ W_ih^T + (b_ih + b_hh)   -> f32 VMEM scratch (Tb*B, 4H).
    pre_scr[...] = (jnp.dot(emb_ref[...], w_ih_ref[...],
                            preferred_element_type=jnp.float32)
                    + b_ref[...])

    # bf16 recurrent weight: half the MXU passes / vreg footprint of f32.
    w_hh = w_hh_ref[...]                                   # (H, 4H) bf16

    def sigmoid_t(x):
        # sigmoid(x) = 0.5*tanh(x/2) + 0.5 : one EUP op instead of exp + recip.
        return 0.5 * jnp.tanh(0.5 * x) + 0.5

    def step(tt, carry):
        h, c = carry                                       # f32 (B, H)
        row = pl.multiple_of(tt * B, B)
        pre_t = pre_scr[pl.ds(row, B), :]                  # (B, 4H) f32
        gates = pre_t + jnp.dot(h.astype(jnp.bfloat16), w_hh,
                                preferred_element_type=jnp.float32)
        i_g = sigmoid_t(gates[:, 0:H])
        f_g = sigmoid_t(gates[:, H:2 * H])
        g_g = jnp.tanh(gates[:, 2 * H:3 * H])
        o_g = sigmoid_t(gates[:, 3 * H:4 * H])
        c_new = f_g * c + i_g * g_g
        h_new = o_g * jnp.tanh(c_new)
        hseq_ref[tt] = h_new                               # decoder input
        return (h_new, c_new)

    h_fin, c_fin = lax.fori_loop(0, Tb, step, (h_scr[...], c_scr[...]),
                                 unroll=True)

    # Persist state for the next time block.
    h_scr[...] = h_fin
    c_scr[...] = c_fin

    # Final-state outputs written once, on the last time block only.
    @pl.when(tb == pl.num_programs(0) - 1)
    def _():
        h_out_ref[...] = h_fin
        c_out_ref[...] = c_fin


# ---------------------------------------------------------------------------
# Full model forward:  Embedding -> LSTM -> Linear decoder.
# ---------------------------------------------------------------------------
def rnn_model_forward(text, hidden, params, time_block=16):
    """text: (T, B) int32; hidden: (h0, c0) each (1, B, H).
    Returns (logits (T, B, V), (h_n (1,B,H), c_n (1,B,H)))."""
    embed_w, w_ih, w_hh, b_ih, b_hh, dec_w, dec_b = (
        params["embed"], params["w_ih"], params["w_hh"],
        params["b_ih"], params["b_hh"], params["dec_w"], params["dec_b"])

    T, B = text.shape
    V, E = embed_w.shape
    H = w_hh.shape[1]
    assert B % 8 == 0 and E % 128 == 0 and H % 128 == 0 and V % 128 == 0

    # Largest time-block size <= time_block that divides T.
    Tb = min(time_block, T)
    while T % Tb != 0:
        Tb -= 1
    # TODO(synk): prime T silently degrades to Tb=1 (correct but slow); pad T or
    # handle a remainder block for production sequence lengths.

    # Embedding lookup (pure gather) kept in plain JAX/XLA.
    # TODO(synk): a DMA-gather Pallas kernel is possible but adds no value here.
    emb = jnp.take(embed_w, text, axis=0)                          # (T, B, E) f32
    emb2d = emb.reshape(T * B, E).astype(jnp.bfloat16)             # bf16 MXU operand

    w_ih_t = w_ih.T.astype(jnp.bfloat16)                           # (E, 4H) bf16
    w_hh_t = w_hh.T.astype(jnp.bfloat16)                           # (H, 4H) bf16
    b_gate = (b_ih + b_hh).reshape(1, 4 * H).astype(jnp.float32)   # (1, 4H) f32

    h0 = hidden[0][0]                                              # (B, H) f32
    c0 = hidden[1][0]                                              # (B, H) f32

    # TODO(synk): on v7x, split the batch across the 2 TensorCores (leading
    # core-parallel grid axis with per-core h/c scratch) when B is large.
    hseq, h_n, c_n = pl.pallas_call(
        _lstm_fused_kernel,
        out_shape=(
            jax.ShapeDtypeStruct((T, B, H), jnp.float32),
            jax.ShapeDtypeStruct((B, H), jnp.float32),
            jax.ShapeDtypeStruct((B, H), jnp.float32),
        ),
        grid_spec=pltpu.PrefetchScalarGridSpec(
            num_scalar_prefetch=0,
            grid=(T // Tb,),
            in_specs=[
                pl.BlockSpec((Tb * B, E), lambda t: (t, 0)),        # emb block
                pl.BlockSpec((E, 4 * H), lambda t: (0, 0)),         # w_ih^T
                pl.BlockSpec((1, 4 * H), lambda t: (0, 0)),         # fused bias
                pl.BlockSpec((B, H), lambda t: (0, 0)),             # h0
                pl.BlockSpec((B, H), lambda t: (0, 0)),             # c0
                pl.BlockSpec((H, 4 * H), lambda t: (0, 0)),         # w_hh^T
            ],
            out_specs=[
                pl.BlockSpec((Tb, B, H), lambda t: (t, 0, 0)),      # per-step h
                pl.BlockSpec((B, H), lambda t: (0, 0)),             # h_n
                pl.BlockSpec((B, H), lambda t: (0, 0)),             # c_n
            ],
            scratch_shapes=[
                pltpu.VMEM((Tb * B, 4 * H), jnp.float32),           # block pre-acts
                pltpu.VMEM((B, H), jnp.float32),                    # h carry
                pltpu.VMEM((B, H), jnp.float32),                    # c carry
            ],
        ),
        compiler_params=pltpu.CompilerParams(
            dimension_semantics=("arbitrary",),                     # sequential
            vmem_limit_bytes=32 * 1024 * 1024),
        cost_estimate=pl.CostEstimate(
            flops=2 * T * B * (E + H) * 4 * H,
            transcendentals=5 * T * B * H,
            bytes_accessed=(2 * T * B * E + 2 * (E + H) * 4 * H
                            + 4 * T * B * H + 4 * 4 * B * H)),
    )(emb2d, w_ih_t, b_gate, h0, c0, w_hh_t)

    # Time-parallel decoder over all timesteps (one big matmul, bf16 operands).
    logits = matmul_bias(hseq.reshape(T * B, H),
                         dec_w.T.astype(jnp.bfloat16), dec_b,
                         out_dtype=jnp.float32)                     # (T*B, V)
    logits = logits.reshape(T, B, V)

    return logits, (h_n[None], c_n[None])


# ---------------------------------------------------------------------------
# Pure-JAX f32 reference matching PyTorch semantics, for verification.
# ---------------------------------------------------------------------------
def reference_forward(text, hidden, params):
    embed_w, w_ih, w_hh, b_ih, b_hh, dec_w, dec_b = (
        params["embed"], params["w_ih"], params["w_hh"],
        params["b_ih"], params["b_hh"], params["dec_w"], params["dec_b"])
    H = w_hh.shape[1]
    emb = jnp.take(embed_w, text, axis=0)                           # (T, B, E)

    def step(carry, x):
        h, c = carry
        gates = x @ w_ih.T + h @ w_hh.T + b_ih + b_hh
        i = jax.nn.sigmoid(gates[:, 0:H])
        f = jax.nn.sigmoid(gates[:, H:2 * H])
        g = jnp.tanh(gates[:, 2 * H:3 * H])
        o = jax.nn.sigmoid(gates[:, 3 * H:4 * H])
        c = f * c + i * g
        h = o * jnp.tanh(c)
        return (h, c), h

    (h_n, c_n), outs = jax.lax.scan(step, (hidden[0][0], hidden[1][0]), emb)
    logits = outs @ dec_w.T + dec_b
    return logits, (h_n[None], c_n[None])


def init_params(key, vocab_size, embed_size, hidden_size):
    ks = jax.random.split(key, 7)
    s = 1.0 / np.sqrt(hidden_size)
    return {
        "embed": jax.random.normal(ks[0], (vocab_size, embed_size), jnp.float32),
        "w_ih": jax.random.uniform(ks[1], (4 * hidden_size, embed_size),
                                   jnp.float32, -s, s),
        "w_hh": jax.random.uniform(ks[2], (4 * hidden_size, hidden_size),
                                   jnp.float32, -s, s),
        "b_ih": jax.random.uniform(ks[3], (4 * hidden_size,), jnp.float32, -s, s),
        "b_hh": jax.random.uniform(ks[4], (4 * hidden_size,), jnp.float32, -s, s),
        "dec_w": jax.random.uniform(ks[5], (vocab_size, hidden_size),
                                    jnp.float32, -s, s),
        "dec_b": jax.random.uniform(ks[6], (vocab_size,), jnp.float32, -s, s),
    }


if __name__ == "__main__":
    # Small but hardware-tile-aligned shapes: B mult of 8, E/H/V mult of 128.
    vocab_size, embed_size, hidden_size = 256, 128, 128
    T, B = 16, 8

    key = jax.random.PRNGKey(0)
    pkey, tkey = jax.random.split(key)
    params = init_params(pkey, vocab_size, embed_size, hidden_size)

    text = jax.random.randint(tkey, (T, B), 0, vocab_size, dtype=jnp.int32)
    # init_hidden equivalent: zeros of shape (1, B, H)
    hidden = (jnp.zeros((1, B, hidden_size), jnp.float32),
              jnp.zeros((1, B, hidden_size), jnp.float32))

    logits, (h_n, c_n) = rnn_model_forward(text, hidden, params)
    jax.block_until_ready((logits, h_n, c_n))

    # bf16 MXU operands in the kernels -> loosened tolerances vs the f32 reference.
    ref_logits, (ref_h, ref_c) = reference_forward(text, hidden, params)
    np.testing.assert_allclose(np.asarray(logits), np.asarray(ref_logits),
                               atol=5e-2, rtol=5e-2)
    np.testing.assert_allclose(np.asarray(h_n), np.asarray(ref_h),
                               atol=5e-2, rtol=5e-2)
    np.testing.assert_allclose(np.asarray(c_n), np.asarray(ref_c),
                               atol=5e-2, rtol=5e-2)

    print("KERNEL_OK")
</pallas_src>

<mosaic_0001>
module attributes {stable_mosaic.version = 11 : i64} {
  func.func @_lstm_fused_kernel(%arg0: i32, %arg1: memref<128x128xbf16, #tpu.memory_space<vmem>>, %arg2: memref<128x512xbf16, #tpu.memory_space<vmem>>, %arg3: memref<1x512xf32, #tpu.memory_space<vmem>>, %arg4: memref<8x128xf32, #tpu.memory_space<vmem>>, %arg5: memref<8x128xf32, #tpu.memory_space<vmem>>, %arg6: memref<128x512xbf16, #tpu.memory_space<vmem>>, %arg7: memref<16x8x128xf32, #tpu.memory_space<vmem>>, %arg8: memref<8x128xf32, #tpu.memory_space<vmem>>, %arg9: memref<8x128xf32, #tpu.memory_space<vmem>>, %arg10: memref<128x512xf32, #tpu.memory_space<vmem>>, %arg11: memref<8x128xf32, #tpu.memory_space<vmem>>, %arg12: memref<8x128xf32, #tpu.memory_space<vmem>>) attributes {dimension_semantics = [#tpu.dimension_semantics<arbitrary>], iteration_bounds = array<i64: 1>, scalar_prefetch = 0 : i64, scratch_operands = 3 : i64, tpu.core_type = #tpu.core_type<tc>, window_params = [{transform_indices = @transform_0, window_bounds = array<i64: 128, 128>}, {pipeline_mode = #tpu.pipeline_mode<synchronous>, transform_indices = @transform_1, window_bounds = array<i64: 128, 512>}, {pipeline_mode = #tpu.pipeline_mode<synchronous>, transform_indices = @transform_2, window_bounds = array<i64: 1, 512>}, {pipeline_mode = #tpu.pipeline_mode<synchronous>, transform_indices = @transform_3, window_bounds = array<i64: 8, 128>}, {pipeline_mode = #tpu.pipeline_mode<synchronous>, transform_indices = @transform_4, window_bounds = array<i64: 8, 128>}, {pipeline_mode = #tpu.pipeline_mode<synchronous>, transform_indices = @transform_5, window_bounds = array<i64: 128, 512>}, {transform_indices = @transform_6, window_bounds = array<i64: 16, 8, 128>}, {pipeline_mode = #tpu.pipeline_mode<synchronous>, transform_indices = @transform_7, window_bounds = array<i64: 8, 128>}, {pipeline_mode = #tpu.pipeline_mode<synchronous>, transform_indices = @transform_8, window_bounds = array<i64: 8, 128>}]} {
    %c0_i32 = arith.constant 0 : i32
    %0 = arith.cmpi eq, %arg0, %c0_i32 : i32
    %1 = arith.extui %0 : i1 to i32
    %c0_i32_0 = arith.constant 0 : i32
    %2 = arith.cmpi ne, %1, %c0_i32_0 : i32
    scf.if %2 {
      %c0_245 = arith.constant 0 : index
      %c0_246 = arith.constant 0 : index
      %690 = vector.load %arg4[%c0_245, %c0_246] : memref<8x128xf32, #tpu.memory_space<vmem>>, vector<8x128xf32>
      %c0_247 = arith.constant 0 : index
      %c0_248 = arith.constant 0 : index
      %691 = vector.load %arg11[%c0_247, %c0_248] : memref<8x128xf32, #tpu.memory_space<vmem>>, vector<8x128xf32>
      tpu.vector_store %arg11[%c0_247, %c0_248], %690 {strides = array<i32>} : memref<8x128xf32, #tpu.memory_space<vmem>>, vector<8x128xf32>,
      %c0_249 = arith.constant 0 : index
      %c0_250 = arith.constant 0 : index
      %692 = vector.load %arg5[%c0_249, %c0_250] : memref<8x128xf32, #tpu.memory_space<vmem>>, vector<8x128xf32>
      %c0_251 = arith.constant 0 : index
      %c0_252 = arith.constant 0 : index
      %693 = vector.load %arg12[%c0_251, %c0_252] : memref<8x128xf32, #tpu.memory_space<vmem>>, vector<8x128xf32>
      tpu.vector_store %arg12[%c0_251, %c0_252], %692 {strides = array<i32>} : memref<8x128xf32, #tpu.memory_space<vmem>>, vector<8x128xf32>,
    } else {
    }
    %c0 = arith.constant 0 : index
    %c0_1 = arith.constant 0 : index
    %3 = vector.load %arg1[%c0, %c0_1] : memref<128x128xbf16, #tpu.memory_space<vmem>>, vector<128x128xbf16>
    %c0_2 = arith.constant 0 : index
    %c0_3 = arith.constant 0 : index
    %4 = vector.load %arg2[%c0_2, %c0_3] : memref<128x512xbf16, #tpu.memory_space<vmem>>, vector<128x512xbf16>
    %cst = arith.constant dense<0.000000e+00> : vector<128x512xf32>
    %5 = tpu.matmul %3, %4, %cst {dimension_numbers = #tpu.dot_dimension_numbers<[1], [0], [0], [1], [0, 0, 1, 1], [], []>} : vector<128x128xbf16>, vector<128x512xbf16>, vector<128x512xf32> -> vector<128x512xf32>
    %c0_4 = arith.constant 0 : index
    %c0_5 = arith.constant 0 : index
    %6 = vector.load %arg3[%c0_4, %c0_5] : memref<1x512xf32, #tpu.memory_space<vmem>>, vector<1x512xf32>
    %7 = vector.broadcast %6 : vector<1x512xf32> to vector<128x512xf32>
    %8 = arith.addf %5, %7 : vector<128x512xf32>
    %c0_6 = arith.constant 0 : index
    %c0_7 = arith.constant 0 : index
    %9 = vector.load %arg10[%c0_6, %c0_7] : memref<128x512xf32, #tpu.memory_space<vmem>>, vector<128x512xf32>
    tpu.vector_store %arg10[%c0_6, %c0_7], %8 {strides = array<i32>} : memref<128x512xf32, #tpu.memory_space<vmem>>, vector<128x512xf32>,
    %c0_8 = arith.constant 0 : index
    %c0_9 = arith.constant 0 : index
    %10 = vector.load %arg6[%c0_8, %c0_9] : memref<128x512xbf16, #tpu.memory_space<vmem>>, vector<128x512xbf16>
    %c0_10 = arith.constant 0 : index
    %c0_11 = arith.constant 0 : index
    %11 = vector.load %arg11[%c0_10, %c0_11] : memref<8x128xf32, #tpu.memory_space<vmem>>, vector<8x128xf32>
    %c0_12 = arith.constant 0 : index
    %c0_13 = arith.constant 0 : index
    %12 = vector.load %arg12[%c0_12, %c0_13] : memref<8x128xf32, #tpu.memory_space<vmem>>, vector<8x128xf32>
    %c0_i32_14 = arith.constant 0 : i32
    %c8_i32 = arith.constant 8 : i32
    %13 = arith.muli %c0_i32_14, %c8_i32 : i32
    %14 = tpu.assume_multiple %13, 8 : i32
    %15 = arith.index_cast %14 : i32 to index
    %c0_15 = arith.constant 0 : index
    %16 = vector.load %arg10[%15, %c0_15] : memref<128x512xf32, #tpu.memory_space<vmem>>, vector<8x512xf32>
    %17 = arith.truncf %11 : vector<8x128xf32> to vector<8x128xbf16>
    %cst_16 = arith.constant dense<0.000000e+00> : vector<8x512xf32>
    %18 = tpu.matmul %17, %10, %cst_16 {dimension_numbers = #tpu.dot_dimension_numbers<[1], [0], [0], [1], [0, 0, 1, 1], [], []>} : vector<8x128xbf16>, vector<128x512xbf16>, vector<8x512xf32> -> vector<8x512xf32>
    %19 = arith.addf %16, %18 : vector<8x512xf32>
    %20 = vector.extract_strided_slice %19 {offsets = [0, 0], sizes = [8, 128], strides = [1, 1]} : vector<8x512xf32> to vector<8x128xf32>
    %cst_17 = arith.constant 5.000000e-01 : f32
    %21 = vector.broadcast %cst_17 : f32 to vector<8x128xf32>
    %22 = arith.mulf %21, %20 : vector<8x128xf32>
    %23 = math.tanh %22 : vector<8x128xf32>
    %cst_18 = arith.constant 5.000000e-01 : f32
    %24 = vector.broadcast %cst_18 : f32 to vector<8x128xf32>
    %25 = arith.mulf %24, %23 : vector<8x128xf32>
    %cst_19 = arith.constant 5.000000e-01 : f32
    %26 = vector.broadcast %cst_19 : f32 to vector<8x128xf32>
    %27 = arith.addf %25, %26 : vector<8x128xf32>
    %28 = vector.extract_strided_slice %19 {offsets = [0, 128], sizes = [8, 128], strides = [1, 1]} : vector<8x512xf32> to vector<8x128xf32>
    %cst_20 = arith.constant 5.000000e-01 : f32
    %29 = vector.broadcast %cst_20 : f32 to vector<8x128xf32>
    %30 = arith.mulf %29, %28 : vector<8x128xf32>
    %31 = math.tanh %30 : vector<8x128xf32>
    %cst_21 = arith.constant 5.000000e-01 : f32
    %32 = vector.broadcast %cst_21 : f32 to vector<8x128xf32>
    %33 = arith.mulf %32, %31 : vector<8x128xf32>
    %cst_22 = arith.constant 5.000000e-01 : f32
    %34 = vector.broadcast %cst_22 : f32 to vector<8x128xf32>
    %35 = arith.addf %33, %34 : vector<8x128xf32>
    %36 = vector.extract_strided_slice %19 {offsets = [0, 256], sizes = [8, 128], strides = [1, 1]} : vector<8x512xf32> to vector<8x128xf32>
    %37 = math.tanh %36 : vector<8x128xf32>
    %38 = vector.extract_strided_slice %19 {offsets = [0, 384], sizes = [8, 128], strides = [1, 1]} : vector<8x512xf32> to vector<8x128xf32>
    %cst_23 = arith.constant 5.000000e-01 : f32
    %39 = vector.broadcast %cst_23 : f32 to vector<8x128xf32>
    %40 = arith.mulf %39, %38 : vector<8x128xf32>
    %41 = math.tanh %40 : vector<8x128xf32>
    %cst_24 = arith.constant 5.000000e-01 : f32
    %42 = vector.broadcast %cst_24 : f32 to vector<8x128xf32>
    %43 = arith.mulf %42, %41 : vector<8x128xf32>
    %cst_25 = arith.constant 5.000000e-01 : f32
    %44 = vector.broadcast %cst_25 : f32 to vector<8x128xf32>
    %45 = arith.addf %43, %44 : vector<8x128xf32>
    %46 = arith.mulf %35, %12 : vector<8x128xf32>
    %47 = arith.mulf %27, %37 : vector<8x128xf32>
    %48 = arith.addf %46, %47 : vector<8x128xf32>
    %49 = math.tanh %48 : vector<8x128xf32>
    %50 = arith.mulf %45, %49 : vector<8x128xf32>
    %51 = arith.index_cast %c0_i32_14 : i32 to index
    %c0_26 = arith.constant 0 : index
    %c0_27 = arith.constant 0 : index
    %52 = vector.load %arg7[%51, %c0_26, %c0_27] : memref<16x8x128xf32, #tpu.memory_space<vmem>>, vector<1x8x128xf32>
    %53 = vector.shape_cast %52 : vector<1x8x128xf32> to vector<8x128xf32>
    %54 = vector.shape_cast %50 : vector<8x128xf32> to vector<1x8x128xf32>
    tpu.vector_store %arg7[%51, %c0_26, %c0_27], %54 {strides = array<i32>} : memref<16x8x128xf32, #tpu.memory_space<vmem>>, vector<1x8x128xf32>,
    %c1_i32 = arith.constant 1 : i32
    %c8_i32_28 = arith.constant 8 : i32
    %55 = arith.muli %c1_i32, %c8_i32_28 : i32
    %56 = tpu.assume_multiple %55, 8 : i32
    %57 = arith.index_cast %56 : i32 to index
    %c0_29 = arith.constant 0 : index
    %58 = vector.load %arg10[%57, %c0_29] : memref<128x512xf32, #tpu.memory_space<vmem>>, vector<8x512xf32>
    %59 = arith.truncf %50 : vector<8x128xf32> to vector<8x128xbf16>
    %cst_30 = arith.constant dense<0.000000e+00> : vector<8x512xf32>
    %60 = tpu.matmul %59, %10, %cst_30 {dimension_numbers = #tpu.dot_dimension_numbers<[1], [0], [0], [1], [0, 0, 1, 1], [], []>} : vector<8x128xbf16>, vector<128x512xbf16>, vector<8x512xf32> -> vector<8x512xf32>
    %61 = arith.addf %58, %60 : vector<8x512xf32>
    %62 = vector.extract_strided_slice %61 {offsets = [0, 0], sizes = [8, 128], strides = [1, 1]} : vector<8x512xf32> to vector<8x128xf32>
    %cst_31 = arith.constant 5.000000e-01 : f32
    %63 = vector.broadcast %cst_31 : f32 to vector<8x128xf32>
    %64 = arith.mulf %63, %62 : vector<8x128xf32>
    %65 = math.tanh %64 : vector<8x128xf32>
    %cst_32 = arith.constant 5.000000e-01 : f32
    %66 = vector.broadcast %cst_32 : f32 to vector<8x128xf32>
    %67 = arith.mulf %66, %65 : vector<8x128xf32>
    %cst_33 = arith.constant 5.000000e-01 : f32
    %68 = vector.broadcast %cst_33 : f32 to vector<8x128xf32>
    %69 = arith.addf %67, %68 : vector<8x128xf32>
    %70 = vector.extract_strided_slice %61 {offsets = [0, 128], sizes = [8, 128], strides = [1, 1]} : vector<8x512xf32> to vector<8x128xf32>
    %cst_34 = arith.constant 5.000000e-01 : f32
    %71 = vector.broadcast %cst_34 : f32 to vector<8x128xf32>
    %72 = arith.mulf %71, %70 : vector<8x128xf32>
    %73 = math.tanh %72 : vector<8x128xf32>
    %cst_35 = arith.constant 5.000000e-01 : f32
    %74 = vector.broadcast %cst_35 : f32 to vector<8x128xf32>
    %75 = arith.mulf %74, %73 : vector<8x128xf32>
    %cst_36 = arith.constant 5.000000e-01 : f32
    %76 = vector.broadcast %cst_36 : f32 to vector<8x128xf32>
    %77 = arith.addf %75, %76 : vector<8x128xf32>
    %78 = vector.extract_strided_slice %61 {offsets = [0, 256], sizes = [8, 128], strides = [1, 1]} : vector<8x512xf32> to vector<8x128xf32>
    %79 = math.tanh %78 : vector<8x128xf32>
    %80 = vector.extract_strided_slice %61 {offsets = [0, 384], sizes = [8, 128], strides = [1, 1]} : vector<8x512xf32> to vector<8x128xf32>
    %cst_37 = arith.constant 5.000000e-01 : f32
    %81 = vector.broadcast %cst_37 : f32 to vector<8x128xf32>
    %82 = arith.mulf %81, %80 : vector<8x128xf32>
    %83 = math.tanh %82 : vector<8x128xf32>
    %cst_38 = arith.constant 5.000000e-01 : f32
    %84 = vector.broadcast %cst_38 : f32 to vector<8x128xf32>
    %85 = arith.mulf %84, %83 : vector<8x128xf32>
    %cst_39 = arith.constant 5.000000e-01 : f32
    %86 = vector.broadcast %cst_39 : f32 to vector<8x128xf32>
    %87 = arith.addf %85, %86 : vector<8x128xf32>
    %88 = arith.mulf %77, %48 : vector<8x128xf32>
    %89 = arith.mulf %69, %79 : vector<8x128xf32>
    %90 = arith.addf %88, %89 : vector<8x128xf32>
    %91 = math.tanh %90 : vector<8x128xf32>
    %92 = arith.mulf %87, %91 : vector<8x128xf32>
    %93 = arith.index_cast %c1_i32 : i32 to index
    %c0_40 = arith.constant 0 : index
    %c0_41 = arith.constant 0 : index
    %94 = vector.load %arg7[%93, %c0_40, %c0_41] : memref<16x8x128xf32, #tpu.memory_space<vmem>>, vector<1x8x128xf32>
    %95 = vector.shape_cast %94 : vector<1x8x128xf32> to vector<8x128xf32>
    %96 = vector.shape_cast %92 : vector<8x128xf32> to vector<1x8x128xf32>
    tpu.vector_store %arg7[%93, %c0_40, %c0_41], %96 {strides = array<i32>} : memref<16x8x128xf32, #tpu.memory_space<vmem>>, vector<1x8x128xf32>,
    %c2_i32 = arith.constant 2 : i32
    %c8_i32_42 = arith.constant 8 : i32
    %97 = arith.muli %c2_i32, %c8_i32_42 : i32
    %98 = tpu.assume_multiple %97, 8 : i32
    %99 = arith.index_cast %98 : i32 to index
    %c0_43 = arith.constant 0 : index
    %100 = vector.load %arg10[%99, %c0_43] : memref<128x512xf32, #tpu.memory_space<vmem>>, vector<8x512xf32>
    %101 = arith.truncf %92 : vector<8x128xf32> to vector<8x128xbf16>
    %cst_44 = arith.constant dense<0.000000e+00> : vector<8x512xf32>
    %102 = tpu.matmul %101, %10, %cst_44 {dimension_numbers = #tpu.dot_dimension_numbers<[1], [0], [0], [1], [0, 0, 1, 1], [], []>} : vector<8x128xbf16>, vector<128x512xbf16>, vector<8x512xf32> -> vector<8x512xf32>
    %103 = arith.addf %100, %102 : vector<8x512xf32>
    %104 = vector.extract_strided_slice %103 {offsets = [0, 0], sizes = [8, 128], strides = [1, 1]} : vector<8x512xf32> to vector<8x128xf32>
    %cst_45 = arith.constant 5.000000e-01 : f32
    %105 = vector.broadcast %cst_45 : f32 to vector<8x128xf32>
    %106 = arith.mulf %105, %104 : vector<8x128xf32>
    %107 = math.tanh %106 : vector<8x128xf32>
    %cst_46 = arith.constant 5.000000e-01 : f32
    %108 = vector.broadcast %cst_46 : f32 to vector<8x128xf32>
    %109 = arith.mulf %108, %107 : vector<8x128xf32>
    %cst_47 = arith.constant 5.000000e-01 : f32
    %110 = vector.broadcast %cst_47 : f32 to vector<8x128xf32>
    %111 = arith.addf %109, %110 : vector<8x128xf32>
    %112 = vector.extract_strided_slice %103 {offsets = [0, 128], sizes = [8, 128], strides = [1, 1]} : vector<8x512xf32> to vector<8x128xf32>
    %cst_48 = arith.constant 5.000000e-01 : f32
    %113 = vector.broadcast %cst_48 : f32 to vector<8x128xf32>
    %114 = arith.mulf %113, %112 : vector<8x128xf32>
    %115 = math.tanh %114 : vector<8x128xf32>
    %cst_49 = arith.constant 5.000000e-01 : f32
    %116 = vector.broadcast %cst_49 : f32 to vector<8x128xf32>
    %117 = arith.mulf %116, %115 : vector<8x128xf32>
    %cst_50 = arith.constant 5.000000e-01 : f32
    %118 = vector.broadcast %cst_50 : f32 to vector<8x128xf32>
    %119 = arith.addf %117, %118 : vector<8x128xf32>
    %120 = vector.extract_strided_slice %103 {offsets = [0, 256], sizes = [8, 128], strides = [1, 1]} : vector<8x512xf32> to vector<8x128xf32>
    %121 = math.tanh %120 : vector<8x128xf32>
    %122 = vector.extract_strided_slice %103 {offsets = [0, 384], sizes = [8, 128], strides = [1, 1]} : vector<8x512xf32> to vector<8x128xf32>
    %cst_51 = arith.constant 5.000000e-01 : f32
    %123 = vector.broadcast %cst_51 : f32 to vector<8x128xf32>
    %124 = arith.mulf %123, %122 : vector<8x128xf32>
    %125 = math.tanh %124 : vector<8x128xf32>
    %cst_52 = arith.constant 5.000000e-01 : f32
    %126 = vector.broadcast %cst_52 : f32 to vector<8x128xf32>
    %127 = arith.mulf %126, %125 : vector<8x128xf32>
    %cst_53 = arith.constant 5.000000e-01 : f32
    %128 = vector.broadcast %cst_53 : f32 to vector<8x128xf32>
    %129 = arith.addf %127, %128 : vector<8x128xf32>
    %130 = arith.mulf %119, %90 : vector<8x128xf32>
    %131 = arith.mulf %111, %121 : vector<8x128xf32>
    %132 = arith.addf %130, %131 : vector<8x128xf32>
    %133 = math.tanh %132 : vector<8x128xf32>
    %134 = arith.mulf %129, %133 : vector<8x128xf32>
    %135 = arith.index_cast %c2_i32 : i32 to index
    %c0_54 = arith.constant 0 : index
    %c0_55 = arith.constant 0 : index
    %136 = vector.load %arg7[%135, %c0_54, %c0_55] : memref<16x8x128xf32, #tpu.memory_space<vmem>>, vector<1x8x128xf32>
    %137 = vector.shape_cast %136 : vector<1x8x128xf32> to vector<8x128xf32>
    %138 = vector.shape_cast %134 : vector<8x128xf32> to vector<1x8x128xf32>
    tpu.vector_store %arg7[%135, %c0_54, %c0_55], %138 {strides = array<i32>} : memref<16x8x128xf32, #tpu.memory_space<vmem>>, vector<1x8x128xf32>,
    %c3_i32 = arith.constant 3 : i32
    %c8_i32_56 = arith.constant 8 : i32
    %139 = arith.muli %c3_i32, %c8_i32_56 : i32
    %140 = tpu.assume_multiple %139, 8 : i32
    %141 = arith.index_cast %140 : i32 to index
    %c0_57 = arith.constant 0 : index
    %142 = vector.load %arg10[%141, %c0_57] : memref<128x512xf32, #tpu.memory_space<vmem>>, vector<8x512xf32>
    %143 = arith.truncf %134 : vector<8x128xf32> to vector<8x128xbf16>
    %cst_58 = arith.constant dense<0.000000e+00> : vector<8x512xf32>
    %144 = tpu.matmul %143, %10, %cst_58 {dimension_numbers = #tpu.dot_dimension_numbers<[1], [0], [0], [1], [0, 0, 1, 1], [], []>} : vector<8x128xbf16>, vector<128x512xbf16>, vector<8x512xf32> -> vector<8x512xf32>
    %145 = arith.addf %142, %144 : vector<8x512xf32>
    %146 = vector.extract_strided_slice %145 {offsets = [0, 0], sizes = [8, 128], strides = [1, 1]} : vector<8x512xf32> to vector<8x128xf32>
    %cst_59 = arith.constant 5.000000e-01 : f32
    %147 = vector.broadcast %cst_59 : f32 to vector<8x128xf32>
    %148 = arith.mulf %147, %146 : vector<8x128xf32>
    %149 = math.tanh %148 : vector<8x128xf32>
    %cst_60 = arith.constant 5.000000e-01 : f32
    %150 = vector.broadcast %cst_60 : f32 to vector<8x128xf32>
    %151 = arith.mulf %150, %149 : vector<8x128xf32>
    %cst_61 = arith.constant 5.000000e-01 : f32
    %152 = vector.broadcast %cst_61 : f32 to vector<8x128xf32>
    %153 = arith.addf %151, %152 : vector<8x128xf32>
    %154 = vector.extract_strided_slice %145 {offsets = [0, 128], sizes = [8, 128], strides = [1, 1]} : vector<8x512xf32> to vector<8x128xf32>
    %cst_62 = arith.constant 5.000000e-01 : f32
    %155 = vector.broadcast %cst_62 : f32 to vector<8x128xf32>
    %156 = arith.mulf %155, %154 : vector<8x128xf32>
    %157 = math.tanh %156 : vector<8x128xf32>
    %cst_63 = arith.constant 5.000000e-01 : f32
    %158 = vector.broadcast %cst_63 : f32 to vector<8x128xf32>
    %159 = arith.mulf %158, %157 : vector<8x128xf32>
    %cst_64 = arith.constant 5.000000e-01 : f32
    %160 = vector.broadcast %cst_64 : f32 to vector<8x128xf32>
    %161 = arith.addf %159, %160 : vector<8x128xf32>
    %162 = vector.extract_strided_slice %145 {offsets = [0, 256], sizes = [8, 128], strides = [1, 1]} : vector<8x512xf32> to vector<8x128xf32>
    %163 = math.tanh %162 : vector<8x128xf32>
    %164 = vector.extract_strided_slice %145 {offsets = [0, 384], sizes = [8, 128], strides = [1, 1]} : vector<8x512xf32> to vector<8x128xf32>
    %cst_65 = arith.constant 5.000000e-01 : f32
    %165 = vector.broadcast %cst_65 : f32 to vector<8x128xf32>
    %166 = arith.mulf %165, %164 : vector<8x128xf32>
    %167 = math.tanh %166 : vector<8x128xf32>
    %cst_66 = arith.constant 5.000000e-01 : f32
    %168 = vector.broadcast %cst_66 : f32 to vector<8x128xf32>
    %169 = arith.mulf %168, %167 : vector<8x128xf32>
    %cst_67 = arith.constant 5.000000e-01 : f32
    %170 = vector.broadcast %cst_67 : f32 to vector<8x128xf32>
    %171 = arith.addf %169, %170 : vector<8x128xf32>
    %172 = arith.mulf %161, %132 : vector<8x128xf32>
    %173 = arith.mulf %153, %163 : vector<8x128xf32>
    %174 = arith.addf %172, %173 : vector<8x128xf32>
    %175 = math.tanh %174 : vector<8x128xf32>
    %176 = arith.mulf %171, %175 : vector<8x128xf32>
    %177 = arith.index_cast %c3_i32 : i32 to index
    %c0_68 = arith.constant 0 : index
    %c0_69 = arith.constant 0 : index
    %178 = vector.load %arg7[%177, %c0_68, %c0_69] : memref<16x8x128xf32, #tpu.memory_space<vmem>>, vector<1x8x128xf32>
    %179 = vector.shape_cast %178 : vector<1x8x128xf32> to vector<8x128xf32>
    %180 = vector.shape_cast %176 : vector<8x128xf32> to vector<1x8x128xf32>
    tpu.vector_store %arg7[%177, %c0_68, %c0_69], %180 {strides = array<i32>} : memref<16x8x128xf32, #tpu.memory_space<vmem>>, vector<1x8x128xf32>,
    %c4_i32 = arith.constant 4 : i32
    %c8_i32_70 = arith.constant 8 : i32
    %181 = arith.muli %c4_i32, %c8_i32_70 : i32
    %182 = tpu.assume_multiple %181, 8 : i32
    %183 = arith.index_cast %182 : i32 to index
    %c0_71 = arith.constant 0 : index
    %184 = vector.load %arg10[%183, %c0_71] : memref<128x512xf32, #tpu.memory_space<vmem>>, vector<8x512xf32>
    %185 = arith.truncf %176 : vector<8x128xf32> to vector<8x128xbf16>
    %cst_72 = arith.constant dense<0.000000e+00> : vector<8x512xf32>
    %186 = tpu.matmul %185, %10, %cst_72 {dimension_numbers = #tpu.dot_dimension_numbers<[1], [0], [0], [1], [0, 0, 1, 1], [], []>} : vector<8x128xbf16>, vector<128x512xbf16>, vector<8x512xf32> -> vector<8x512xf32>
    %187 = arith.addf %184, %186 : vector<8x512xf32>
    %188 = vector.extract_strided_slice %187 {offsets = [0, 0], sizes = [8, 128], strides = [1, 1]} : vector<8x512xf32> to vector<8x128xf32>
    %cst_73 = arith.constant 5.000000e-01 : f32
    %189 = vector.broadcast %cst_73 : f32 to vector<8x128xf32>
    %190 = arith.mulf %189, %188 : vector<8x128xf32>
    %191 = math.tanh %190 : vector<8x128xf32>
    %cst_74 = arith.constant 5.000000e-01 : f32
    %192 = vector.broadcast %cst_74 : f32 to vector<8x128xf32>
    %193 = arith.mulf %192, %191 : vector<8x128xf32>
    %cst_75 = arith.constant 5.000000e-01 : f32
    %194 = vector.broadcast %cst_75 : f32 to vector<8x128xf32>
    %195 = arith.addf %193, %194 : vector<8x128xf32>
    %196 = vector.extract_strided_slice %187 {offsets = [0, 128], sizes = [8, 128], strides = [1, 1]} : vector<8x512xf32> to vector<8x128xf32>
    %cst_76 = arith.constant 5.000000e-01 : f32
    %197 = vector.broadcast %cst_76 : f32 to vector<8x128xf32>
    %198 = arith.mulf %197, %196 : vector<8x128xf32>
    %199 = math.tanh %198 : vector<8x128xf32>
    %cst_77 = arith.constant 5.000000e-01 : f32
    %200 = vector.broadcast %cst_77 : f32 to vector<8x128xf32>
    %201 = arith.mulf %200, %199 : vector<8x128xf32>
    %cst_78 = arith.constant 5.000000e-01 : f32
    %202 = vector.broadcast %cst_78 : f32 to vector<8x128xf32>
    %203 = arith.addf %201, %202 : vector<8x128xf32>
    %204 = vector.extract_strided_slice %187 {offsets = [0, 256], sizes = [8, 128], strides = [1, 1]} : vector<8x512xf32> to vector<8x128xf32>
    %205 = math.tanh %204 : vector<8x128xf32>
    %206 = vector.extract_strided_slice %187 {offsets = [0, 384], sizes = [8, 128], strides = [1, 1]} : vector<8x512xf32> to vector<8x128xf32>
    %cst_79 = arith.constant 5.000000e-01 : f32
    %207 = vector.broadcast %cst_79 : f32 to vector<8x128xf32>
    %208 = arith.mulf %207, %206 : vector<8x128xf32>
    %209 = math.tanh %208 : vector<8x128xf32>
    %cst_80 = arith.constant 5.000000e-01 : f32
    %210 = vector.broadcast %cst_80 : f32 to vector<8x128xf32>
    %211 = arith.mulf %210, %209 : vector<8x128xf32>
    %cst_81 = arith.constant 5.000000e-01 : f32
    %212 = vector.broadcast %cst_81 : f32 to vector<8x128xf32>
    %213 = arith.addf %211, %212 : vector<8x128xf32>
    %214 = arith.mulf %203, %174 : vector<8x128xf32>
    %215 = arith.mulf %195, %205 : vector<8x128xf32>
    %216 = arith.addf %214, %215 : vector<8x128xf32>
    %217 = math.tanh %216 : vector<8x128xf32>
    %218 = arith.mulf %213, %217 : vector<8x128xf32>
    %219 = arith.index_cast %c4_i32 : i32 to index
    %c0_82 = arith.constant 0 : index
    %c0_83 = arith.constant 0 : index
    %220 = vector.load %arg7[%219, %c0_82, %c0_83] : memref<16x8x128xf32, #tpu.memory_space<vmem>>, vector<1x8x128xf32>
    %221 = vector.shape_cast %220 : vector<1x8x128xf32> to vector<8x128xf32>
    %222 = vector.shape_cast %218 : vector<8x128xf32> to vector<1x8x128xf32>
    tpu.vector_store %arg7[%219, %c0_82, %c0_83], %222 {strides = array<i32>} : memref<16x8x128xf32, #tpu.memory_space<vmem>>, vector<1x8x128xf32>,
    %c5_i32 = arith.constant 5 : i32
    %c8_i32_84 = arith.constant 8 : i32
    %223 = arith.muli %c5_i32, %c8_i32_84 : i32
    %224 = tpu.assume_multiple %223, 8 : i32
    %225 = arith.index_cast %224 : i32 to index
    %c0_85 = arith.constant 0 : index
    %226 = vector.load %arg10[%225, %c0_85] : memref<128x512xf32, #tpu.memory_space<vmem>>, vector<8x512xf32>
    %227 = arith.truncf %218 : vector<8x128xf32> to vector<8x128xbf16>
    %cst_86 = arith.constant dense<0.000000e+00> : vector<8x512xf32>
    %228 = tpu.matmul %227, %10, %cst_86 {dimension_numbers = #tpu.dot_dimension_numbers<[1], [0], [0], [1], [0, 0, 1, 1], [], []>} : vector<8x128xbf16>, vector<128x512xbf16>, vector<8x512xf32> -> vector<8x512xf32>
    %229 = arith.addf %226, %228 : vector<8x512xf32>
    %230 = vector.extract_strided_slice %229 {offsets = [0, 0], sizes = [8, 128], strides = [1, 1]} : vector<8x512xf32> to vector<8x128xf32>
    %cst_87 = arith.constant 5.000000e-01 : f32
    %231 = vector.broadcast %cst_87 : f32 to vector<8x128xf32>
    %232 = arith.mulf %231, %230 : vector<8x128xf32>
    %233 = math.tanh %232 : vector<8x128xf32>
    %cst_88 = arith.constant 5.000000e-01 : f32
    %234 = vector.broadcast %cst_88 : f32 to vector<8x128xf32>
    %235 = arith.mulf %234, %233 : vector<8x128xf32>
    %cst_89 = arith.constant 5.000000e-01 : f32
    %236 = vector.broadcast %cst_89 : f32 to vector<8x128xf32>
    %237 = arith.addf %235, %236 : vector<8x128xf32>
    %238 = vector.extract_strided_slice %229 {offsets = [0, 128], sizes = [8, 128], strides = [1, 1]} : vector<8x512xf32> to vector<8x128xf32>
    %cst_90 = arith.constant 5.000000e-01 : f32
    %239 = vector.broadcast %cst_90 : f32 to vector<8x128xf32>
    %240 = arith.mulf %239, %238 : vector<8x128xf32>
    %241 = math.tanh %240 : vector<8x128xf32>
    %cst_91 = arith.constant 5.000000e-01 : f32
    %242 = vector.broadcast %cst_91 : f32 to vector<8x128xf32>
    %243 = arith.mulf %242, %241 : vector<8x128xf32>
    %cst_92 = arith.constant 5.000000e-01 : f32
    %244 = vector.broadcast %cst_92 : f32 to vector<8x128xf32>
    %245 = arith.addf %243, %244 : vector<8x128xf32>
    %246 = vector.extract_strided_slice %229 {offsets = [0, 256], sizes = [8, 128], strides = [1, 1]} : vector<8x512xf32> to vector<8x128xf32>
    %247 = math.tanh %246 : vector<8x128xf32>
    %248 = vector.extract_strided_slice %229 {offsets = [0, 384], sizes = [8, 128], strides = [1, 1]} : vector<8x512xf32> to vector<8x128xf32>
    %cst_93 = arith.constant 5.000000e-01 : f32
    %249 = vector.broadcast %cst_93 : f32 to vector<8x128xf32>
    %250 = arith.mulf %249, %248 : vector<8x128xf32>
    %251 = math.tanh %250 : vector<8x128xf32>
    %cst_94 = arith.constant 5.000000e-01 : f32
    %252 = vector.broadcast %cst_94 : f32 to vector<8x128xf32>
    %253 = arith.mulf %252, %251 : vector<8x128xf32>
    %cst_95 = arith.constant 5.000000e-01 : f32
    %254 = vector.broadcast %cst_95 : f32 to vector<8x128xf32>
    %255 = arith.addf %253, %254 : vector<8x128xf32>
    %256 = arith.mulf %245, %216 : vector<8x128xf32>
    %257 = arith.mulf %237, %247 : vector<8x128xf32>
    %258 = arith.addf %256, %257 : vector<8x128xf32>
    %259 = math.tanh %258 : vector<8x128xf32>
    %260 = arith.mulf %255, %259 : vector<8x128xf32>
    %261 = arith.index_cast %c5_i32 : i32 to index
    %c0_96 = arith.constant 0 : index
    %c0_97 = arith.constant 0 : index
    %262 = vector.load %arg7[%261, %c0_96, %c0_97] : memref<16x8x128xf32, #tpu.memory_space<vmem>>, vector<1x8x128xf32>
    %263 = vector.shape_cast %262 : vector<1x8x128xf32> to vector<8x128xf32>
    %264 = vector.shape_cast %260 : vector<8x128xf32> to vector<1x8x128xf32>
    tpu.vector_store %arg7[%261, %c0_96, %c0_97], %264 {strides = array<i32>} : memref<16x8x128xf32, #tpu.memory_space<vmem>>, vector<1x8x128xf32>,
    %c6_i32 = arith.constant 6 : i32
    %c8_i32_98 = arith.constant 8 : i32
    %265 = arith.muli %c6_i32, %c8_i32_98 : i32
    %266 = tpu.assume_multiple %265, 8 : i32
    %267 = arith.index_cast %266 : i32 to index
    %c0_99 = arith.constant 0 : index
    %268 = vector.load %arg10[%267, %c0_99] : memref<128x512xf32, #tpu.memory_space<vmem>>, vector<8x512xf32>
    %269 = arith.truncf %260 : vector<8x128xf32> to vector<8x128xbf16>
    %cst_100 = arith.constant dense<0.000000e+00> : vector<8x512xf32>
    %270 = tpu.matmul %269, %10, %cst_100 {dimension_numbers = #tpu.dot_dimension_numbers<[1], [0], [0], [1], [0, 0, 1, 1], [], []>} : vector<8x128xbf16>, vector<128x512xbf16>, vector<8x512xf32> -> vector<8x512xf32>
    %271 = arith.addf %268, %270 : vector<8x512xf32>
    %272 = vector.extract_strided_slice %271 {offsets = [0, 0], sizes = [8, 128], strides = [1, 1]} : vector<8x512xf32> to vector<8x128xf32>
    %cst_101 = arith.constant 5.000000e-01 : f32
    %273 = vector.broadcast %cst_101 : f32 to vector<8x128xf32>
    %274 = arith.mulf %273, %272 : vector<8x128xf32>
    %275 = math.tanh %274 : vector<8x128xf32>
    %cst_102 = arith.constant 5.000000e-01 : f32
    %276 = vector.broadcast %cst_102 : f32 to vector<8x128xf32>
    %277 = arith.mulf %276, %275 : vector<8x128xf32>
    %cst_103 = arith.constant 5.000000e-01 : f32
    %278 = vector.broadcast %cst_103 : f32 to vector<8x128xf32>
    %279 = arith.addf %277, %278 : vector<8x128xf32>
    %280 = vector.extract_strided_slice %271 {offsets = [0, 128], sizes = [8, 128], strides = [1, 1]} : vector<8x512xf32> to vector<8x128xf32>
    %cst_104 = arith.constant 5.000000e-01 : f32
    %281 = vector.broadcast %cst_104 : f32 to vector<8x128xf32>
    %282 = arith.mulf %281, %280 : vector<8x128xf32>
    %283 = math.tanh %282 : vector<8x128xf32>
    %cst_105 = arith.constant 5.000000e-01 : f32
    %284 = vector.broadcast %cst_105 : f32 to vector<8x128xf32>
    %285 = arith.mulf %284, %283 : vector<8x128xf32>
    %cst_106 = arith.constant 5.000000e-01 : f32
    %286 = vector.broadcast %cst_106 : f32 to vector<8x128xf32>
    %287 = arith.addf %285, %286 : vector<8x128xf32>
    %288 = vector.extract_strided_slice %271 {offsets = [0, 256], sizes = [8, 128], strides = [1, 1]} : vector<8x512xf32> to vector<8x128xf32>
    %289 = math.tanh %288 : vector<8x128xf32>
    %290 = vector.extract_strided_slice %271 {offsets = [0, 384], sizes = [8, 128], strides = [1, 1]} : vector<8x512xf32> to vector<8x128xf32>
    %cst_107 = arith.constant 5.000000e-01 : f32
    %291 = vector.broadcast %cst_107 : f32 to vector<8x128xf32>
    %292 = arith.mulf %291, %290 : vector<8x128xf32>
    %293 = math.tanh %292 : vector<8x128xf32>
    %cst_108 = arith.constant 5.000000e-01 : f32
    %294 = vector.broadcast %cst_108 : f32 to vector<8x128xf32>
    %295 = arith.mulf %294, %293 : vector<8x128xf32>
    %cst_109 = arith.constant 5.000000e-01 : f32
    %296 = vector.broadcast %cst_109 : f32 to vector<8x128xf32>
    %297 = arith.addf %295, %296 : vector<8x128xf32>
    %298 = arith.mulf %287, %258 : vector<8x128xf32>
    %299 = arith.mulf %279, %289 : vector<8x128xf32>
    %300 = arith.addf %298, %299 : vector<8x128xf32>
    %301 = math.tanh %300 : vector<8x128xf32>
    %302 = arith.mulf %297, %301 : vector<8x128xf32>
    %303 = arith.index_cast %c6_i32 : i32 to index
    %c0_110 = arith.constant 0 : index
    %c0_111 = arith.constant 0 : index
    %304 = vector.load %arg7[%303, %c0_110, %c0_111] : memref<16x8x128xf32, #tpu.memory_space<vmem>>, vector<1x8x128xf32>
    %305 = vector.shape_cast %304 : vector<1x8x128xf32> to vector<8x128xf32>
    %306 = vector.shape_cast %302 : vector<8x128xf32> to vector<1x8x128xf32>
    tpu.vector_store %arg7[%303, %c0_110, %c0_111], %306 {strides = array<i32>} : memref<16x8x128xf32, #tpu.memory_space<vmem>>, vector<1x8x128xf32>,
    %c7_i32 = arith.constant 7 : i32
    %c8_i32_112 = arith.constant 8 : i32
    %307 = arith.muli %c7_i32, %c8_i32_112 : i32
    %308 = tpu.assume_multiple %307, 8 : i32
    %309 = arith.index_cast %308 : i32 to index
    %c0_113 = arith.constant 0 : index
    %310 = vector.load %arg10[%309, %c0_113] : memref<128x512xf32, #tpu.memory_space<vmem>>, vector<8x512xf32>
    %311 = arith.truncf %302 : vector<8x128xf32> to vector<8x128xbf16>
    %cst_114 = arith.constant dense<0.000000e+00> : vector<8x512xf32>
    %312 = tpu.matmul %311, %10, %cst_114 {dimension_numbers = #tpu.dot_dimension_numbers<[1], [0], [0], [1], [0, 0, 1, 1], [], []>} : vector<8x128xbf16>, vector<128x512xbf16>, vector<8x512xf32> -> vector<8x512xf32>
    %313 = arith.addf %310, %312 : vector<8x512xf32>
    %314 = vector.extract_strided_slice %313 {offsets = [0, 0], sizes = [8, 128], strides = [1, 1]} : vector<8x512xf32> to vector<8x128xf32>
    %cst_115 = arith.constant 5.000000e-01 : f32
    %315 = vector.broadcast %cst_115 : f32 to vector<8x128xf32>
    %316 = arith.mulf %315, %314 : vector<8x128xf32>
    %317 = math.tanh %316 : vector<8x128xf32>
    %cst_116 = arith.constant 5.000000e-01 : f32
    %318 = vector.broadcast %cst_116 : f32 to vector<8x128xf32>
    %319 = arith.mulf %318, %317 : vector<8x128xf32>
    %cst_117 = arith.constant 5.000000e-01 : f32
    %320 = vector.broadcast %cst_117 : f32 to vector<8x128xf32>
    %321 = arith.addf %319, %320 : vector<8x128xf32>
    %322 = vector.extract_strided_slice %313 {offsets = [0, 128], sizes = [8, 128], strides = [1, 1]} : vector<8x512xf32> to vector<8x128xf32>
    %cst_118 = arith.constant 5.000000e-01 : f32
    %323 = vector.broadcast %cst_118 : f32 to vector<8x128xf32>
    %324 = arith.mulf %323, %322 : vector<8x128xf32>
    %325 = math.tanh %324 : vector<8x128xf32>
    %cst_119 = arith.constant 5.000000e-01 : f32
    %326 = vector.broadcast %cst_119 : f32 to vector<8x128xf32>
    %327 = arith.mulf %326, %325 : vector<8x128xf32>
    %cst_120 = arith.constant 5.000000e-01 : f32
    %328 = vector.broadcast %cst_120 : f32 to vector<8x128xf32>
    %329 = arith.addf %327, %328 : vector<8x128xf32>
    %330 = vector.extract_strided_slice %313 {offsets = [0, 256], sizes = [8, 128], strides = [1, 1]} : vector<8x512xf32> to vector<8x128xf32>
    %331 = math.tanh %330 : vector<8x128xf32>
    %332 = vector.extract_strided_slice %313 {offsets = [0, 384], sizes = [8, 128], strides = [1, 1]} : vector<8x512xf32> to vector<8x128xf32>
    %cst_121 = arith.constant 5.000000e-01 : f32
    %333 = vector.broadcast %cst_121 : f32 to vector<8x128xf32>
    %334 = arith.mulf %333, %332 : vector<8x128xf32>
    %335 = math.tanh %334 : vector<8x128xf32>
    %cst_122 = arith.constant 5.000000e-01 : f32
    %336 = vector.broadcast %cst_122 : f32 to vector<8x128xf32>
    %337 = arith.mulf %336, %335 : vector<8x128xf32>
    %cst_123 = arith.constant 5.000000e-01 : f32
    %338 = vector.broadcast %cst_123 : f32 to vector<8x128xf32>
    %339 = arith.addf %337, %338 : vector<8x128xf32>
    %340 = arith.mulf %329, %300 : vector<8x128xf32>
    %341 = arith.mulf %321, %331 : vector<8x128xf32>
    %342 = arith.addf %340, %341 : vector<8x128xf32>
    %343 = math.tanh %342 : vector<8x128xf32>
    %344 = arith.mulf %339, %343 : vector<8x128xf32>
    %345 = arith.index_cast %c7_i32 : i32 to index
    %c0_124 = arith.constant 0 : index
    %c0_125 = arith.constant 0 : index
    %346 = vector.load %arg7[%345, %c0_124, %c0_125] : memref<16x8x128xf32, #tpu.memory_space<vmem>>, vector<1x8x128xf32>
    %347 = vector.shape_cast %346 : vector<1x8x128xf32> to vector<8x128xf32>
    %348 = vector.shape_cast %344 : vector<8x128xf32> to vector<1x8x128xf32>
    tpu.vector_store %arg7[%345, %c0_124, %c0_125], %348 {strides = array<i32>} : memref<16x8x128xf32, #tpu.memory_space<vmem>>, vector<1x8x128xf32>,
    %c8_i32_126 = arith.constant 8 : i32
    %c8_i32_127 = arith.constant 8 : i32
    %349 = arith.muli %c8_i32_126, %c8_i32_127 : i32
    %350 = tpu.assume_multiple %349, 8 : i32
    %351 = arith.index_cast %350 : i32 to index
    %c0_128 = arith.constant 0 : index
    %352 = vector.load %arg10[%351, %c0_128] : memref<128x512xf32, #tpu.memory_space<vmem>>, vector<8x512xf32>
    %353 = arith.truncf %344 : vector<8x128xf32> to vector<8x128xbf16>
    %cst_129 = arith.constant dense<0.000000e+00> : vector<8x512xf32>
    %354 = tpu.matmul %353, %10, %cst_129 {dimension_numbers = #tpu.dot_dimension_numbers<[1], [0], [0], [1], [0, 0, 1, 1], [], []>} : vector<8x128xbf16>, vector<128x512xbf16>, vector<8x512xf32> -> vector<8x512xf32>
    %355 = arith.addf %352, %354 : vector<8x512xf32>
    %356 = vector.extract_strided_slice %355 {offsets = [0, 0], sizes = [8, 128], strides = [1, 1]} : vector<8x512xf32> to vector<8x128xf32>
    %cst_130 = arith.constant 5.000000e-01 : f32
    %357 = vector.broadcast %cst_130 : f32 to vector<8x128xf32>
    %358 = arith.mulf %357, %356 : vector<8x128xf32>
    %359 = math.tanh %358 : vector<8x128xf32>
    %cst_131 = arith.constant 5.000000e-01 : f32
    %360 = vector.broadcast %cst_131 : f32 to vector<8x128xf32>
    %361 = arith.mulf %360, %359 : vector<8x128xf32>
    %cst_132 = arith.constant 5.000000e-01 : f32
    %362 = vector.broadcast %cst_132 : f32 to vector<8x128xf32>
    %363 = arith.addf %361, %362 : vector<8x128xf32>
    %364 = vector.extract_strided_slice %355 {offsets = [0, 128], sizes = [8, 128], strides = [1, 1]} : vector<8x512xf32> to vector<8x128xf32>
    %cst_133 = arith.constant 5.000000e-01 : f32
    %365 = vector.broadcast %cst_133 : f32 to vector<8x128xf32>
    %366 = arith.mulf %365, %364 : vector<8x128xf32>
    %367 = math.tanh %366 : vector<8x128xf32>
    %cst_134 = arith.constant 5.000000e-01 : f32
    %368 = vector.broadcast %cst_134 : f32 to vector<8x128xf32>
    %369 = arith.mulf %368, %367 : vector<8x128xf32>
    %cst_135 = arith.constant 5.000000e-01 : f32
    %370 = vector.broadcast %cst_135 : f32 to vector<8x128xf32>
    %371 = arith.addf %369, %370 : vector<8x128xf32>
    %372 = vector.extract_strided_slice %355 {offsets = [0, 256], sizes = [8, 128], strides = [1, 1]} : vector<8x512xf32> to vector<8x128xf32>
    %373 = math.tanh %372 : vector<8x128xf32>
    %374 = vector.extract_strided_slice %355 {offsets = [0, 384], sizes = [8, 128], strides = [1, 1]} : vector<8x512xf32> to vector<8x128xf32>
    %cst_136 = arith.constant 5.000000e-01 : f32
    %375 = vector.broadcast %cst_136 : f32 to vector<8x128xf32>
    %376 = arith.mulf %375, %374 : vector<8x128xf32>
    %377 = math.tanh %376 : vector<8x128xf32>
    %cst_137 = arith.constant 5.000000e-01 : f32
    %378 = vector.broadcast %cst_137 : f32 to vector<8x128xf32>
    %379 = arith.mulf %378, %377 : vector<8x128xf32>
    %cst_138 = arith.constant 5.000000e-01 : f32
    %380 = vector.broadcast %cst_138 : f32 to vector<8x128xf32>
    %381 = arith.addf %379, %380 : vector<8x128xf32>
    %382 = arith.mulf %371, %342 : vector<8x128xf32>
    %383 = arith.mulf %363, %373 : vector<8x128xf32>
    %384 = arith.addf %382, %383 : vector<8x128xf32>
    %385 = math.tanh %384 : vector<8x128xf32>
    %386 = arith.mulf %381, %385 : vector<8x128xf32>
    %387 = arith.index_cast %c8_i32_126 : i32 to index
    %c0_139 = arith.constant 0 : index
    %c0_140 = arith.constant 0 : index
    %388 = vector.load %arg7[%387, %c0_139, %c0_140] : memref<16x8x128xf32, #tpu.memory_space<vmem>>, vector<1x8x128xf32>
    %389 = vector.shape_cast %388 : vector<1x8x128xf32> to vector<8x128xf32>
    %390 = vector.shape_cast %386 : vector<8x128xf32> to vector<1x8x128xf32>
    tpu.vector_store %arg7[%387, %c0_139, %c0_140], %390 {strides = array<i32>} : memref<16x8x128xf32, #tpu.memory_space<vmem>>, vector<1x8x128xf32>,
    %c9_i32 = arith.constant 9 : i32
    %c8_i32_141 = arith.constant 8 : i32
    %391 = arith.muli %c9_i32, %c8_i32_141 : i32
    %392 = tpu.assume_multiple %391, 8 : i32
    %393 = arith.index_cast %392 : i32 to index
    %c0_142 = arith.constant 0 : index
    %394 = vector.load %arg10[%393, %c0_142] : memref<128x512xf32, #tpu.memory_space<vmem>>, vector<8x512xf32>
    %395 = arith.truncf %386 : vector<8x128xf32> to vector<8x128xbf16>
    %cst_143 = arith.constant dense<0.000000e+00> : vector<8x512xf32>
    %396 = tpu.matmul %395, %10, %cst_143 {dimension_numbers = #tpu.dot_dimension_numbers<[1], [0], [0], [1], [0, 0, 1, 1], [], []>} : vector<8x128xbf16>, vector<128x512xbf16>, vector<8x512xf32> -> vector<8x512xf32>
    %397 = arith.addf %394, %396 : vector<8x512xf32>
    %398 = vector.extract_strided_slice %397 {offsets = [0, 0], sizes = [8, 128], strides = [1, 1]} : vector<8x512xf32> to vector<8x128xf32>
    %cst_144 = arith.constant 5.000000e-01 : f32
    %399 = vector.broadcast %cst_144 : f32 to vector<8x128xf32>
    %400 = arith.mulf %399, %398 : vector<8x128xf32>
    %401 = math.tanh %400 : vector<8x128xf32>
    %cst_145 = arith.constant 5.000000e-01 : f32
    %402 = vector.broadcast %cst_145 : f32 to vector<8x128xf32>
    %403 = arith.mulf %402, %401 : vector<8x128xf32>
    %cst_146 = arith.constant 5.000000e-01 : f32
    %404 = vector.broadcast %cst_146 : f32 to vector<8x128xf32>
    %405 = arith.addf %403, %404 : vector<8x128xf32>
    %406 = vector.extract_strided_slice %397 {offsets = [0, 128], sizes = [8, 128], strides = [1, 1]} : vector<8x512xf32> to vector<8x128xf32>
    %cst_147 = arith.constant 5.000000e-01 : f32
    %407 = vector.broadcast %cst_147 : f32 to vector<8x128xf32>
    %408 = arith.mulf %407, %406 : vector<8x128xf32>
    %409 = math.tanh %408 : vector<8x128xf32>
    %cst_148 = arith.constant 5.000000e-01 : f32
    %410 = vector.broadcast %cst_148 : f32 to vector<8x128xf32>
    %411 = arith.mulf %410, %409 : vector<8x128xf32>
    %cst_149 = arith.constant 5.000000e-01 : f32
    %412 = vector.broadcast %cst_149 : f32 to vector<8x128xf32>
    %413 = arith.addf %411, %412 : vector<8x128xf32>
    %414 = vector.extract_strided_slice %397 {offsets = [0, 256], sizes = [8, 128], strides = [1, 1]} : vector<8x512xf32> to vector<8x128xf32>
    %415 = math.tanh %414 : vector<8x128xf32>
    %416 = vector.extract_strided_slice %397 {offsets = [0, 384], sizes = [8, 128], strides = [1, 1]} : vector<8x512xf32> to vector<8x128xf32>
    %cst_150 = arith.constant 5.000000e-01 : f32
    %417 = vector.broadcast %cst_150 : f32 to vector<8x128xf32>
    %418 = arith.mulf %417, %416 : vector<8x128xf32>
    %419 = math.tanh %418 : vector<8x128xf32>
    %cst_151 = arith.constant 5.000000e-01 : f32
    %420 = vector.broadcast %cst_151 : f32 to vector<8x128xf32>
    %421 = arith.mulf %420, %419 : vector<8x128xf32>
    %cst_152 = arith.constant 5.000000e-01 : f32
    %422 = vector.broadcast %cst_152 : f32 to vector<8x128xf32>
    %423 = arith.addf %421, %422 : vector<8x128xf32>
    %424 = arith.mulf %413, %384 : vector<8x128xf32>
    %425 = arith.mulf %405, %415 : vector<8x128xf32>
    %426 = arith.addf %424, %425 : vector<8x128xf32>
    %427 = math.tanh %426 : vector<8x128xf32>
    %428 = arith.mulf %423, %427 : vector<8x128xf32>
    %429 = arith.index_cast %c9_i32 : i32 to index
    %c0_153 = arith.constant 0 : index
    %c0_154 = arith.constant 0 : index
    %430 = vector.load %arg7[%429, %c0_153, %c0_154] : memref<16x8x128xf32, #tpu.memory_space<vmem>>, vector<1x8x128xf32>
    %431 = vector.shape_cast %430 : vector<1x8x128xf32> to vector<8x128xf32>
    %432 = vector.shape_cast %428 : vector<8x128xf32> to vector<1x8x128xf32>
    tpu.vector_store %arg7[%429, %c0_153, %c0_154], %432 {strides = array<i32>} : memref<16x8x128xf32, #tpu.memory_space<vmem>>, vector<1x8x128xf32>,
    %c10_i32 = arith.constant 10 : i32
    %c8_i32_155 = arith.constant 8 : i32
    %433 = arith.muli %c10_i32, %c8_i32_155 : i32
    %434 = tpu.assume_multiple %433, 8 : i32
    %435 = arith.index_cast %434 : i32 to index
    %c0_156 = arith.constant 0 : index
    %436 = vector.load %arg10[%435, %c0_156] : memref<128x512xf32, #tpu.memory_space<vmem>>, vector<8x512xf32>
    %437 = arith.truncf %428 : vector<8x128xf32> to vector<8x128xbf16>
    %cst_157 = arith.constant dense<0.000000e+00> : vector<8x512xf32>
    %438 = tpu.matmul %437, %10, %cst_157 {dimension_numbers = #tpu.dot_dimension_numbers<[1], [0], [0], [1], [0, 0, 1, 1], [], []>} : vector<8x128xbf16>, vector<128x512xbf16>, vector<8x512xf32> -> vector<8x512xf32>
    %439 = arith.addf %436, %438 : vector<8x512xf32>
    %440 = vector.extract_strided_slice %439 {offsets = [0, 0], sizes = [8, 128], strides = [1, 1]} : vector<8x512xf32> to vector<8x128xf32>
    %cst_158 = arith.constant 5.000000e-01 : f32
    %441 = vector.broadcast %cst_158 : f32 to vector<8x128xf32>
    %442 = arith.mulf %441, %440 : vector<8x128xf32>
    %443 = math.tanh %442 : vector<8x128xf32>
    %cst_159 = arith.constant 5.000000e-01 : f32
    %444 = vector.broadcast %cst_159 : f32 to vector<8x128xf32>
    %445 = arith.mulf %444, %443 : vector<8x128xf32>
    %cst_160 = arith.constant 5.000000e-01 : f32
    %446 = vector.broadcast %cst_160 : f32 to vector<8x128xf32>
    %447 = arith.addf %445, %446 : vector<8x128xf32>
    %448 = vector.extract_strided_slice %439 {offsets = [0, 128], sizes = [8, 128], strides = [1, 1]} : vector<8x512xf32> to vector<8x128xf32>
    %cst_161 = arith.constant 5.000000e-01 : f32
    %449 = vector.broadcast %cst_161 : f32 to vector<8x128xf32>
    %450 = arith.mulf %449, %448 : vector<8x128xf32>
    %451 = math.tanh %450 : vector<8x128xf32>
    %cst_162 = arith.constant 5.000000e-01 : f32
    %452 = vector.broadcast %cst_162 : f32 to vector<8x128xf32>
    %453 = arith.mulf %452, %451 : vector<8x128xf32>
    %cst_163 = arith.constant 5.000000e-01 : f32
    %454 = vector.broadcast %cst_163 : f32 to vector<8x128xf32>
    %455 = arith.addf %453, %454 : vector<8x128xf32>
    %456 = vector.extract_strided_slice %439 {offsets = [0, 256], sizes = [8, 128], strides = [1, 1]} : vector<8x512xf32> to vector<8x128xf32>
    %457 = math.tanh %456 : vector<8x128xf32>
    %458 = vector.extract_strided_slice %439 {offsets = [0, 384], sizes = [8, 128], strides = [1, 1]} : vector<8x512xf32> to vector<8x128xf32>
    %cst_164 = arith.constant 5.000000e-01 : f32
    %459 = vector.broadcast %cst_164 : f32 to vector<8x128xf32>
    %460 = arith.mulf %459, %458 : vector<8x128xf32>
    %461 = math.tanh %460 : vector<8x128xf32>
    %cst_165 = arith.constant 5.000000e-01 : f32
    %462 = vector.broadcast %cst_165 : f32 to vector<8x128xf32>
    %463 = arith.mulf %462, %461 : vector<8x128xf32>
    %cst_166 = arith.constant 5.000000e-01 : f32
    %464 = vector.broadcast %cst_166 : f32 to vector<8x128xf32>
    %465 = arith.addf %463, %464 : vector<8x128xf32>
    %466 = arith.mulf %455, %426 : vector<8x128xf32>
    %467 = arith.mulf %447, %457 : vector<8x128xf32>
    %468 = arith.addf %466, %467 : vector<8x128xf32>
    %469 = math.tanh %468 : vector<8x128xf32>
    %470 = arith.mulf %465, %469 : vector<8x128xf32>
    %471 = arith.index_cast %c10_i32 : i32 to index
    %c0_167 = arith.constant 0 : index
    %c0_168 = arith.constant 0 : index
    %472 = vector.load %arg7[%471, %c0_167, %c0_168] : memref<16x8x128xf32, #tpu.memory_space<vmem>>, vector<1x8x128xf32>
    %473 = vector.shape_cast %472 : vector<1x8x128xf32> to vector<8x128xf32>
    %474 = vector.shape_cast %470 : vector<8x128xf32> to vector<1x8x128xf32>
    tpu.vector_store %arg7[%471, %c0_167, %c0_168], %474 {strides = array<i32>} : memref<16x8x128xf32, #tpu.memory_space<vmem>>, vector<1x8x128xf32>,
    %c11_i32 = arith.constant 11 : i32
    %c8_i32_169 = arith.constant 8 : i32
    %475 = arith.muli %c11_i32, %c8_i32_169 : i32
    %476 = tpu.assume_multiple %475, 8 : i32
    %477 = arith.index_cast %476 : i32 to index
    %c0_170 = arith.constant 0 : index
    %478 = vector.load %arg10[%477, %c0_170] : memref<128x512xf32, #tpu.memory_space<vmem>>, vector<8x512xf32>
    %479 = arith.truncf %470 : vector<8x128xf32> to vector<8x128xbf16>
    %cst_171 = arith.constant dense<0.000000e+00> : vector<8x512xf32>
    %480 = tpu.matmul %479, %10, %cst_171 {dimension_numbers = #tpu.dot_dimension_numbers<[1], [0], [0], [1], [0, 0, 1, 1], [], []>} : vector<8x128xbf16>, vector<128x512xbf16>, vector<8x512xf32> -> vector<8x512xf32>
    %481 = arith.addf %478, %480 : vector<8x512xf32>
    %482 = vector.extract_strided_slice %481 {offsets = [0, 0], sizes = [8, 128], strides = [1, 1]} : vector<8x512xf32> to vector<8x128xf32>
    %cst_172 = arith.constant 5.000000e-01 : f32
    %483 = vector.broadcast %cst_172 : f32 to vector<8x128xf32>
    %484 = arith.mulf %483, %482 : vector<8x128xf32>
    %485 = math.tanh %484 : vector<8x128xf32>
    %cst_173 = arith.constant 5.000000e-01 : f32
    %486 = vector.broadcast %cst_173 : f32 to vector<8x128xf32>
    %487 = arith.mulf %486, %485 : vector<8x128xf32>
    %cst_174 = arith.constant 5.000000e-01 : f32
    %488 = vector.broadcast %cst_174 : f32 to vector<8x128xf32>
    %489 = arith.addf %487, %488 : vector<8x128xf32>
    %490 = vector.extract_strided_slice %481 {offsets = [0, 128], sizes = [8, 128], strides = [1, 1]} : vector<8x512xf32> to vector<8x128xf32>
    %cst_175 = arith.constant 5.000000e-01 : f32
    %491 = vector.broadcast %cst_175 : f32 to vector<8x128xf32>
    %492 = arith.mulf %491, %490 : vector<8x128xf32>
    %493 = math.tanh %492 : vector<8x128xf32>
    %cst_176 = arith.constant 5.000000e-01 : f32
    %494 = vector.broadcast %cst_176 : f32 to vector<8x128xf32>
    %495 = arith.mulf %494, %493 : vector<8x128xf32>
    %cst_177 = arith.constant 5.000000e-01 : f32
    %496 = vector.broadcast %cst_177 : f32 to vector<8x128xf32>
    %497 = arith.addf %495, %496 : vector<8x128xf32>
    %498 = vector.extract_strided_slice %481 {offsets = [0, 256], sizes = [8, 128], strides = [1, 1]} : vector<8x512xf32> to vector<8x128xf32>
    %499 = math.tanh %498 : vector<8x128xf32>
    %500 = vector.extract_strided_slice %481 {offsets = [0, 384], sizes = [8, 128], strides = [1, 1]} : vector<8x512xf32> to vector<8x128xf32>
    %cst_178 = arith.constant 5.000000e-01 : f32
    %501 = vector.broadcast %cst_178 : f32 to vector<8x128xf32>
    %502 = arith.mulf %501, %500 : vector<8x128xf32>
    %503 = math.tanh %502 : vector<8x128xf32>
    %cst_179 = arith.constant 5.000000e-01 : f32
    %504 = vector.broadcast %cst_179 : f32 to vector<8x128xf32>
    %505 = arith.mulf %504, %503 : vector<8x128xf32>
    %cst_180 = arith.constant 5.000000e-01 : f32
    %506 = vector.broadcast %cst_180 : f32 to vector<8x128xf32>
    %507 = arith.addf %505, %506 : vector<8x128xf32>
    %508 = arith.mulf %497, %468 : vector<8x128xf32>
    %509 = arith.mulf %489, %499 : vector<8x128xf32>
    %510 = arith.addf %508, %509 : vector<8x128xf32>
    %511 = math.tanh %510 : vector<8x128xf32>
    %512 = arith.mulf %507, %511 : vector<8x128xf32>
    %513 = arith.index_cast %c11_i32 : i32 to index
    %c0_181 = arith.constant 0 : index
    %c0_182 = arith.constant 0 : index
    %514 = vector.load %arg7[%513, %c0_181, %c0_182] : memref<16x8x128xf32, #tpu.memory_space<vmem>>, vector<1x8x128xf32>
    %515 = vector.shape_cast %514 : vector<1x8x128xf32> to vector<8x128xf32>
    %516 = vector.shape_cast %512 : vector<8x128xf32> to vector<1x8x128xf32>
    tpu.vector_store %arg7[%513, %c0_181, %c0_182], %516 {strides = array<i32>} : memref<16x8x128xf32, #tpu.memory_space<vmem>>, vector<1x8x128xf32>,
    %c12_i32 = arith.constant 12 : i32
    %c8_i32_183 = arith.constant 8 : i32
    %517 = arith.muli %c12_i32, %c8_i32_183 : i32
    %518 = tpu.assume_multiple %517, 8 : i32
    %519 = arith.index_cast %518 : i32 to index
    %c0_184 = arith.constant 0 : index
    %520 = vector.load %arg10[%519, %c0_184] : memref<128x512xf32, #tpu.memory_space<vmem>>, vector<8x512xf32>
    %521 = arith.truncf %512 : vector<8x128xf32> to vector<8x128xbf16>
    %cst_185 = arith.constant dense<0.000000e+00> : vector<8x512xf32>
    %522 = tpu.matmul %521, %10, %cst_185 {dimension_numbers = #tpu.dot_dimension_numbers<[1], [0], [0], [1], [0, 0, 1, 1], [], []>} : vector<8x128xbf16>, vector<128x512xbf16>, vector<8x512xf32> -> vector<8x512xf32>
    %523 = arith.addf %520, %522 : vector<8x512xf32>
    %524 = vector.extract_strided_slice %523 {offsets = [0, 0], sizes = [8, 128], strides = [1, 1]} : vector<8x512xf32> to vector<8x128xf32>
    %cst_186 = arith.constant 5.000000e-01 : f32
    %525 = vector.broadcast %cst_186 : f32 to vector<8x128xf32>
    %526 = arith.mulf %525, %524 : vector<8x128xf32>
    %527 = math.tanh %526 : vector<8x128xf32>
    %cst_187 = arith.constant 5.000000e-01 : f32
    %528 = vector.broadcast %cst_187 : f32 to vector<8x128xf32>
    %529 = arith.mulf %528, %527 : vector<8x128xf32>
    %cst_188 = arith.constant 5.000000e-01 : f32
    %530 = vector.broadcast %cst_188 : f32 to vector<8x128xf32>
    %531 = arith.addf %529, %530 : vector<8x128xf32>
    %532 = vector.extract_strided_slice %523 {offsets = [0, 128], sizes = [8, 128], strides = [1, 1]} : vector<8x512xf32> to vector<8x128xf32>
    %cst_189 = arith.constant 5.000000e-01 : f32
    %533 = vector.broadcast %cst_189 : f32 to vector<8x128xf32>
    %534 = arith.mulf %533, %532 : vector<8x128xf32>
    %535 = math.tanh %534 : vector<8x128xf32>
    %cst_190 = arith.constant 5.000000e-01 : f32
    %536 = vector.broadcast %cst_190 : f32 to vector<8x128xf32>
    %537 = arith.mulf %536, %535 : vector<8x128xf32>
    %cst_191 = arith.constant 5.000000e-01 : f32
    %538 = vector.broadcast %cst_191 : f32 to vector<8x128xf32>
    %539 = arith.addf %537, %538 : vector<8x128xf32>
    %540 = vector.extract_strided_slice %523 {offsets = [0, 256], sizes = [8, 128], strides = [1, 1]} : vector<8x512xf32> to vector<8x128xf32>
    %541 = math.tanh %540 : vector<8x128xf32>
    %542 = vector.extract_strided_slice %523 {offsets = [0, 384], sizes = [8, 128], strides = [1, 1]} : vector<8x512xf32> to vector<8x128xf32>
    %cst_192 = arith.constant 5.000000e-01 : f32
    %543 = vector.broadcast %cst_192 : f32 to vector<8x128xf32>
    %544 = arith.mulf %543, %542 : vector<8x128xf32>
    %545 = math.tanh %544 : vector<8x128xf32>
    %cst_193 = arith.constant 5.000000e-01 : f32
    %546 = vector.broadcast %cst_193 : f32 to vector<8x128xf32>
    %547 = arith.mulf %546, %545 : vector<8x128xf32>
    %cst_194 = arith.constant 5.000000e-01 : f32
    %548 = vector.broadcast %cst_194 : f32 to vector<8x128xf32>
    %549 = arith.addf %547, %548 : vector<8x128xf32>
    %550 = arith.mulf %539, %510 : vector<8x128xf32>
    %551 = arith.mulf %531, %541 : vector<8x128xf32>
    %552 = arith.addf %550, %551 : vector<8x128xf32>
    %553 = math.tanh %552 : vector<8x128xf32>
    %554 = arith.mulf %549, %553 : vector<8x128xf32>
    %555 = arith.index_cast %c12_i32 : i32 to index
    %c0_195 = arith.constant 0 : index
    %c0_196 = arith.constant 0 : index
    %556 = vector.load %arg7[%555, %c0_195, %c0_196] : memref<16x8x128xf32, #tpu.memory_space<vmem>>, vector<1x8x128xf32>
    %557 = vector.shape_cast %556 : vector<1x8x128xf32> to vector<8x128xf32>
    %558 = vector.shape_cast %554 : vector<8x128xf32> to vector<1x8x128xf32>
    tpu.vector_store %arg7[%555, %c0_195, %c0_196], %558 {strides = array<i32>} : memref<16x8x128xf32, #tpu.memory_space<vmem>>, vector<1x8x128xf32>,
    %c13_i32 = arith.constant 13 : i32
    %c8_i32_197 = arith.constant 8 : i32
    %559 = arith.muli %c13_i32, %c8_i32_197 : i32
    %560 = tpu.assume_multiple %559, 8 : i32
    %561 = arith.index_cast %560 : i32 to index
    %c0_198 = arith.constant 0 : index
    %562 = vector.load %arg10[%561, %c0_198] : memref<128x512xf32, #tpu.memory_space<vmem>>, vector<8x512xf32>
    %563 = arith.truncf %554 : vector<8x128xf32> to vector<8x128xbf16>
    %cst_199 = arith.constant dense<0.000000e+00> : vector<8x512xf32>
    %564 = tpu.matmul %563, %10, %cst_199 {dimension_numbers = #tpu.dot_dimension_numbers<[1], [0], [0], [1], [0, 0, 1, 1], [], []>} : vector<8x128xbf16>, vector<128x512xbf16>, vector<8x512xf32> -> vector<8x512xf32>
    %565 = arith.addf %562, %564 : vector<8x512xf32>
    %566 = vector.extract_strided_slice %565 {offsets = [0, 0], sizes = [8, 128], strides = [1, 1]} : vector<8x512xf32> to vector<8x128xf32>
    %cst_200 = arith.constant 5.000000e-01 : f32
    %567 = vector.broadcast %cst_200 : f32 to vector<8x128xf32>
    %568 = arith.mulf %567, %566 : vector<8x128xf32>
    %569 = math.tanh %568 : vector<8x128xf32>
    %cst_201 = arith.constant 5.000000e-01 : f32
    %570 = vector.broadcast %cst_201 : f32 to vector<8x128xf32>
    %571 = arith.mulf %570, %569 : vector<8x128xf32>
    %cst_202 = arith.constant 5.000000e-01 : f32
    %572 = vector.broadcast %cst_202 : f32 to vector<8x128xf32>
    %573 = arith.addf %571, %572 : vector<8x128xf32>
    %574 = vector.extract_strided_slice %565 {offsets = [0, 128], sizes = [8, 128], strides = [1, 1]} : vector<8x512xf32> to vector<8x128xf32>
    %cst_203 = arith.constant 5.000000e-01 : f32
    %575 = vector.broadcast %cst_203 : f32 to vector<8x128xf32>
    %576 = arith.mulf %575, %574 : vector<8x128xf32>
    %577 = math.tanh %576 : vector<8x128xf32>
    %cst_204 = arith.constant 5.000000e-01 : f32
    %578 = vector.broadcast %cst_204 : f32 to vector<8x128xf32>
    %579 = arith.mulf %578, %577 : vector<8x128xf32>
    %cst_205 = arith.constant 5.000000e-01 : f32
    %580 = vector.broadcast %cst_205 : f32 to vector<8x128xf32>
    %581 = arith.addf %579, %580 : vector<8x128xf32>
    %582 = vector.extract_strided_slice %565 {offsets = [0, 256], sizes = [8, 128], strides = [1, 1]} : vector<8x512xf32> to vector<8x128xf32>
    %583 = math.tanh %582 : vector<8x128xf32>
    %584 = vector.extract_strided_slice %565 {offsets = [0, 384], sizes = [8, 128], strides = [1, 1]} : vector<8x512xf32> to vector<8x128xf32>
    %cst_206 = arith.constant 5.000000e-01 : f32
    %585 = vector.broadcast %cst_206 : f32 to vector<8x128xf32>
    %586 = arith.mulf %585, %584 : vector<8x128xf32>
    %587 = math.tanh %586 : vector<8x128xf32>
    %cst_207 = arith.constant 5.000000e-01 : f32
    %588 = vector.broadcast %cst_207 : f32 to vector<8x128xf32>
    %589 = arith.mulf %588, %587 : vector<8x128xf32>
    %cst_208 = arith.constant 5.000000e-01 : f32
    %590 = vector.broadcast %cst_208 : f32 to vector<8x128xf32>
    %591 = arith.addf %589, %590 : vector<8x128xf32>
    %592 = arith.mulf %581, %552 : vector<8x128xf32>
    %593 = arith.mulf %573, %583 : vector<8x128xf32>
    %594 = arith.addf %592, %593 : vector<8x128xf32>
    %595 = math.tanh %594 : vector<8x128xf32>
    %596 = arith.mulf %591, %595 : vector<8x128xf32>
    %597 = arith.index_cast %c13_i32 : i32 to index
    %c0_209 = arith.constant 0 : index
    %c0_210 = arith.constant 0 : index
    %598 = vector.load %arg7[%597, %c0_209, %c0_210] : memref<16x8x128xf32, #tpu.memory_space<vmem>>, vector<1x8x128xf32>
    %599 = vector.shape_cast %598 : vector<1x8x128xf32> to vector<8x128xf32>
    %600 = vector.shape_cast %596 : vector<8x128xf32> to vector<1x8x128xf32>
    tpu.vector_store %arg7[%597, %c0_209, %c0_210], %600 {strides = array<i32>} : memref<16x8x128xf32, #tpu.memory_space<vmem>>, vector<1x8x128xf32>,
    %c14_i32 = arith.constant 14 : i32
    %c8_i32_211 = arith.constant 8 : i32
    %601 = arith.muli %c14_i32, %c8_i32_211 : i32
    %602 = tpu.assume_multiple %601, 8 : i32
    %603 = arith.index_cast %602 : i32 to index
    %c0_212 = arith.constant 0 : index
    %604 = vector.load %arg10[%603, %c0_212] : memref<128x512xf32, #tpu.memory_space<vmem>>, vector<8x512xf32>
    %605 = arith.truncf %596 : vector<8x128xf32> to vector<8x128xbf16>
    %cst_213 = arith.constant dense<0.000000e+00> : vector<8x512xf32>
    %606 = tpu.matmul %605, %10, %cst_213 {dimension_numbers = #tpu.dot_dimension_numbers<[1], [0], [0], [1], [0, 0, 1, 1], [], []>} : vector<8x128xbf16>, vector<128x512xbf16>, vector<8x512xf32> -> vector<8x512xf32>
    %607 = arith.addf %604, %606 : vector<8x512xf32>
    %608 = vector.extract_strided_slice %607 {offsets = [0, 0], sizes = [8, 128], strides = [1, 1]} : vector<8x512xf32> to vector<8x128xf32>
    %cst_214 = arith.constant 5.000000e-01 : f32
    %609 = vector.broadcast %cst_214 : f32 to vector<8x128xf32>
    %610 = arith.mulf %609, %608 : vector<8x128xf32>
    %611 = math.tanh %610 : vector<8x128xf32>
    %cst_215 = arith.constant 5.000000e-01 : f32
    %612 = vector.broadcast %cst_215 : f32 to vector<8x128xf32>
    %613 = arith.mulf %612, %611 : vector<8x128xf32>
    %cst_216 = arith.constant 5.000000e-01 : f32
    %614 = vector.broadcast %cst_216 : f32 to vector<8x128xf32>
    %615 = arith.addf %613, %614 : vector<8x128xf32>
    %616 = vector.extract_strided_slice %607 {offsets = [0, 128], sizes = [8, 128], strides = [1, 1]} : vector<8x512xf32> to vector<8x128xf32>
    %cst_217 = arith.constant 5.000000e-01 : f32
    %617 = vector.broadcast %cst_217 : f32 to vector<8x128xf32>
    %618 = arith.mulf %617, %616 : vector<8x128xf32>
    %619 = math.tanh %618 : vector<8x128xf32>
    %cst_218 = arith.constant 5.000000e-01 : f32
    %620 = vector.broadcast %cst_218 : f32 to vector<8x128xf32>
    %621 = arith.mulf %620, %619 : vector<8x128xf32>
    %cst_219 = arith.constant 5.000000e-01 : f32
    %622 = vector.broadcast %cst_219 : f32 to vector<8x128xf32>
    %623 = arith.addf %621, %622 : vector<8x128xf32>
    %624 = vector.extract_strided_slice %607 {offsets = [0, 256], sizes = [8, 128], strides = [1, 1]} : vector<8x512xf32> to vector<8x128xf32>
    %625 = math.tanh %624 : vector<8x128xf32>
    %626 = vector.extract_strided_slice %607 {offsets = [0, 384], sizes = [8, 128], strides = [1, 1]} : vector<8x512xf32> to vector<8x128xf32>
    %cst_220 = arith.constant 5.000000e-01 : f32
    %627 = vector.broadcast %cst_220 : f32 to vector<8x128xf32>
    %628 = arith.mulf %627, %626 : vector<8x128xf32>
    %629 = math.tanh %628 : vector<8x128xf32>
    %cst_221 = arith.constant 5.000000e-01 : f32
    %630 = vector.broadcast %cst_221 : f32 to vector<8x128xf32>
    %631 = arith.mulf %630, %629 : vector<8x128xf32>
    %cst_222 = arith.constant 5.000000e-01 : f32
    %632 = vector.broadcast %cst_222 : f32 to vector<8x128xf32>
    %633 = arith.addf %631, %632 : vector<8x128xf32>
    %634 = arith.mulf %623, %594 : vector<8x128xf32>
    %635 = arith.mulf %615, %625 : vector<8x128xf32>
    %636 = arith.addf %634, %635 : vector<8x128xf32>
    %637 = math.tanh %636 : vector<8x128xf32>
    %638 = arith.mulf %633, %637 : vector<8x128xf32>
    %639 = arith.index_cast %c14_i32 : i32 to index
    %c0_223 = arith.constant 0 : index
    %c0_224 = arith.constant 0 : index
    %640 = vector.load %arg7[%639, %c0_223, %c0_224] : memref<16x8x128xf32, #tpu.memory_space<vmem>>, vector<1x8x128xf32>
    %641 = vector.shape_cast %640 : vector<1x8x128xf32> to vector<8x128xf32>
    %642 = vector.shape_cast %638 : vector<8x128xf32> to vector<1x8x128xf32>
    tpu.vector_store %arg7[%639, %c0_223, %c0_224], %642 {strides = array<i32>} : memref<16x8x128xf32, #tpu.memory_space<vmem>>, vector<1x8x128xf32>,
    %c15_i32 = arith.constant 15 : i32
    %c8_i32_225 = arith.constant 8 : i32
    %643 = arith.muli %c15_i32, %c8_i32_225 : i32
    %644 = tpu.assume_multiple %643, 8 : i32
    %645 = arith.index_cast %644 : i32 to index
    %c0_226 = arith.constant 0 : index
    %646 = vector.load %arg10[%645, %c0_226] : memref<128x512xf32, #tpu.memory_space<vmem>>, vector<8x512xf32>
    %647 = arith.truncf %638 : vector<8x128xf32> to vector<8x128xbf16>
    %cst_227 = arith.constant dense<0.000000e+00> : vector<8x512xf32>
    %648 = tpu.matmul %647, %10, %cst_227 {dimension_numbers = #tpu.dot_dimension_numbers<[1], [0], [0], [1], [0, 0, 1, 1], [], []>} : vector<8x128xbf16>, vector<128x512xbf16>, vector<8x512xf32> -> vector<8x512xf32>
    %649 = arith.addf %646, %648 : vector<8x512xf32>
    %650 = vector.extract_strided_slice %649 {offsets = [0, 0], sizes = [8, 128], strides = [1, 1]} : vector<8x512xf32> to vector<8x128xf32>
    %cst_228 = arith.constant 5.000000e-01 : f32
    %651 = vector.broadcast %cst_228 : f32 to vector<8x128xf32>
    %652 = arith.mulf %651, %650 : vector<8x128xf32>
    %653 = math.tanh %652 : vector<8x128xf32>
    %cst_229 = arith.constant 5.000000e-01 : f32
    %654 = vector.broadcast %cst_229 : f32 to vector<8x128xf32>
    %655 = arith.mulf %654, %653 : vector<8x128xf32>
    %cst_230 = arith.constant 5.000000e-01 : f32
    %656 = vector.broadcast %cst_230 : f32 to vector<8x128xf32>
    %657 = arith.addf %655, %656 : vector<8x128xf32>
    %658 = vector.extract_strided_slice %649 {offsets = [0, 128], sizes = [8, 128], strides = [1, 1]} : vector<8x512xf32> to vector<8x128xf32>
    %cst_231 = arith.constant 5.000000e-01 : f32
    %659 = vector.broadcast %cst_231 : f32 to vector<8x128xf32>
    %660 = arith.mulf %659, %658 : vector<8x128xf32>
    %661 = math.tanh %660 : vector<8x128xf32>
    %cst_232 = arith.constant 5.000000e-01 : f32
    %662 = vector.broadcast %cst_232 : f32 to vector<8x128xf32>
    %663 = arith.mulf %662, %661 : vector<8x128xf32>
    %cst_233 = arith.constant 5.000000e-01 : f32
    %664 = vector.broadcast %cst_233 : f32 to vector<8x128xf32>
    %665 = arith.addf %663, %664 : vector<8x128xf32>
    %666 = vector.extract_strided_slice %649 {offsets = [0, 256], sizes = [8, 128], strides = [1, 1]} : vector<8x512xf32> to vector<8x128xf32>
    %667 = math.tanh %666 : vector<8x128xf32>
    %668 = vector.extract_strided_slice %649 {offsets = [0, 384], sizes = [8, 128], strides = [1, 1]} : vector<8x512xf32> to vector<8x128xf32>
    %cst_234 = arith.constant 5.000000e-01 : f32
    %669 = vector.broadcast %cst_234 : f32 to vector<8x128xf32>
    %670 = arith.mulf %669, %668 : vector<8x128xf32>
    %671 = math.tanh %670 : vector<8x128xf32>
    %cst_235 = arith.constant 5.000000e-01 : f32
    %672 = vector.broadcast %cst_235 : f32 to vector<8x128xf32>
    %673 = arith.mulf %672, %671 : vector<8x128xf32>
    %cst_236 = arith.constant 5.000000e-01 : f32
    %674 = vector.broadcast %cst_236 : f32 to vector<8x128xf32>
    %675 = arith.addf %673, %674 : vector<8x128xf32>
    %676 = arith.mulf %665, %636 : vector<8x128xf32>
    %677 = arith.mulf %657, %667 : vector<8x128xf32>
    %678 = arith.addf %676, %677 : vector<8x128xf32>
    %679 = math.tanh %678 : vector<8x128xf32>
    %680 = arith.mulf %675, %679 : vector<8x128xf32>
    %681 = arith.index_cast %c15_i32 : i32 to index
    %c0_237 = arith.constant 0 : index
    %c0_238 = arith.constant 0 : index
    %682 = vector.load %arg7[%681, %c0_237, %c0_238] : memref<16x8x128xf32, #tpu.memory_space<vmem>>, vector<1x8x128xf32>
    %683 = vector.shape_cast %682 : vector<1x8x128xf32> to vector<8x128xf32>
    %684 = vector.shape_cast %680 : vector<8x128xf32> to vector<1x8x128xf32>
    tpu.vector_store %arg7[%681, %c0_237, %c0_238], %684 {strides = array<i32>} : memref<16x8x128xf32, #tpu.memory_space<vmem>>, vector<1x8x128xf32>,
    %c16_i32 = arith.constant 16 : i32
    %c0_239 = arith.constant 0 : index
    %c0_240 = arith.constant 0 : index
    %685 = vector.load %arg11[%c0_239, %c0_240] : memref<8x128xf32, #tpu.memory_space<vmem>>, vector<8x128xf32>
    tpu.vector_store %arg11[%c0_239, %c0_240], %680 {strides = array<i32>} : memref<8x128xf32, #tpu.memory_space<vmem>>, vector<8x128xf32>,
    %c0_241 = arith.constant 0 : index
    %c0_242 = arith.constant 0 : index
    %686 = vector.load %arg12[%c0_241, %c0_242] : memref<8x128xf32, #tpu.memory_space<vmem>>, vector<8x128xf32>
    tpu.vector_store %arg12[%c0_241, %c0_242], %678 {strides = array<i32>} : memref<8x128xf32, #tpu.memory_space<vmem>>, vector<8x128xf32>,
    %c0_i32_243 = arith.constant 0 : i32
    %687 = arith.cmpi eq, %arg0, %c0_i32_243 : i32
    %688 = arith.extui %687 : i1 to i32
    %c0_i32_244 = arith.constant 0 : i32
    %689 = arith.cmpi ne, %688, %c0_i32_244 : i32
    scf.if %689 {
      %c0_245 = arith.constant 0 : index
      %c0_246 = arith.constant 0 : index
      %690 = vector.load %arg8[%c0_245, %c0_246] : memref<8x128xf32, #tpu.memory_space<vmem>>, vector<8x128xf32>
      tpu.vector_store %arg8[%c0_245, %c0_246], %680 {strides = array<i32>} : memref<8x128xf32, #tpu.memory_space<vmem>>, vector<8x128xf32>,
      %c0_247 = arith.constant 0 : index
      %c0_248 = arith.constant 0 : index
      %691 = vector.load %arg9[%c0_247, %c0_248] : memref<8x128xf32, #tpu.memory_space<vmem>>, vector<8x128xf32>
      tpu.vector_store %arg9[%c0_247, %c0_248], %678 {strides = array<i32>} : memref<8x128xf32, #tpu.memory_space<vmem>>, vector<8x128xf32>,
    } else {
    }
    return
  }
  func.func @transform_0(%arg0: i32) -> (i32, i32) {
    %c0_i32 = arith.constant 0 : i32
    %c0_i32_0 = arith.constant 0 : i32
    return %arg0, %c0_i32 : i32, i32
  }
  func.func @transform_1(%arg0: i32) -> (i32, i32) {
    %c0_i32 = arith.constant 0 : i32
    %c0_i32_0 = arith.constant 0 : i32
    %c0_i32_1 = arith.constant 0 : i32
    return %c0_i32, %c0_i32_0 : i32, i32
  }
  func.func @transform_2(%arg0: i32) -> (i32, i32) {
    %c0_i32 = arith.constant 0 : i32
    %c0_i32_0 = arith.constant 0 : i32
    %c0_i32_1 = arith.constant 0 : i32
    return %c0_i32, %c0_i32_0 : i32, i32
  }
  func.func @transform_3(%arg0: i32) -> (i32, i32) {
    %c0_i32 = arith.constant 0 : i32
    %c0_i32_0 = arith.constant 0 : i32
    %c0_i32_1 = arith.constant 0 : i32
    return %c0_i32, %c0_i32_0 : i32, i32
  }
  func.func @transform_4(%arg0: i32) -> (i32, i32) {
    %c0_i32 = arith.constant 0 : i32
    %c0_i32_0 = arith.constant 0 : i32
    %c0_i32_1 = arith.constant 0 : i32
    return %c0_i32, %c0_i32_0 : i32, i32
  }
  func.func @transform_5(%arg0: i32) -> (i32, i32) {
    %c0_i32 = arith.constant 0 : i32
    %c0_i32_0 = arith.constant 0 : i32
    %c0_i32_1 = arith.constant 0 : i32
    return %c0_i32, %c0_i32_0 : i32, i32
  }
  func.func @transform_6(%arg0: i32) -> (i32, i32, i32) {
    %c0_i32 = arith.constant 0 : i32
    %c0_i32_0 = arith.constant 0 : i32
    %c0_i32_1 = arith.constant 0 : i32
    return %arg0, %c0_i32, %c0_i32_0 : i32, i32, i32
  }
  func.func @transform_7(%arg0: i32) -> (i32, i32) {
    %c0_i32 = arith.constant 0 : i32
    %c0_i32_0 = arith.constant 0 : i32
    %c0_i32_1 = arith.constant 0 : i32
    return %c0_i32, %c0_i32_0 : i32, i32
  }
  func.func @transform_8(%arg0: i32) -> (i32, i32) {
    %c0_i32 = arith.constant 0 : i32
    %c0_i32_0 = arith.constant 0 : i32
    %c0_i32_1 = arith.constant 0 : i32
    return %c0_i32, %c0_i32_0 : i32, i32
  }
}

</mosaic_0001>

<bundles_post_ra>
// kernel: tpu_custom_call.1
= control target key start
LH: loop header
LB: loop body
LE: loop exit
PB: predicated region body
PF: predicated region fallthrough
CT: control target
= control target key end

     0   :  { %14 = vsyncpa [#allocation6], 0  ;;  %s4606_s0 = inlined_call_operand.hbm [shape: bf16[128,128], index: 0, kind: input, shape index: {}]   ;;  %s4607_s1 = inlined_call_operand.hbm [shape: bf16[128,512], index: 1, kind: input, shape index: {}]   ;;  %s4608_s2 = inlined_call_operand.hbm [shape: f32[1,512], index: 2, kind: input, shape index: {}]   ;;  %s4609_s3 = inlined_call_operand.vmem [shape: f32[8,128], index: 3, kind: input, shape index: {}]   ;;  %s4610_s4 = inlined_call_operand.hbm [shape: f32[8,128], index: 4, kind: input, shape index: {}]   ;;  %s4611_s5 = inlined_call_operand.hbm [shape: bf16[128,512], index: 5, kind: input, shape index: {}]   ;;  %s4612_s6 = inlined_call_operand.hbm [shape: f32[16,8,128], index: 6, kind: output, shape index: {0}]   ;;  %s4613_s7 = inlined_call_operand.hbm [shape: f32[8,128], index: 7, kind: output, shape index: {1}]   ;;  %s4614_s8 = inlined_call_operand.hbm [shape: f32[8,128], index: 8, kind: output, shape index: {2}]  }
   0x1   :  { %15 = vsyncpa [#allocation9], 0 }
   0x2   :  { %16 = vsyncpa [#allocation12], 0 }
   0x3   :  { %17 = vsyncpa [#allocation7], 0 }
   0x4   :  { %18 = vsyncpa [#allocation16], 0  ;;  %s3355_s27 = smov [#allocation8]   ;;  %s3169_s9 = scalar_lea.hbm %s4607_s1, 4096 }
   0x5   :  { %s36_s28 = sshll.u32 %s3355_s27, 4  ;;  %p3170_p0 = scmp.ne.s32.totalorder %s4607_s1, %s3169_s9  ;;  %s37_s28 = int_to_ptr.vmem [resolvable:$true] %s36_s28 }
   0x6   :  { %p3173_p1 = scmp.lt.u32.totalorder %s3169_s9, %s4607_s1 }
   0x8   :  { %p3175_p2 = pnand %p3173_p1, %p3170_p0 }
   0xa   :  { %3178 = shalt.err (!%p3175_p2)
}
   0xb   :  { %s3179_s14 = scalar_lea.vmem %s37_s28, 4096  ;;  %p3184_p4 = scmp.lt.s32.totalorder %s37_s28, %s37_s28 }
   0xc   :  { %p3180_p3 = scmp.ne.s32.totalorder %s37_s28, %s3179_s14  ;;  %p3185_p5 = scmp.lt.s32.totalorder %s3179_s14, %s3179_s14 }
   0xe   :  { %p3186_p6 = por %p3185_p5, %p3184_p4 }
  0x10   :  { %p3187_p7 = pnand %p3186_p6, %p3180_p3 }
  0x12   :  { %3190 = shalt.err (!%p3187_p7)
}
  0x13   :  { %s3356_s15 = smov 256   ;;  %s3357_s16 = smov 16  }
  0x14   :  { %42 = dma.hbm_to_vmem [thread:$0]  %s4607_s1, 4096, %s37_s28, [#allocation9], %s3356_s15, %s3356_s15, %s3357_s16  }
  0x15   :  { %s3358_s19 = smov [#allocation11]   ;;  %s3359_s21 = smov [#allocation5]  }
  0x16   :  { %s61_s20 = sshll.u32 %s3358_s19, 4  ;;  %s24_s22 = sshll.u32 %s3359_s21, 4  ;;  %s62_s20 = int_to_ptr.vmem [resolvable:$true] %s61_s20  ;;  %s25_s22 = int_to_ptr.vmem [resolvable:$true] %s24_s22 }
  0x17   :  { %s3191_s25 = scalar_lea.hbm %s4610_s4, 128 }
  0x18   :  { %p3192_p8 = scmp.ne.s32.totalorder %s4610_s4, %s3191_s25  ;;  %p3195_p9 = scmp.lt.u32.totalorder %s3191_s25, %s4610_s4 }
  0x1a   :  { %p3197_p10 = pnand %p3195_p9, %p3192_p8 }
  0x1c   :  { %3200 = shalt.err (!%p3197_p10)
}
  0x1d   :  { %s3201_s1 = scalar_lea.vmem %s62_s20, 128  ;;  %p3206_p12 = scmp.lt.s32.totalorder %s62_s20, %s62_s20 }
  0x1e   :  { %p3202_p11 = scmp.ne.s32.totalorder %s62_s20, %s3201_s1  ;;  %p3207_p13 = scmp.lt.s32.totalorder %s3201_s1, %s3201_s1 }
  0x20   :  { %p3208_p0 = por %p3207_p13, %p3206_p12 }
  0x22   :  { %p3209_p1 = pnand %p3208_p0, %p3202_p11 }
  0x24   :  { %3212 = shalt.err (!%p3209_p1)
}
  0x25   :  { %64 = dma.hbm_to_vmem [thread:$0]  %s4610_s4, 128, %s62_s20, [#allocation12]  }
  0x26   :  { %s3213_s12 = scalar_lea.hbm %s4606_s0, 1024 }
  0x27   :  { %p3214_p2 = scmp.ne.s32.totalorder %s4606_s0, %s3213_s12  ;;  %p3217_p3 = scmp.lt.u32.totalorder %s3213_s12, %s4606_s0 }
  0x29   :  { %p3219_p4 = pnand %p3217_p3, %p3214_p2 }
  0x2b   :  { %3222 = shalt.err (!%p3219_p4)
}
  0x2c   :  { %s3223_s19 = scalar_lea.vmem %s25_s22, 1024  ;;  %p3228_p6 = scmp.lt.s32.totalorder %s25_s22, %s25_s22 }
  0x2d   :  { %p3224_p5 = scmp.ne.s32.totalorder %s25_s22, %s3223_s19  ;;  %p3229_p7 = scmp.lt.s32.totalorder %s3223_s19, %s3223_s19 }
  0x2f   :  { %p3230_p8 = por %p3229_p7, %p3228_p6 }
  0x31   :  { %p3231_p9 = pnand %p3230_p8, %p3224_p5 }
  0x33   :  { %3234 = shalt.err (!%p3231_p9)
}
  0x34   :  { %s3360_s4 = smov 64   ;;  %s3361_s20 = smov 4  }
  0x35   :  { %30 = dma.hbm_to_vmem [thread:$0]  %s4606_s0, 1024, %s25_s22, [#allocation6], %s3360_s4, %s3360_s4, %s3361_s20  }
  0x36   :  { %s3362_s24 = smov [#allocation10]   ;;  %s3363_s26 = smov [#allocation13]  }
  0x37   :  { %s49_s25 = sshll.u32 %s3362_s24, 4  ;;  %s70_s27 = sshll.u32 %s3363_s26, 4  ;;  %s50_s25 = int_to_ptr.vmem [resolvable:$true] %s49_s25  ;;  %s71_s27 = int_to_ptr.vmem [resolvable:$true] %s70_s27 }
  0x38   :  { %s3235_s1 = scalar_lea.hbm %s4608_s2, 64 }
  0x39   :  { %p3236_p10 = scmp.ne.s32.totalorder %s4608_s2, %s3235_s1  ;;  %p3239_p11 = scmp.lt.u32.totalorder %s3235_s1, %s4608_s2 }
  0x3b   :  { %p3241_p12 = pnand %p3239_p11, %p3236_p10 }
  0x3d   :  { %3244 = shalt.err (!%p3241_p12)
}
  0x3e   :  { %s3245_s0 = scalar_lea.vmem %s50_s25, 64  ;;  %p3250_p0 = scmp.lt.s32.totalorder %s50_s25, %s50_s25 }
  0x3f   :  { %p3246_p13 = scmp.ne.s32.totalorder %s50_s25, %s3245_s0  ;;  %p3251_p1 = scmp.lt.s32.totalorder %s3245_s0, %s3245_s0 }
  0x41   :  { %p3252_p2 = por %p3251_p1, %p3250_p0 }
  0x43   :  { %p3253_p3 = pnand %p3252_p2, %p3246_p13 }
  0x45   :  { %3256 = shalt.err (!%p3253_p3)
}
  0x46   :  { %52 = dma.hbm_to_vmem [thread:$0]  %s4608_s2, 64, %s50_s25, [#allocation9]  }
  0x47   :  { %s3257_s17 = scalar_lea.hbm %s4611_s5, 4096 }
  0x48   :  { %p3258_p4 = scmp.ne.s32.totalorder %s4611_s5, %s3257_s17  ;;  %p3261_p5 = scmp.lt.u32.totalorder %s3257_s17, %s4611_s5 }
  0x4a   :  { %p3263_p6 = pnand %p3261_p5, %p3258_p4 }
  0x4c   :  { %3266 = shalt.err (!%p3263_p6)
}
  0x4d   :  { %s3267_s21 = scalar_lea.vmem %s71_s27, 4096  ;;  %p3272_p8 = scmp.lt.s32.totalorder %s71_s27, %s71_s27 }
  0x4e   :  { %p3268_p7 = scmp.ne.s32.totalorder %s71_s27, %s3267_s21  ;;  %p3273_p9 = scmp.lt.s32.totalorder %s3267_s21, %s3267_s21 }
  0x50   :  { %p3274_p10 = por %p3273_p9, %p3272_p8 }
  0x52   :  { %p3275_p11 = pnand %p3274_p10, %p3268_p7 }
  0x54   :  { %3278 = shalt.err (!%p3275_p11)
}
  0x55   :  { %76 = dma.hbm_to_vmem [thread:$0]  %s4611_s5, 4096, %s71_s27, [#allocation12], %s3356_s15, %s3356_s15, %s3357_s16  }
  0x56   :  { %3345 = dma.done.wait [#allocation6], 1024  }
  0x57   :  { %3346 = vsyncadd [#allocation6], 4294966272 }
  0x58   :  { %3347 = dma.done.wait [#allocation9], 4160  }
  0x59   :  { %3348 = vsyncadd [#allocation9], 4294963136 }
  0x5a   :  { %3349 = dma.done.wait [#allocation12], 4224  }
  0x5b   :  { %3350 = vsyncadd [#allocation12], 4294963072  ;;  %v4615_v0 = vmov 0   ;;  %v2841_v1 = vld [vmem:[#allocation8 + $0x4] ss:$16 sps:$4 sm:$0xff]   ;;  %v2895_v43 = vld [vmem:[#allocation5 + $0x8] sm:$0xff]  }
  0x5c   :  { %411 = vmatprep.mubr.bf16.mxu0 %v4615_v0  ;;  %524 = vmatprep.mubr.bf16.mxu1 %v4615_v0  ;;  %v2843_v2 = vld [vmem:[#allocation8 + $0xc] ss:$16 sps:$4 sm:$0xff]   ;;  %v2845_v3 = vld [vmem:[#allocation8] ss:$16 sps:$4 sm:$0xff]   ;;  %v2846_v4 = vld [vmem:[#allocation8 + $0x8] ss:$16 sps:$4 sm:$0xff]  }
  0x5d   :  { %379 = vmatprep.subr.bf16.mxu0 %v2841_v1  ;;  %492 = vmatprep.subr.bf16.mxu1 %v2843_v2  ;;  %v2847_v5 = vld [vmem:[#allocation8 + $0x24] ss:$16 sps:$4 sm:$0xff]   ;;  %v2849_v6 = vld [vmem:[#allocation8 + $0x2c] ss:$16 sps:$4 sm:$0xff]   ;;  %v2851_v7 = vld [vmem:[#allocation8 + $0x20] ss:$16 sps:$4 sm:$0xff]  }
  0x5e   :  { %380 = vmatpush1.bf16.msra.mxu0 %v2845_v3  ;;  %493 = vmatpush1.bf16.msra.mxu1 %v2846_v4  ;;  %v2852_v8 = vld [vmem:[#allocation8 + $0x28] ss:$16 sps:$4 sm:$0xff]   ;;  %v2853_v9 = vld [vmem:[#allocation8 + $0x44] ss:$16 sps:$4 sm:$0xff]   ;;  %v2855_v10 = vld [vmem:[#allocation8 + $0x4c] ss:$16 sps:$4 sm:$0xff]  }
  0x5f   :  { %381 = vmatprep.subr.bf16.mxu0 %v2847_v5  ;;  %494 = vmatprep.subr.bf16.mxu1 %v2849_v6  ;;  %v2857_v11 = vld [vmem:[#allocation8 + $0x40] ss:$16 sps:$4 sm:$0xff]   ;;  %v2858_v12 = vld [vmem:[#allocation8 + $0x48] ss:$16 sps:$4 sm:$0xff]   ;;  %v2859_v13 = vld [vmem:[#allocation8 + $0x64] ss:$16 sps:$4 sm:$0xff]  }
  0x60   :  { %v2861_v14 = vld [vmem:[#allocation8 + $0x6c] ss:$16 sps:$4 sm:$0xff]   ;;  %v2863_v15 = vld [vmem:[#allocation8 + $0x60] ss:$16 sps:$4 sm:$0xff]   ;;  %v2864_v16 = vld [vmem:[#allocation8 + $0x68] ss:$16 sps:$4 sm:$0xff]  }
  0x61   :  { %v2865_v17 = vld [vmem:[#allocation8 + $0x84] ss:$16 sps:$4 sm:$0xff]   ;;  %v2867_v18 = vld [vmem:[#allocation8 + $0x8c] ss:$16 sps:$4 sm:$0xff]   ;;  %v2869_v19 = vld [vmem:[#allocation8 + $0x80] ss:$16 sps:$4 sm:$0xff]  }
  0x62   :  { %382 = vmatpush1.bf16.msra.mxu0 %v2851_v7  ;;  %495 = vmatpush1.bf16.msra.mxu1 %v2852_v8  ;;  %v2870_v20 = vld [vmem:[#allocation8 + $0x88] ss:$16 sps:$4 sm:$0xff]   ;;  %v2871_v21 = vld [vmem:[#allocation8 + $0xa4] ss:$16 sps:$4 sm:$0xff]   ;;  %v2873_v22 = vld [vmem:[#allocation8 + $0xac] ss:$16 sps:$4 sm:$0xff]  }
  0x63   :  { %383 = vmatprep.subr.bf16.mxu0 %v2853_v9  ;;  %496 = vmatprep.subr.bf16.mxu1 %v2855_v10  ;;  %v2875_v23 = vld [vmem:[#allocation8 + $0xa0] ss:$16 sps:$4 sm:$0xff]   ;;  %v2876_v24 = vld [vmem:[#allocation8 + $0xa8] ss:$16 sps:$4 sm:$0xff]   ;;  %v2877_v25 = vld [vmem:[#allocation8 + $0xc4] ss:$16 sps:$4 sm:$0xff]  }
  0x64   :  { %v2879_v26 = vld [vmem:[#allocation8 + $0xcc] ss:$16 sps:$4 sm:$0xff]   ;;  %v2881_v27 = vld [vmem:[#allocation8 + $0xc0] ss:$16 sps:$4 sm:$0xff]   ;;  %v2882_v28 = vld [vmem:[#allocation8 + $0xc8] ss:$16 sps:$4 sm:$0xff]  }
  0x65   :  { %v2883_v29 = vld [vmem:[#allocation8 + $0xe4] ss:$16 sps:$4 sm:$0xff]   ;;  %v2885_v30 = vld [vmem:[#allocation8 + $0xec] ss:$16 sps:$4 sm:$0xff]   ;;  %v2887_v31 = vld [vmem:[#allocation8 + $0xe0] ss:$16 sps:$4 sm:$0xff]  }
  0x66   :  { %384 = vmatpush1.bf16.msra.mxu0 %v2857_v11  ;;  %497 = vmatpush1.bf16.msra.mxu1 %v2858_v12  ;;  %v2888_v32 = vld [vmem:[#allocation8 + $0xe8] ss:$16 sps:$4 sm:$0xff]   ;;  %v3483_v33 = vld [vmem:[#allocation13 + $0x4] ss:$16 sps:$4 sm:$0xff]   ;;  %v3487_v36 = vld [vmem:[#allocation13] ss:$16 sps:$4 sm:$0xff]   ;;  %v151_v12 = vlaneseq }
  0x67   :  { %385 = vmatprep.subr.bf16.mxu0 %v2859_v13  ;;  %498 = vmatprep.subr.bf16.mxu1 %v2861_v14  ;;  %v3485_v34 = vld [vmem:[#allocation13 + $0xc] ss:$16 sps:$4 sm:$0xff]   ;;  %v2889_v35 = vld [vmem:[#allocation5] sm:$0xff]   ;;  %v3499_v40 = vld [vmem:[#allocation13 + $0x20] ss:$16 sps:$4 sm:$0xff]   ;;  %s3366_s24 = smov [#allocation14]  }
  0x68   :  { %v3491_v37 = vld [vmem:[#allocation13 + $0x24] ss:$16 sps:$4 sm:$0xff]   ;;  %v3493_v38 = vld [vmem:[#allocation13 + $0x8] ss:$16 sps:$4 sm:$0xff]   ;;  %v3495_v39 = vld [vmem:[#allocation13 + $0x2c] ss:$16 sps:$4 sm:$0xff]  }
  0x69   :  { %v3503_v41 = vld [vmem:[#allocation13 + $0x44] ss:$16 sps:$4 sm:$0xff]   ;;  %v3506_v42 = vld [vmem:[#allocation13 + $0x28] ss:$16 sps:$4 sm:$0xff]   ;;  %v3511_v44 = vld [vmem:[#allocation13 + $0x40] ss:$16 sps:$4 sm:$0xff]  }
  0x6a   :  { %386 = vmatpush1.bf16.msra.mxu0 %v2863_v15  ;;  %499 = vmatpush1.bf16.msra.mxu1 %v2864_v16  ;;  %v3513_v45 = vld [vmem:[#allocation13 + $0x4c] ss:$16 sps:$4 sm:$0xff]   ;;  %v3515_v46 = vld [vmem:[#allocation13 + $0x64] ss:$16 sps:$4 sm:$0xff]   ;;  %v3518_v47 = vld [vmem:[#allocation13 + $0x48] ss:$16 sps:$4 sm:$0xff]  }
  0x6b   :  { %387 = vmatprep.subr.bf16.mxu0 %v2865_v17  ;;  %500 = vmatprep.subr.bf16.mxu1 %v2867_v18  ;;  %v3520_v48 = vld [vmem:[#allocation13 + $0x6c] ss:$16 sps:$4 sm:$0xff]   ;;  %v3526_v49 = vld [vmem:[#allocation13 + $0x60] ss:$16 sps:$4 sm:$0xff]   ;;  %v3528_v50 = vld [vmem:[#allocation13 + $0x84] ss:$16 sps:$4 sm:$0xff]  }
  0x6c   :  { %v3532_v51 = vld [vmem:[#allocation13 + $0x68] ss:$16 sps:$4 sm:$0xff]   ;;  %v3535_v53 = vld [vmem:[#allocation13 + $0x80] ss:$16 sps:$4 sm:$0xff]   ;;  %v3538_v54 = vld [vmem:[#allocation13 + $0x8c] ss:$16 sps:$4 sm:$0xff]  }
  0x6d   :  { %v2902_v52 = vld [vmem:[#allocation5 + $0x10] sm:$0xff]   ;;  %v3546_v57 = vld [vmem:[#allocation13 + $0xac] ss:$16 sps:$4 sm:$0xff]   ;;  %v3552_v58 = vld [vmem:[#allocation13 + $0xa0] ss:$16 sps:$4 sm:$0xff]   ;;  %v152_v13 = vshrl.u32 %v151_v12, 7 }
  0x6e   :  { %388 = vmatpush1.bf16.msra.mxu0 %v2869_v19  ;;  %501 = vmatpush1.bf16.msra.mxu1 %v2870_v20  ;;  %v3542_v55 = vld [vmem:[#allocation13 + $0xa4] ss:$16 sps:$4 sm:$0xff]   ;;  %v3544_v56 = vld [vmem:[#allocation13 + $0x88] ss:$16 sps:$4 sm:$0xff]   ;;  %v2909_v61 = vld [vmem:[#allocation5 + $0x18] sm:$0xff]   ;;  %s2698_s25 = sshll.u32 %s3366_s24, 4  ;;  %s4556_s25 = int_to_ptr.vmem [resolvable:$true] %s2698_s25 }
  0x6f   :  { %389 = vmatprep.subr.bf16.mxu0 %v2871_v21  ;;  %502 = vmatprep.subr.bf16.mxu1 %v2873_v22  ;;  %v3556_v59 = vld [vmem:[#allocation13 + $0xc4] ss:$16 sps:$4 sm:$0xff]   ;;  %v3558_v60 = vld [vmem:[#allocation13 + $0xa8] ss:$16 sps:$4 sm:$0xff]   ;;  %v3562_v62 = vld [vmem:[#allocation13 + $0xc0] ss:$16 sps:$4 sm:$0xff]  }
  0x70   :  { %v3564_v63 = vld [vmem:[#allocation13 + $0xcc] ss:$16 sps:$4 sm:$0xff]   ;;  %v3568_v1 = vld [vmem:[#allocation13 + $0xe4] ss:$16 sps:$4 sm:$0xff]   ;;  %v3570_v2 = vld [vmem:[#allocation13 + $0xc8] ss:$16 sps:$4 sm:$0xff]  }
  0x71   :  { %v3572_v3 = vld [vmem:[#allocation13 + $0xec] ss:$16 sps:$4 sm:$0xff]   ;;  %v3578_v4 = vld [vmem:[#allocation13 + $0xe0] ss:$16 sps:$4 sm:$0xff]   ;;  %v3582_v5 = vld [vmem:[#allocation13 + $0xe8] ss:$16 sps:$4 sm:$0xff]  }
  0x72   :  { %390 = vmatpush1.bf16.msra.mxu0 %v2875_v23  ;;  %503 = vmatpush1.bf16.msra.mxu1 %v2876_v24  ;;  %v2916_v6 = vld [vmem:[#allocation5 + $0x20] sm:$0xff]   ;;  %v2923_v7 = vld [vmem:[#allocation5 + $0x28] sm:$0xff]   ;;  %v2930_v8 = vld [vmem:[#allocation5 + $0x30] sm:$0xff]   ;;  %v161_v14 = vsub.s32 2, %v152_v13  ;;  %v165_v15 = vsub.s32 3, %v152_v13  ;;  %v153_v16 = vsub.s32 0, %v152_v13 }
  0x73   :  { %391 = vmatprep.subr.bf16.mxu0 %v2877_v25  ;;  %504 = vmatprep.subr.bf16.mxu1 %v2879_v26  ;;  %v2937_v9 = vld [vmem:[#allocation5 + $0x38] sm:$0xff]   ;;  %v97_v10 = vld [vmem:[%s4609_s3] sm:$0xff]  ;;  %v157_v18 = vsub.s32 1, %v152_v13  ;;  %s3365_s3 = smov [#allocation15]   ;;  %s3367_s26 = smov [#allocation17]  }
  0x74   :  { %v710_v11 = vpack.c.bf16 %v97_v10, %v97_v10  ;;  %v149_v17 = vld [vmem:[#allocation10] sm:$0xf]  ;;  %s2711_s16 = sshll.u32 %s3365_s3, 4  ;;  %s2721_s27 = sshll.u32 %s3367_s26, 4  ;;  %s2712_s16 = int_to_ptr.vmem [resolvable:$true] %s2711_s16  ;;  %s4558_s27 = int_to_ptr.vmem [resolvable:$true] %s2721_s27 }
  0x75   :  { %v3634_v19 = vrot.slane %v149_v17, %v161_v14  ;;  %v3640_v22 = vrot.slane %v149_v17, %v165_v15  ;;  %v3642_v23 = vrot.slane %v149_v17, %v153_v16  ;;  %v3648_v26 = vrot.slane %v149_v17, %v157_v18  ;;  %s3279_s29 = scalar_lea.vmem %s2712_s16, 128  ;;  %p3284_p13 = scmp.lt.s32.totalorder %s2712_s16, %s2712_s16 }
  0x76   :  { %392 = vmatpush1.bf16.msra.mxu0 %v2881_v27  ;;  %505 = vmatpush1.bf16.msra.mxu1 %v2882_v28  ;;  %p3280_p12 = scmp.ne.s32.totalorder %s2712_s16, %s3279_s29  ;;  %p3285_p0 = scmp.lt.s32.totalorder %s3279_s29, %s3279_s29 }
  0x77   :  { %393 = vmatprep.subr.bf16.mxu0 %v2883_v29  ;;  %506 = vmatprep.subr.bf16.mxu1 %v2885_v30 }
  0x78   :  { %p3286_p1 = por %p3285_p0, %p3284_p13 }
  0x7a   :  { %394 = vmatpush1.bf16.msra.mxu0 %v2887_v31  ;;  %507 = vmatpush1.bf16.msra.mxu1 %v2888_v32  ;;  %p3287_p2 = pnand %p3286_p1, %p3280_p12 }
  0x7b   :  { %871 = vmatprep.subr.bf16.mxu0 %v3483_v33  ;;  %912 = vmatprep.subr.bf16.mxu1 %v3485_v34 }
  0x7d   :  { %412 = vmatmul.mubr.bf16.vlgmr.msra.gmra.mrb[0].mxu0 %v2889_v35  ;;  %525 = vmatmul.mubr.bf16.vlgmr.msra.gmra.mrb[0].mxu1 %v2889_v35 }
  0x7e   :  { %872 = vmatpush1.bf16.msra.mxu0 %v3487_v36  ;;  %421 = vmatprep.mubr.bf16.mxu0 %v4615_v0 }
  0x7f   :  { %534 = vmatprep.mubr.bf16.mxu1 %v4615_v0  ;;  %873 = vmatprep.subr.bf16.mxu0 %v3491_v37 }
  0x80   :  { %913 = vmatpush1.bf16.msra.mxu1 %v3493_v38 }
  0x81   :  { %914 = vmatprep.subr.bf16.mxu1 %v3495_v39 }
  0x82   :  { %874 = vmatpush1.bf16.msra.mxu0 %v3499_v40 }
  0x83   :  { %875 = vmatprep.subr.bf16.mxu0 %v3503_v41 }
  0x84   :  { %915 = vmatpush1.bf16.msra.mxu1 %v3506_v42 }
  0x85   :  { %422 = vmatmul.mubr.bf16.gmra.mrb[4].mxu0 %v2895_v43  ;;  %535 = vmatmul.mubr.bf16.gmra.mrb[4].mxu1 %v2895_v43 }
  0x86   :  { %431 = vmatprep.mubr.bf16.mxu0 %v4615_v0  ;;  %544 = vmatprep.mubr.bf16.mxu1 %v4615_v0 }
  0x87   :  { %876 = vmatpush1.bf16.msra.mxu0 %v3511_v44  ;;  %916 = vmatprep.subr.bf16.mxu1 %v3513_v45 }
  0x88   :  { %877 = vmatprep.subr.bf16.mxu0 %v3515_v46  ;;  %917 = vmatpush1.bf16.msra.mxu1 %v3518_v47 }
  0x89   :  { %918 = vmatprep.subr.bf16.mxu1 %v3520_v48 }
  0x8b   :  { %878 = vmatpush1.bf16.msra.mxu0 %v3526_v49 }
  0x8c   :  { %879 = vmatprep.subr.bf16.mxu0 %v3528_v50  ;;  %919 = vmatpush1.bf16.msra.mxu1 %v3532_v51 }
  0x8d   :  { %432 = vmatmul.mubr.bf16.gmra.mrb[8].mxu0 %v2902_v52  ;;  %545 = vmatmul.mubr.bf16.gmra.mrb[8].mxu1 %v2902_v52 }
  0x8e   :  { %441 = vmatprep.mubr.bf16.mxu0 %v4615_v0  ;;  %554 = vmatprep.mubr.bf16.mxu1 %v4615_v0 }
  0x8f   :  { %880 = vmatpush1.bf16.msra.mxu0 %v3535_v53  ;;  %920 = vmatprep.subr.bf16.mxu1 %v3538_v54 }
  0x90   :  { %881 = vmatprep.subr.bf16.mxu0 %v3542_v55  ;;  %921 = vmatpush1.bf16.msra.mxu1 %v3544_v56 }
  0x91   :  { %922 = vmatprep.subr.bf16.mxu1 %v3546_v57 }
  0x93   :  { %882 = vmatpush1.bf16.msra.mxu0 %v3552_v58 }
  0x94   :  { %883 = vmatprep.subr.bf16.mxu0 %v3556_v59  ;;  %923 = vmatpush1.bf16.msra.mxu1 %v3558_v60 }
  0x95   :  { %442 = vmatmul.mubr.bf16.gmra.mrb[12].mxu0 %v2909_v61  ;;  %555 = vmatmul.mubr.bf16.gmra.mrb[12].mxu1 %v2909_v61 }
  0x96   :  { %451 = vmatprep.mubr.bf16.mxu0 %v4615_v0  ;;  %564 = vmatprep.mubr.bf16.mxu1 %v4615_v0 }
  0x97   :  { %884 = vmatpush1.bf16.msra.mxu0 %v3562_v62  ;;  %924 = vmatprep.subr.bf16.mxu1 %v3564_v63 }
  0x98   :  { %885 = vmatprep.subr.bf16.mxu0 %v3568_v1  ;;  %925 = vmatpush1.bf16.msra.mxu1 %v3570_v2 }
  0x99   :  { %926 = vmatprep.subr.bf16.mxu1 %v3572_v3 }
  0x9b   :  { %886 = vmatpush1.bf16.msra.mxu0 %v3578_v4 }
  0x9c   :  { %927 = vmatpush1.bf16.msra.mxu1 %v3582_v5  ;;  %984 = vmatprep.subr.bf16.mxu0 %v3483_v33 }
  0x9d   :  { %452 = vmatmul.mubr.bf16.gmra.mrb[16].mxu0 %v2916_v6  ;;  %565 = vmatmul.mubr.bf16.gmra.mrb[16].mxu1 %v2916_v6 }
  0x9e   :  { %461 = vmatprep.mubr.bf16.mxu0 %v4615_v0  ;;  %574 = vmatprep.mubr.bf16.mxu1 %v4615_v0 }
  0x9f   :  { %1025 = vmatprep.subr.bf16.mxu1 %v3485_v34 }
  0xa5   :  { %462 = vmatmul.mubr.bf16.gmra.mrb[20].mxu0 %v2923_v7  ;;  %575 = vmatmul.mubr.bf16.gmra.mrb[20].mxu1 %v2923_v7 }
  0xa6   :  { %471 = vmatprep.mubr.bf16.mxu0 %v4615_v0  ;;  %584 = vmatprep.mubr.bf16.mxu1 %v4615_v0 }
  0xad   :  { %472 = vmatmul.mubr.bf16.gmra.mrb[24].mxu0 %v2930_v8  ;;  %585 = vmatmul.mubr.bf16.gmra.mrb[24].mxu1 %v2930_v8 }
  0xae   :  { %481 = vmatprep.mubr.bf16.mxu0 %v4615_v0  ;;  %594 = vmatprep.mubr.bf16.mxu1 %v4615_v0 }
  0xb5   :  { %482 = vmatmul.mubr.bf16.gmra.mrb[28].mxu0 %v2937_v9  ;;  %595 = vmatmul.mubr.bf16.gmra.mrb[28].mxu1 %v2937_v9 }
  0xb6   :  { %903 = vmatprep.mubr.bf16.mxu0 %v4615_v0  ;;  %944 = vmatprep.mubr.bf16.mxu1 %v4615_v0 }
  0xbd   :  { %904 = vmatmul.mubr.bf16.vlgmr.msra.gmra.mrb[32].mxu0 %v710_v11  ;;  %945 = vmatmul.mubr.bf16.vlgmr.msra.gmra.mrb[32].mxu1 %v710_v11 }
  0xbe   :  { %985 = vmatpush1.bf16.msra.mxu0 %v3487_v36  ;;  %1026 = vmatpush1.bf16.msra.mxu1 %v3493_v38 }
  0xbf   :  { %986 = vmatprep.subr.bf16.mxu0 %v3491_v37  ;;  %1027 = vmatprep.subr.bf16.mxu1 %v3495_v39 }
  0xc0   :  { %1016 = vmatprep.mubr.bf16.mxu0 %v4615_v0  ;;  %1057 = vmatprep.mubr.bf16.mxu1 %v4615_v0 }
  0xc2   :  { %987 = vmatpush1.bf16.msra.mxu0 %v3499_v40  ;;  %1028 = vmatpush1.bf16.msra.mxu1 %v3506_v42 }
  0xc3   :  { %988 = vmatprep.subr.bf16.mxu0 %v3503_v41  ;;  %1029 = vmatprep.subr.bf16.mxu1 %v3513_v45 }
  0xc6   :  { %989 = vmatpush1.bf16.msra.mxu0 %v3511_v44  ;;  %1030 = vmatpush1.bf16.msra.mxu1 %v3518_v47 }
  0xc7   :  { %990 = vmatprep.subr.bf16.mxu0 %v3515_v46  ;;  %1031 = vmatprep.subr.bf16.mxu1 %v3520_v48 }
  0xca   :  { %991 = vmatpush1.bf16.msra.mxu0 %v3526_v49  ;;  %1032 = vmatpush1.bf16.msra.mxu1 %v3532_v51 }
  0xcb   :  { %992 = vmatprep.subr.bf16.mxu0 %v3528_v50  ;;  %1033 = vmatprep.subr.bf16.mxu1 %v3538_v54 }
  0xce   :  { %993 = vmatpush1.bf16.msra.mxu0 %v3535_v53  ;;  %1034 = vmatpush1.bf16.msra.mxu1 %v3544_v56 }
  0xcf   :  { %994 = vmatprep.subr.bf16.mxu0 %v3542_v55  ;;  %1035 = vmatprep.subr.bf16.mxu1 %v3546_v57 }
  0xd2   :  { %995 = vmatpush1.bf16.msra.mxu0 %v3552_v58  ;;  %1036 = vmatpush1.bf16.msra.mxu1 %v3558_v60 }
  0xd3   :  { %996 = vmatprep.subr.bf16.mxu0 %v3556_v59  ;;  %1037 = vmatprep.subr.bf16.mxu1 %v3564_v63 }
  0xd6   :  { %997 = vmatpush1.bf16.msra.mxu0 %v3562_v62  ;;  %1038 = vmatpush1.bf16.msra.mxu1 %v3570_v2 }
  0xd7   :  { %998 = vmatprep.subr.bf16.mxu0 %v3568_v1  ;;  %1039 = vmatprep.subr.bf16.mxu1 %v3572_v3 }
  0xda   :  { %999 = vmatpush1.bf16.msra.mxu0 %v3578_v4  ;;  %1040 = vmatpush1.bf16.msra.mxu1 %v3582_v5 }
  0xdb   :  { %1098 = vmatprep.subr.bf16.mxu0 %v3483_v33  ;;  %1139 = vmatprep.subr.bf16.mxu1 %v3485_v34 }
 0x150   :  { %v3636_v20 = vpop.f32.mrb[0].mxu0  ;;  %v3638_v21 = vpop.f32.mrb[0].mxu1 }
 0x151   :  { %v3644_v24 = vpop.f32.mrb[1].mxu0  ;;  %v3646_v25 = vpop.f32.mrb[1].mxu1 }
 0x152   :  { %v417_v27 = vpop.f32.mrb[2].mxu0  ;;  %v530_v28 = vpop.f32.mrb[2].mxu1 }
 0x153   :  { %v3651_v29 = vadd.f32 %v417_v27, %v3642_v23  ;;  %v419_v30 = vpop.f32.mrb[3].mxu0  ;;  %v3654_v31 = vadd.f32 %v530_v28, %v3634_v19  ;;  %v532_v32 = vpop.f32.mrb[3].mxu1 }
 0x154   :  { %v3657_v35 = vadd.f32 %v419_v30, %v3648_v26  ;;  %v3660_v43 = vadd.f32 %v532_v32, %v3640_v22 }
 0x158   :  { %v423_v52 = vpop.f32.mrb[4].mxu0  ;;  %v536_v61 = vpop.f32.mrb[4].mxu1 }
 0x159   :  { %v3663_v6 = vadd.f32 %v423_v52, %v3642_v23  ;;  %v425_v7 = vpop.f32.mrb[5].mxu0  ;;  %v3666_v8 = vadd.f32 %v536_v61, %v3634_v19  ;;  %v538_v9 = vpop.f32.mrb[5].mxu1 }
 0x15a   :  { %v3669_v10 = vadd.f32 %v425_v7, %v3648_v26  ;;  %v427_v11 = vpop.f32.mrb[6].mxu0  ;;  %v3672_v12 = vadd.f32 %v538_v9, %v3640_v22  ;;  %v540_v13 = vpop.f32.mrb[6].mxu1 }
 0x15b   :  { %v3675_v14 = vadd.f32 %v427_v11, %v3642_v23  ;;  %v429_v15 = vpop.f32.mrb[7].mxu0  ;;  %v3678_v16 = vadd.f32 %v540_v13, %v3634_v19  ;;  %v542_v17 = vpop.f32.mrb[7].mxu1 }
 0x15c   :  { %v3681_v18 = vadd.f32 %v429_v15, %v3648_v26  ;;  %v3684_v27 = vadd.f32 %v542_v17, %v3640_v22 }
 0x15d   :  { %4617 = vst [vmem:[#allocation23_spill] sm:$0xff] %v3678_v16 }
 0x15e   :  { %4618 = vst [vmem:[#allocation24_spill] sm:$0xff] %v3681_v18  ;;  %4619 = vst [vmem:[#allocation25_spill] sm:$0xff] %v3684_v27 }
 0x160   :  { %v433_v28 = vpop.f32.mrb[8].mxu0  ;;  %v546_v30 = vpop.f32.mrb[8].mxu1 }
 0x161   :  { %v3687_v32 = vadd.f32 %v433_v28, %v3642_v23  ;;  %v435_v52 = vpop.f32.mrb[9].mxu0  ;;  %v3690_v61 = vadd.f32 %v546_v30, %v3634_v19  ;;  %v548_v7 = vpop.f32.mrb[9].mxu1 }
 0x162   :  { %v3693_v9 = vadd.f32 %v435_v52, %v3648_v26  ;;  %v437_v11 = vpop.f32.mrb[10].mxu0  ;;  %v3696_v13 = vadd.f32 %v548_v7, %v3640_v22  ;;  %v550_v15 = vpop.f32.mrb[10].mxu1 }
 0x163   :  { %4620 = vst [vmem:[#allocation26_spill] sm:$0xff] %v3687_v32  ;;  %4621 = vst [vmem:[#allocation27_spill] sm:$0xff] %v3690_v61  ;;  %v3699_v17 = vadd.f32 %v437_v11, %v3642_v23  ;;  %v439_v0 = vpop.f32.mrb[11].mxu0  ;;  %v3702_v28 = vadd.f32 %v550_v15, %v3634_v19  ;;  %v552_v32 = vpop.f32.mrb[11].mxu1 }
 0x164   :  { %4622 = vst [vmem:[#allocation28_spill] sm:$0xff] %v3693_v9  ;;  %4623 = vst [vmem:[#allocation29_spill] sm:$0xff] %v3696_v13  ;;  %v3705_v30 = vadd.f32 %v439_v0, %v3648_v26  ;;  %v3708_v61 = vadd.f32 %v552_v32, %v3640_v22 }
 0x165   :  { %4624 = vst [vmem:[#allocation30_spill] sm:$0xff] %v3699_v17  ;;  %4625 = vst [vmem:[#allocation31_spill] sm:$0xff] %v3702_v28 }
 0x166   :  { %4626 = vst [vmem:[#allocation32_spill] sm:$0xff] %v3705_v30  ;;  %4627 = vst [vmem:[#allocation33_spill] sm:$0xff] %v3708_v61 }
 0x168   :  { %v443_v52 = vpop.f32.mrb[12].mxu0  ;;  %v556_v9 = vpop.f32.mrb[12].mxu1 }
 0x169   :  { %v3711_v7 = vadd.f32 %v443_v52, %v3642_v23  ;;  %v445_v13 = vpop.f32.mrb[13].mxu0  ;;  %v3714_v11 = vadd.f32 %v556_v9, %v3634_v19  ;;  %v558_v17 = vpop.f32.mrb[13].mxu1 }
 0x16a   :  { %v3717_v15 = vadd.f32 %v445_v13, %v3648_v26  ;;  %v447_v28 = vpop.f32.mrb[14].mxu0  ;;  %v3720_v0 = vadd.f32 %v558_v17, %v3640_v22  ;;  %v560_v30 = vpop.f32.mrb[14].mxu1 }
 0x16b   :  { %4628 = vst [vmem:[#allocation34_spill] sm:$0xff] %v3711_v7  ;;  %4629 = vst [vmem:[#allocation35_spill] sm:$0xff] %v3714_v11  ;;  %v3723_v32 = vadd.f32 %v447_v28, %v3642_v23  ;;  %v449_v61 = vpop.f32.mrb[15].mxu0  ;;  %v3726_v52 = vadd.f32 %v560_v30, %v3634_v19  ;;  %v562_v7 = vpop.f32.mrb[15].mxu1 }
 0x16c   :  { %4630 = vst [vmem:[#allocation36_spill] sm:$0xff] %v3717_v15  ;;  %4631 = vst [vmem:[#allocation37_spill] sm:$0xff] %v3720_v0  ;;  %v3729_v9 = vadd.f32 %v449_v61, %v3648_v26  ;;  %v3732_v11 = vadd.f32 %v562_v7, %v3640_v22 }
 0x16d   :  { %4632 = vst [vmem:[#allocation38_spill] sm:$0xff] %v3723_v32  ;;  %4633 = vst [vmem:[#allocation39_spill] sm:$0xff] %v3726_v52 }
 0x16e   :  { %4634 = vst [vmem:[#allocation40_spill] sm:$0xff] %v3729_v9  ;;  %4635 = vst [vmem:[#allocation41_spill] sm:$0xff] %v3732_v11 }
 0x170   :  { %v453_v13 = vpop.f32.mrb[16].mxu0  ;;  %v566_v15 = vpop.f32.mrb[16].mxu1 }
 0x171   :  { %v3735_v17 = vadd.f32 %v453_v13, %v3642_v23  ;;  %v455_v0 = vpop.f32.mrb[17].mxu0  ;;  %v3738_v28 = vadd.f32 %v566_v15, %v3634_v19  ;;  %v568_v32 = vpop.f32.mrb[17].mxu1 }
 0x172   :  { %v3741_v30 = vadd.f32 %v455_v0, %v3648_v26  ;;  %v457_v52 = vpop.f32.mrb[18].mxu0  ;;  %v3744_v61 = vadd.f32 %v568_v32, %v3640_v22  ;;  %v570_v9 = vpop.f32.mrb[18].mxu1 }
 0x173   :  { %4636 = vst [vmem:[#allocation42_spill] sm:$0xff] %v3735_v17  ;;  %4637 = vst [vmem:[#allocation43_spill] sm:$0xff] %v3738_v28  ;;  %v3747_v7 = vadd.f32 %v457_v52, %v3642_v23  ;;  %v459_v11 = vpop.f32.mrb[19].mxu0  ;;  %v3750_v13 = vadd.f32 %v570_v9, %v3634_v19  ;;  %v572_v17 = vpop.f32.mrb[19].mxu1 }
 0x174   :  { %4638 = vst [vmem:[#allocation44_spill] sm:$0xff] %v3741_v30  ;;  %4639 = vst [vmem:[#allocation45_spill] sm:$0xff] %v3744_v61  ;;  %v3753_v15 = vadd.f32 %v459_v11, %v3648_v26  ;;  %v3756_v28 = vadd.f32 %v572_v17, %v3640_v22 }
 0x175   :  { %4640 = vst [vmem:[#allocation46_spill] sm:$0xff] %v3747_v7  ;;  %4641 = vst [vmem:[#allocation47_spill] sm:$0xff] %v3750_v13 }
 0x176   :  { %4642 = vst [vmem:[#allocation48_spill] sm:$0xff] %v3753_v15  ;;  %4643 = vst [vmem:[#allocation49_spill] sm:$0xff] %v3756_v28 }
 0x178   :  { %v463_v0 = vpop.f32.mrb[20].mxu0  ;;  %v576_v30 = vpop.f32.mrb[20].mxu1 }
 0x179   :  { %v3759_v32 = vadd.f32 %v463_v0, %v3642_v23  ;;  %v465_v61 = vpop.f32.mrb[21].mxu0  ;;  %v3762_v52 = vadd.f32 %v576_v30, %v3634_v19  ;;  %v578_v7 = vpop.f32.mrb[21].mxu1 }
 0x17a   :  { %v3765_v9 = vadd.f32 %v465_v61, %v3648_v26  ;;  %v467_v13 = vpop.f32.mrb[22].mxu0  ;;  %v3768_v11 = vadd.f32 %v578_v7, %v3640_v22  ;;  %v580_v15 = vpop.f32.mrb[22].mxu1 }
 0x17b   :  { %4644 = vst [vmem:[#allocation50_spill] sm:$0xff] %v3759_v32  ;;  %4645 = vst [vmem:[#allocation51_spill] sm:$0xff] %v3762_v52  ;;  %v3771_v17 = vadd.f32 %v467_v13, %v3642_v23  ;;  %v469_v28 = vpop.f32.mrb[23].mxu0  ;;  %v3774_v0 = vadd.f32 %v580_v15, %v3634_v19  ;;  %v582_v32 = vpop.f32.mrb[23].mxu1 }
 0x17c   :  { %4646 = vst [vmem:[#allocation52_spill] sm:$0xff] %v3765_v9  ;;  %4647 = vst [vmem:[#allocation53_spill] sm:$0xff] %v3768_v11  ;;  %v3777_v30 = vadd.f32 %v469_v28, %v3648_v26  ;;  %v3780_v52 = vadd.f32 %v582_v32, %v3640_v22 }
 0x17d   :  { %4648 = vst [vmem:[#allocation54_spill] sm:$0xff] %v3771_v17  ;;  %4649 = vst [vmem:[#allocation55_spill] sm:$0xff] %v3774_v0 }
 0x17e   :  { %4650 = vst [vmem:[#allocation56_spill] sm:$0xff] %v3777_v30  ;;  %4651 = vst [vmem:[#allocation57_spill] sm:$0xff] %v3780_v52 }
 0x180   :  { %v473_v61 = vpop.f32.mrb[24].mxu0  ;;  %v586_v9 = vpop.f32.mrb[24].mxu1 }
 0x181   :  { %v3783_v7 = vadd.f32 %v473_v61, %v3642_v23  ;;  %v475_v11 = vpop.f32.mrb[25].mxu0  ;;  %v3786_v13 = vadd.f32 %v586_v9, %v3634_v19  ;;  %v588_v17 = vpop.f32.mrb[25].mxu1 }
 0x182   :  { %v3789_v15 = vadd.f32 %v475_v11, %v3648_v26  ;;  %v477_v0 = vpop.f32.mrb[26].mxu0  ;;  %v3792_v28 = vadd.f32 %v588_v17, %v3640_v22  ;;  %v590_v30 = vpop.f32.mrb[26].mxu1 }
 0x183   :  { %4652 = vst [vmem:[#allocation58_spill] sm:$0xff] %v3783_v7  ;;  %4653 = vst [vmem:[#allocation59_spill] sm:$0xff] %v3786_v13  ;;  %v3795_v32 = vadd.f32 %v477_v0, %v3642_v23  ;;  %v479_v52 = vpop.f32.mrb[27].mxu0  ;;  %v3798_v61 = vadd.f32 %v590_v30, %v3634_v19  ;;  %v592_v7 = vpop.f32.mrb[27].mxu1 }
 0x184   :  { %4654 = vst [vmem:[#allocation60_spill] sm:$0xff] %v3789_v15  ;;  %4655 = vst [vmem:[#allocation61_spill] sm:$0xff] %v3792_v28  ;;  %v3801_v9 = vadd.f32 %v479_v52, %v3648_v26  ;;  %v3804_v13 = vadd.f32 %v592_v7, %v3640_v22 }
 0x185   :  { %4656 = vst [vmem:[#allocation62_spill] sm:$0xff] %v3795_v32  ;;  %4657 = vst [vmem:[#allocation63_spill] sm:$0xff] %v3798_v61 }
 0x186   :  { %4658 = vst [vmem:[#allocation64_spill] sm:$0xff] %v3801_v9  ;;  %4659 = vst [vmem:[#allocation65_spill] sm:$0xff] %v3804_v13 }
 0x188   :  { %v483_v11 = vpop.f32.mrb[28].mxu0  ;;  %v596_v15 = vpop.f32.mrb[28].mxu1 }
 0x189   :  { %v3807_v17 = vadd.f32 %v483_v11, %v3642_v23  ;;  %v485_v28 = vpop.f32.mrb[29].mxu0  ;;  %v3810_v0 = vadd.f32 %v596_v15, %v3634_v19  ;;  %v598_v32 = vpop.f32.mrb[29].mxu1 }
 0x18a   :  { %v3813_v30 = vadd.f32 %v485_v28, %v3648_v26  ;;  %v487_v61 = vpop.f32.mrb[30].mxu0  ;;  %v3816_v52 = vadd.f32 %v598_v32, %v3640_v22  ;;  %v600_v9 = vpop.f32.mrb[30].mxu1  ;;  %v414_v28 = vadd.f32 %v3636_v20, %v3642_v23  ;;  %v527_v32 = vadd.f32 %v3638_v21, %v3634_v19 }
 0x18b   :  { %4660 = vst [vmem:[#allocation66_spill] sm:$0xff] %v3807_v17  ;;  %4661 = vst [vmem:[#allocation67_spill] sm:$0xff] %v3810_v0  ;;  %v3819_v7 = vadd.f32 %v487_v61, %v3642_v23  ;;  %v489_v13 = vpop.f32.mrb[31].mxu0  ;;  %v3822_v11 = vadd.f32 %v600_v9, %v3634_v19  ;;  %v602_v17 = vpop.f32.mrb[31].mxu1  ;;  %v416_v61 = vadd.f32 %v3644_v24, %v3648_v26 }
 0x18c   :  { %4662 = vst [vmem:[#allocation68_spill] sm:$0xff] %v3813_v30  ;;  %4663 = vst [vmem:[#allocation69_spill] sm:$0xff] %v3816_v52  ;;  %v3825_v15 = vadd.f32 %v489_v13, %v3648_v26  ;;  %v3828_v0 = vadd.f32 %v602_v17, %v3640_v22  ;;  %v529_v9 = vadd.f32 %v3646_v25, %v3640_v22 }
 0x18d   :  { %4664 = vst [vmem:[#allocation70_spill] sm:$0xff] %v3819_v7  ;;  %4665 = vst [vmem:[#allocation71_spill] sm:$0xff] %v3822_v11 }
 0x18e   :  { %4666 = vst [vmem:[#allocation72_spill] sm:$0xff] %v3825_v15  ;;  %4667 = vst [vmem:[#allocation73_spill] sm:$0xff] %v3828_v0 }
 0x190   :  { %v905_v11 = vpop.f32.mrb[32].mxu0  ;;  %v946_v7 = vpop.f32.mrb[32].mxu1 }
 0x191   :  { %v953_v52 = vadd.f32 %v905_v11, %v414_v28  ;;  %v955_v13 = vadd.f32 %v946_v7, %v527_v32  ;;  %v907_v15 = vpop.f32.mrb[33].mxu0  ;;  %v948_v30 = vpop.f32.mrb[33].mxu1  ;;  %v99_v11 = vld [vmem:[#allocation11] sm:$0xff] }
 0x192   :  { %v954_v17 = vadd.f32 %v907_v15, %v416_v61  ;;  %v956_v0 = vadd.f32 %v948_v30, %v529_v9  ;;  %v909_v27 = vpop.f32.mrb[34].mxu0  ;;  %v950_v18 = vpop.f32.mrb[34].mxu1 }
 0x193   :  { %v957_v20 = vmul.f32 0.5, %v953_v52  ;;  %v910_v23 = vpop.f32.mrb[35].mxu0  ;;  %v951_v16 = vpop.f32.mrb[35].mxu1 }
 0x194   :  { %v961_v19 = vmul.f32 0.5, %v954_v17  ;;  %v966_v21 = vmul.f32 0.5, %v956_v0 }
 0x195   :  { %2945 = vtanh.f32 %v957_v20 }
 0x196   :  { %2947 = vtanh.f32 %v961_v19 }
 0x197   :  { %2949 = vtanh.f32 %v955_v13  ;;  %v4668_v13 = vmov 0  }
 0x198   :  { %2951 = vtanh.f32 %v966_v21 }
 0x19f   :  { %v2946_v24 = vpop.eup %2945 }
 0x1a0   :  { %v2948_v22 = vpop.eup %2947  ;;  %v959_v25 = vmul.f32 0.5, %v2946_v24 }
 0x1a1   :  { %v963_v26 = vmul.f32 0.5, %v2948_v22  ;;  %v2950_v28 = vpop.eup %2949 }
 0x1a2   :  { %v960_v7 = vadd.f32 0.5, %v959_v25  ;;  %v2952_v16 = vpop.eup %2951 }
 0x1a3   :  { %v964_v15 = vadd.f32 0.5, %v963_v26  ;;  %v968_v52 = vmul.f32 0.5, %v2952_v16 }
 0x1a4   :  { %v971_v30 = vmul.f32 %v2950_v28, %v960_v7 }
 0x1a5   :  { %v970_v27 = vmul.f32 %v964_v15, %v99_v11  ;;  %v969_v32 = vadd.f32 0.5, %v968_v52 }
 0x1a7   :  { %v3838_v18 = vadd.f32 %v971_v30, %v970_v27 }
 0x1a9   :  { %2953 = vtanh.f32 %v3838_v18 }
 0x1b3   :  { %v2954_v61 = vpop.eup %2953 }
 0x1b4   :  { %v974_v0 = vmul.f32 %v2954_v61, %v969_v32 }
 0x1b6   :  { %975 = vst [vmem:[#allocation14] sm:$0xff] %v974_v0  ;;  %v983_v9 = vpack.c.bf16 %v974_v0, %v974_v0 }
 0x1b8   :  { %1017 = vmatmul.mubr.bf16.vlgmr.msra.gmra.mrb[36].mxu0 %v983_v9  ;;  %1058 = vmatmul.mubr.bf16.vlgmr.msra.gmra.mrb[36].mxu1 %v983_v9 }
 0x1b9   :  { %1099 = vmatpush1.bf16.msra.mxu0 %v3487_v36  ;;  %1140 = vmatpush1.bf16.msra.mxu1 %v3493_v38 }
 0x1ba   :  { %1100 = vmatprep.subr.bf16.mxu0 %v3491_v37  ;;  %1141 = vmatprep.subr.bf16.mxu1 %v3495_v39 }
 0x1bb   :  { %1130 = vmatprep.mubr.bf16.mxu0 %v4668_v13  ;;  %1171 = vmatprep.mubr.bf16.mxu1 %v4668_v13 }
 0x1bd   :  { %1101 = vmatpush1.bf16.msra.mxu0 %v3499_v40  ;;  %1142 = vmatpush1.bf16.msra.mxu1 %v3506_v42 }
 0x1be   :  { %1102 = vmatprep.subr.bf16.mxu0 %v3503_v41  ;;  %1143 = vmatprep.subr.bf16.mxu1 %v3513_v45 }
 0x1c1   :  { %1103 = vmatpush1.bf16.msra.mxu0 %v3511_v44  ;;  %1144 = vmatpush1.bf16.msra.mxu1 %v3518_v47 }
 0x1c2   :  { %1104 = vmatprep.subr.bf16.mxu0 %v3515_v46  ;;  %1145 = vmatprep.subr.bf16.mxu1 %v3520_v48 }
 0x1c5   :  { %1105 = vmatpush1.bf16.msra.mxu0 %v3526_v49  ;;  %1146 = vmatpush1.bf16.msra.mxu1 %v3532_v51 }
 0x1c6   :  { %1106 = vmatprep.subr.bf16.mxu0 %v3528_v50  ;;  %1147 = vmatprep.subr.bf16.mxu1 %v3538_v54 }
 0x1c9   :  { %1107 = vmatpush1.bf16.msra.mxu0 %v3535_v53  ;;  %1148 = vmatpush1.bf16.msra.mxu1 %v3544_v56 }
 0x1ca   :  { %1108 = vmatprep.subr.bf16.mxu0 %v3542_v55  ;;  %1149 = vmatprep.subr.bf16.mxu1 %v3546_v57 }
 0x1cd   :  { %1109 = vmatpush1.bf16.msra.mxu0 %v3552_v58  ;;  %1150 = vmatpush1.bf16.msra.mxu1 %v3558_v60 }
 0x1ce   :  { %1110 = vmatprep.subr.bf16.mxu0 %v3556_v59  ;;  %1151 = vmatprep.subr.bf16.mxu1 %v3564_v63 }
 0x1d1   :  { %1111 = vmatpush1.bf16.msra.mxu0 %v3562_v62  ;;  %1152 = vmatpush1.bf16.msra.mxu1 %v3570_v2 }
 0x1d2   :  { %1112 = vmatprep.subr.bf16.mxu0 %v3568_v1  ;;  %1153 = vmatprep.subr.bf16.mxu1 %v3572_v3 }
 0x1d5   :  { %1113 = vmatpush1.bf16.msra.mxu0 %v3578_v4  ;;  %1154 = vmatpush1.bf16.msra.mxu1 %v3582_v5 }
 0x1d6   :  { %1212 = vmatprep.subr.bf16.mxu0 %v3483_v33  ;;  %1253 = vmatprep.subr.bf16.mxu1 %v3485_v34 }
 0x28b   :  { %v1018_v17 = vpop.f32.mrb[36].mxu0  ;;  %v1059_v20 = vpop.f32.mrb[36].mxu1 }
 0x28c   :  { %v1066_v23 = vadd.f32 %v1018_v17, %v3651_v29  ;;  %v1068_v19 = vadd.f32 %v1059_v20, %v3654_v31  ;;  %v1020_v21 = vpop.f32.mrb[37].mxu0  ;;  %v1061_v24 = vpop.f32.mrb[37].mxu1 }
 0x28d   :  { %v1067_v22 = vadd.f32 %v1020_v21, %v3657_v35  ;;  %v1069_v25 = vadd.f32 %v1061_v24, %v3660_v43  ;;  %v1022_v26 = vpop.f32.mrb[38].mxu0  ;;  %v1063_v7 = vpop.f32.mrb[38].mxu1 }
 0x28e   :  { %v1070_v11 = vmul.f32 0.5, %v1066_v23  ;;  %v1023_v28 = vpop.f32.mrb[39].mxu0  ;;  %v1064_v15 = vpop.f32.mrb[39].mxu1 }
 0x28f   :  { %v1074_v30 = vmul.f32 0.5, %v1067_v22  ;;  %v1079_v27 = vmul.f32 0.5, %v1069_v25 }
 0x290   :  { %2955 = vtanh.f32 %v1070_v11 }
 0x291   :  { %2957 = vtanh.f32 %v1074_v30 }
 0x292   :  { %2959 = vtanh.f32 %v1068_v19 }
 0x293   :  { %2961 = vtanh.f32 %v1079_v27 }
 0x29a   :  { %v2956_v16 = vpop.eup %2955 }
 0x29b   :  { %v2958_v29 = vpop.eup %2957  ;;  %v1072_v52 = vmul.f32 0.5, %v2956_v16 }
 0x29c   :  { %v1076_v31 = vmul.f32 0.5, %v2958_v29  ;;  %v2960_v61 = vpop.eup %2959 }
 0x29d   :  { %v1073_v32 = vadd.f32 0.5, %v1072_v52  ;;  %v2962_v17 = vpop.eup %2961 }
 0x29e   :  { %v1077_v35 = vadd.f32 0.5, %v1076_v31  ;;  %v1081_v20 = vmul.f32 0.5, %v2962_v17 }
 0x29f   :  { %v1084_v0 = vmul.f32 %v2960_v61, %v1073_v32 }
 0x2a0   :  { %v1083_v43 = vmul.f32 %v1077_v35, %v3838_v18  ;;  %v1082_v23 = vadd.f32 0.5, %v1081_v20 }
 0x2a2   :  { %v3880_v9 = vadd.f32 %v1084_v0, %v1083_v43 }
 0x2a4   :  { %2963 = vtanh.f32 %v3880_v9 }
 0x2ae   :  { %v2964_v19 = vpop.eup %2963 }
 0x2af   :  { %v1087_v21 = vmul.f32 %v2964_v19, %v1082_v23 }
 0x2b1   :  { %1089 = vst [vmem:[#allocation14 + $0x8] sm:$0xff] %v1087_v21  ;;  %v1097_v24 = vpack.c.bf16 %v1087_v21, %v1087_v21 }
 0x2b3   :  { %1131 = vmatmul.mubr.bf16.vlgmr.msra.gmra.mrb[40].mxu0 %v1097_v24  ;;  %1172 = vmatmul.mubr.bf16.vlgmr.msra.gmra.mrb[40].mxu1 %v1097_v24 }
 0x2b4   :  { %1213 = vmatpush1.bf16.msra.mxu0 %v3487_v36  ;;  %1254 = vmatpush1.bf16.msra.mxu1 %v3493_v38 }
 0x2b5   :  { %1214 = vmatprep.subr.bf16.mxu0 %v3491_v37  ;;  %1255 = vmatprep.subr.bf16.mxu1 %v3495_v39 }
 0x2b6   :  { %1244 = vmatprep.mubr.bf16.mxu0 %v4668_v13  ;;  %1285 = vmatprep.mubr.bf16.mxu1 %v4668_v13 }
 0x2b8   :  { %1215 = vmatpush1.bf16.msra.mxu0 %v3499_v40  ;;  %1256 = vmatpush1.bf16.msra.mxu1 %v3506_v42 }
 0x2b9   :  { %1216 = vmatprep.subr.bf16.mxu0 %v3503_v41  ;;  %1257 = vmatprep.subr.bf16.mxu1 %v3513_v45 }
 0x2bc   :  { %1217 = vmatpush1.bf16.msra.mxu0 %v3511_v44  ;;  %1258 = vmatpush1.bf16.msra.mxu1 %v3518_v47 }
 0x2bd   :  { %1218 = vmatprep.subr.bf16.mxu0 %v3515_v46  ;;  %1259 = vmatprep.subr.bf16.mxu1 %v3520_v48 }
 0x2c0   :  { %1219 = vmatpush1.bf16.msra.mxu0 %v3526_v49  ;;  %1260 = vmatpush1.bf16.msra.mxu1 %v3532_v51 }
 0x2c1   :  { %1220 = vmatprep.subr.bf16.mxu0 %v3528_v50  ;;  %1261 = vmatprep.subr.bf16.mxu1 %v3538_v54 }
 0x2c4   :  { %1221 = vmatpush1.bf16.msra.mxu0 %v3535_v53  ;;  %1262 = vmatpush1.bf16.msra.mxu1 %v3544_v56 }
 0x2c5   :  { %1222 = vmatprep.subr.bf16.mxu0 %v3542_v55  ;;  %1263 = vmatprep.subr.bf16.mxu1 %v3546_v57 }
 0x2c8   :  { %1223 = vmatpush1.bf16.msra.mxu0 %v3552_v58  ;;  %1264 = vmatpush1.bf16.msra.mxu1 %v3558_v60 }
 0x2c9   :  { %1224 = vmatprep.subr.bf16.mxu0 %v3556_v59  ;;  %1265 = vmatprep.subr.bf16.mxu1 %v3564_v63 }
 0x2cc   :  { %1225 = vmatpush1.bf16.msra.mxu0 %v3562_v62  ;;  %1266 = vmatpush1.bf16.msra.mxu1 %v3570_v2 }
 0x2cd   :  { %1226 = vmatprep.subr.bf16.mxu0 %v3568_v1  ;;  %1267 = vmatprep.subr.bf16.mxu1 %v3572_v3 }
 0x2d0   :  { %1227 = vmatpush1.bf16.msra.mxu0 %v3578_v4  ;;  %1268 = vmatpush1.bf16.msra.mxu1 %v3582_v5 }
 0x2d1   :  { %1326 = vmatprep.subr.bf16.mxu0 %v3483_v33  ;;  %1367 = vmatprep.subr.bf16.mxu1 %v3485_v34 }
 0x386   :  { %v1132_v18 = vpop.f32.mrb[40].mxu0  ;;  %v1173_v22 = vpop.f32.mrb[40].mxu1 }
 0x387   :  { %v1180_v25 = vadd.f32 %v1132_v18, %v3663_v6  ;;  %v1182_v26 = vadd.f32 %v1173_v22, %v3666_v8  ;;  %v1134_v7 = vpop.f32.mrb[41].mxu0  ;;  %v1175_v11 = vpop.f32.mrb[41].mxu1 }
 0x388   :  { %v1181_v28 = vadd.f32 %v1134_v7, %v3669_v10  ;;  %v1183_v15 = vadd.f32 %v1175_v11, %v3672_v12  ;;  %v1136_v30 = vpop.f32.mrb[42].mxu0  ;;  %v1177_v27 = vpop.f32.mrb[42].mxu1 }
 0x389   :  { %v1184_v16 = vmul.f32 0.5, %v1180_v25  ;;  %v1137_v29 = vpop.f32.mrb[43].mxu0  ;;  %v1178_v52 = vpop.f32.mrb[43].mxu1 }
 0x38a   :  { %v1188_v33 = vmul.f32 0.5, %v1181_v28  ;;  %v1193_v34 = vmul.f32 0.5, %v1183_v15 }
 0x38b   :  { %2965 = vtanh.f32 %v1184_v16 }
 0x38c   :  { %2967 = vtanh.f32 %v1188_v33 }
 0x38d   :  { %2969 = vtanh.f32 %v1182_v26 }
 0x38e   :  { %2971 = vtanh.f32 %v1193_v34  ;;  %v3971_v34 = vld [vmem:[#allocation13] ss:$16 sps:$4 sm:$0xff]  }
 0x395   :  { %v2966_v31 = vpop.eup %2965 }
 0x396   :  { %v2968_v6 = vpop.eup %2967  ;;  %v1186_v32 = vmul.f32 0.5, %v2966_v31  ;;  %v3974_v31 = vld [vmem:[#allocation13 + $0x8] ss:$16 sps:$4 sm:$0xff]  }
 0x397   :  { %v1190_v8 = vmul.f32 0.5, %v2968_v6  ;;  %v2970_v35 = vpop.eup %2969  ;;  %v3977_v6 = vld [vmem:[#allocation13 + $0x24] ss:$16 sps:$4 sm:$0xff]  }
 0x398   :  { %v1187_v61 = vadd.f32 0.5, %v1186_v32  ;;  %v2972_v17 = vpop.eup %2971  ;;  %v3980_v32 = vld [vmem:[#allocation13 + $0x2c] ss:$16 sps:$4 sm:$0xff]  }
 0x399   :  { %v1191_v10 = vadd.f32 0.5, %v1190_v8  ;;  %v1195_v20 = vmul.f32 0.5, %v2972_v17  ;;  %v3985_v8 = vld [vmem:[#allocation13 + $0x20] ss:$16 sps:$4 sm:$0xff]   ;;  %v4006_v17 = vld [vmem:[#allocation13 + $0x6c] ss:$16 sps:$4 sm:$0xff]  }
 0x39a   :  { %v1198_v0 = vmul.f32 %v2970_v35, %v1187_v61  ;;  %v3988_v61 = vld [vmem:[#allocation13 + $0x28] ss:$16 sps:$4 sm:$0xff]   ;;  %v3991_v35 = vld [vmem:[#allocation13 + $0x44] ss:$16 sps:$4 sm:$0xff]  }
 0x39b   :  { %v1197_v12 = vmul.f32 %v1191_v10, %v3880_v9  ;;  %v1196_v23 = vadd.f32 0.5, %v1195_v20  ;;  %v3994_v10 = vld [vmem:[#allocation13 + $0x4c] ss:$16 sps:$4 sm:$0xff]   ;;  %v4009_v20 = vld [vmem:[#allocation13 + $0x60] ss:$16 sps:$4 sm:$0xff]  }
 0x39d   :  { %v3922_v43 = vadd.f32 %v1198_v0, %v1197_v12  ;;  %v3997_v0 = vld [vmem:[#allocation13 + $0x40] ss:$16 sps:$4 sm:$0xff]   ;;  %v4000_v12 = vld [vmem:[#allocation13 + $0x48] ss:$16 sps:$4 sm:$0xff]  }
 0x39f   :  { %2973 = vtanh.f32 %v3922_v43 }
 0x3a9   :  { %v2974_v19 = vpop.eup %2973 }
 0x3aa   :  { %v1201_v21 = vmul.f32 %v2974_v19, %v1196_v23  ;;  %v4012_v23 = vld [vmem:[#allocation13 + $0x68] ss:$16 sps:$4 sm:$0xff]   ;;  %v4015_v19 = vld [vmem:[#allocation13 + $0x84] ss:$16 sps:$4 sm:$0xff]  }
 0x3ac   :  { %1203 = vst [vmem:[#allocation14 + $0x10] sm:$0xff] %v1201_v21  ;;  %v1211_v24 = vpack.c.bf16 %v1201_v21, %v1201_v21  ;;  %v4018_v21 = vld [vmem:[#allocation13 + $0x8c] ss:$16 sps:$4 sm:$0xff]  }
 0x3ae   :  { %1245 = vmatmul.mubr.bf16.vlgmr.msra.gmra.mrb[44].mxu0 %v1211_v24  ;;  %1286 = vmatmul.mubr.bf16.vlgmr.msra.gmra.mrb[44].mxu1 %v1211_v24  ;;  %v4021_v24 = vld [vmem:[#allocation13 + $0x80] ss:$16 sps:$4 sm:$0xff]  }
 0x3af   :  { %1327 = vmatpush1.bf16.msra.mxu0 %v3487_v36  ;;  %1368 = vmatpush1.bf16.msra.mxu1 %v3493_v38  ;;  %v3957_v36 = vld [vmem:[#allocation13 + $0x4] ss:$16 sps:$4 sm:$0xff]  }
 0x3b0   :  { %1328 = vmatprep.subr.bf16.mxu0 %v3491_v37  ;;  %1369 = vmatprep.subr.bf16.mxu1 %v3495_v39  ;;  %v3960_v37 = vld [vmem:[#allocation13 + $0xc] ss:$16 sps:$4 sm:$0xff]  }
 0x3b1   :  { %1358 = vmatprep.mubr.bf16.mxu0 %v4668_v13  ;;  %1399 = vmatprep.mubr.bf16.mxu1 %v4668_v13 }
 0x3b3   :  { %1329 = vmatpush1.bf16.msra.mxu0 %v3499_v40  ;;  %1370 = vmatpush1.bf16.msra.mxu1 %v3506_v42 }
 0x3b4   :  { %1330 = vmatprep.subr.bf16.mxu0 %v3503_v41  ;;  %1371 = vmatprep.subr.bf16.mxu1 %v3513_v45  ;;  %v4669_v41 = vld [vmem:[#allocation23_spill] sm:$0xff] }
 0x3b7   :  { %1331 = vmatpush1.bf16.msra.mxu0 %v3511_v44  ;;  %1372 = vmatpush1.bf16.msra.mxu1 %v3518_v47 }
 0x3b8   :  { %1332 = vmatprep.subr.bf16.mxu0 %v3515_v46  ;;  %1373 = vmatprep.subr.bf16.mxu1 %v3520_v48  ;;  %v4670_v46 = vld [vmem:[#allocation24_spill] sm:$0xff]  ;;  %v4671_v48 = vld [vmem:[#allocation25_spill] sm:$0xff] }
 0x3bb   :  { %1333 = vmatpush1.bf16.msra.mxu0 %v3526_v49  ;;  %1374 = vmatpush1.bf16.msra.mxu1 %v3532_v51 }
 0x3bc   :  { %1334 = vmatprep.subr.bf16.mxu0 %v3528_v50  ;;  %1375 = vmatprep.subr.bf16.mxu1 %v3538_v54 }
 0x3bf   :  { %1335 = vmatpush1.bf16.msra.mxu0 %v3535_v53  ;;  %1376 = vmatpush1.bf16.msra.mxu1 %v3544_v56 }
 0x3c0   :  { %1336 = vmatprep.subr.bf16.mxu0 %v3542_v55  ;;  %1377 = vmatprep.subr.bf16.mxu1 %v3546_v57 }
 0x3c3   :  { %1337 = vmatpush1.bf16.msra.mxu0 %v3552_v58  ;;  %1378 = vmatpush1.bf16.msra.mxu1 %v3558_v60 }
 0x3c4   :  { %1338 = vmatprep.subr.bf16.mxu0 %v3556_v59  ;;  %1379 = vmatprep.subr.bf16.mxu1 %v3564_v63 }
 0x3c7   :  { %1339 = vmatpush1.bf16.msra.mxu0 %v3562_v62  ;;  %1380 = vmatpush1.bf16.msra.mxu1 %v3570_v2 }
 0x3c8   :  { %1340 = vmatprep.subr.bf16.mxu0 %v3568_v1  ;;  %1381 = vmatprep.subr.bf16.mxu1 %v3572_v3 }
 0x3cb   :  { %1341 = vmatpush1.bf16.msra.mxu0 %v3578_v4  ;;  %1382 = vmatpush1.bf16.msra.mxu1 %v3582_v5 }
 0x3cc   :  { %1440 = vmatprep.subr.bf16.mxu0 %v3957_v36  ;;  %1481 = vmatprep.subr.bf16.mxu1 %v3960_v37 }
 0x481   :  { %v1246_v38 = vpop.f32.mrb[44].mxu0  ;;  %v1287_v39 = vpop.f32.mrb[44].mxu1 }
 0x482   :  { %v1294_v40 = vadd.f32 %v1246_v38, %v3675_v14  ;;  %v1296_v42 = vadd.f32 %v1287_v39, %v4669_v41  ;;  %v1248_v44 = vpop.f32.mrb[45].mxu0  ;;  %v1289_v45 = vpop.f32.mrb[45].mxu1  ;;  %v4024_v38 = vld [vmem:[#allocation13 + $0x88] ss:$16 sps:$4 sm:$0xff]   ;;  %v4027_v39 = vld [vmem:[#allocation13 + $0xa4] ss:$16 sps:$4 sm:$0xff]  }
 0x483   :  { %v1295_v47 = vadd.f32 %v1248_v44, %v4670_v46  ;;  %v1297_v49 = vadd.f32 %v1289_v45, %v4671_v48  ;;  %v1250_v50 = vpop.f32.mrb[46].mxu0  ;;  %v1291_v51 = vpop.f32.mrb[46].mxu1  ;;  %v4673_v41 = vld [vmem:[#allocation27_spill] sm:$0xff]  ;;  %v4674_v44 = vld [vmem:[#allocation28_spill] sm:$0xff]  ;;  %v4675_v45 = vld [vmem:[#allocation29_spill] sm:$0xff] }
 0x484   :  { %v1298_v53 = vmul.f32 0.5, %v1294_v40  ;;  %v1251_v54 = vpop.f32.mrb[47].mxu0  ;;  %v1292_v55 = vpop.f32.mrb[47].mxu1  ;;  %v4030_v40 = vld [vmem:[#allocation13 + $0xac] ss:$16 sps:$4 sm:$0xff]  }
 0x485   :  { %v1302_v56 = vmul.f32 0.5, %v1295_v47  ;;  %v1307_v57 = vmul.f32 0.5, %v1297_v49 }
 0x486   :  { %2975 = vtanh.f32 %v1298_v53 }
 0x487   :  { %2977 = vtanh.f32 %v1302_v56 }
 0x488   :  { %2979 = vtanh.f32 %v1296_v42 }
 0x489   :  { %2981 = vtanh.f32 %v1307_v57 }
 0x490   :  { %v2976_v9 = vpop.eup %2975 }
 0x491   :  { %v2978_v14 = vpop.eup %2977  ;;  %v1300_v18 = vmul.f32 0.5, %v2976_v9 }
 0x492   :  { %v1304_v22 = vmul.f32 0.5, %v2978_v14  ;;  %v2980_v26 = vpop.eup %2979 }
 0x493   :  { %v1301_v25 = vadd.f32 0.5, %v1300_v18  ;;  %v2982_v30 = vpop.eup %2981 }
 0x494   :  { %v1305_v7 = vadd.f32 0.5, %v1304_v22  ;;  %v1309_v27 = vmul.f32 0.5, %v2982_v30 }
 0x495   :  { %v1312_v11 = vmul.f32 %v2980_v26, %v1301_v25 }
 0x496   :  { %v1311_v28 = vmul.f32 %v1305_v7, %v3922_v43  ;;  %v1310_v16 = vadd.f32 0.5, %v1309_v27  ;;  %v4003_v43 = vld [vmem:[#allocation13 + $0x64] ss:$16 sps:$4 sm:$0xff]   ;;  %v4078_v27 = vld [vmem:[#allocation13 + $0xa8] ss:$16 sps:$4 sm:$0xff]  }
 0x498   :  { %v3968_v15 = vadd.f32 %v1312_v11, %v1311_v28 }
 0x49a   :  { %2983 = vtanh.f32 %v3968_v15 }
 0x4a4   :  { %v2984_v29 = vpop.eup %2983 }
 0x4a5   :  { %v1315_v52 = vmul.f32 %v2984_v29, %v1310_v16  ;;  %v4081_v16 = vld [vmem:[#allocation13 + $0xc4] ss:$16 sps:$4 sm:$0xff]   ;;  %v4084_v29 = vld [vmem:[#allocation13 + $0xcc] ss:$16 sps:$4 sm:$0xff]  }
 0x4a7   :  { %1317 = vst [vmem:[#allocation14 + $0x18] sm:$0xff] %v1315_v52  ;;  %v1325_v33 = vpack.c.bf16 %v1315_v52, %v1315_v52  ;;  %v4087_v52 = vld [vmem:[#allocation13 + $0xc0] ss:$16 sps:$4 sm:$0xff]  }
 0x4a9   :  { %1359 = vmatmul.mubr.bf16.vlgmr.msra.gmra.mrb[48].mxu0 %v1325_v33  ;;  %1400 = vmatmul.mubr.bf16.vlgmr.msra.gmra.mrb[48].mxu1 %v1325_v33  ;;  %v4090_v33 = vld [vmem:[#allocation13 + $0xc8] ss:$16 sps:$4 sm:$0xff]  }
 0x4aa   :  { %1441 = vmatpush1.bf16.msra.mxu0 %v3971_v34  ;;  %1482 = vmatpush1.bf16.msra.mxu1 %v3974_v31 }
 0x4ab   :  { %1442 = vmatprep.subr.bf16.mxu0 %v3977_v6  ;;  %1483 = vmatprep.subr.bf16.mxu1 %v3980_v32 }
 0x4ac   :  { %1472 = vmatprep.mubr.bf16.mxu0 %v4668_v13  ;;  %1513 = vmatprep.mubr.bf16.mxu1 %v4668_v13 }
 0x4ae   :  { %1443 = vmatpush1.bf16.msra.mxu0 %v3985_v8  ;;  %1484 = vmatpush1.bf16.msra.mxu1 %v3988_v61 }
 0x4af   :  { %1444 = vmatprep.subr.bf16.mxu0 %v3991_v35  ;;  %1485 = vmatprep.subr.bf16.mxu1 %v3994_v10 }
 0x4b2   :  { %1445 = vmatpush1.bf16.msra.mxu0 %v3997_v0  ;;  %1486 = vmatpush1.bf16.msra.mxu1 %v4000_v12 }
 0x4b3   :  { %1446 = vmatprep.subr.bf16.mxu0 %v4003_v43  ;;  %1487 = vmatprep.subr.bf16.mxu1 %v4006_v17 }
 0x4b6   :  { %1447 = vmatpush1.bf16.msra.mxu0 %v4009_v20  ;;  %1488 = vmatpush1.bf16.msra.mxu1 %v4012_v23 }
 0x4b7   :  { %1448 = vmatprep.subr.bf16.mxu0 %v4015_v19  ;;  %1489 = vmatprep.subr.bf16.mxu1 %v4018_v21 }
 0x4ba   :  { %1449 = vmatpush1.bf16.msra.mxu0 %v4021_v24  ;;  %1490 = vmatpush1.bf16.msra.mxu1 %v4024_v38 }
 0x4bb   :  { %1450 = vmatprep.subr.bf16.mxu0 %v4027_v39  ;;  %1491 = vmatprep.subr.bf16.mxu1 %v4030_v40 }
 0x4be   :  { %1451 = vmatpush1.bf16.msra.mxu0 %v3552_v58  ;;  %1492 = vmatpush1.bf16.msra.mxu1 %v3558_v60  ;;  %v4672_v60 = vld [vmem:[#allocation26_spill] sm:$0xff] }
 0x4bf   :  { %1452 = vmatprep.subr.bf16.mxu0 %v3556_v59  ;;  %1493 = vmatprep.subr.bf16.mxu1 %v3564_v63 }
 0x4c2   :  { %1453 = vmatpush1.bf16.msra.mxu0 %v3562_v62  ;;  %1494 = vmatpush1.bf16.msra.mxu1 %v3570_v2 }
 0x4c3   :  { %1454 = vmatprep.subr.bf16.mxu0 %v3568_v1  ;;  %1495 = vmatprep.subr.bf16.mxu1 %v3572_v3 }
 0x4c6   :  { %1455 = vmatpush1.bf16.msra.mxu0 %v3578_v4  ;;  %1496 = vmatpush1.bf16.msra.mxu1 %v3582_v5 }
 0x4c7   :  { %1554 = vmatprep.subr.bf16.mxu0 %v3957_v36  ;;  %1595 = vmatprep.subr.bf16.mxu1 %v3960_v37 }
 0x57c   :  { %v1360_v58 = vpop.f32.mrb[48].mxu0  ;;  %v1401_v59 = vpop.f32.mrb[48].mxu1 }
 0x57d   :  { %v1408_v63 = vadd.f32 %v1360_v58, %v4672_v60  ;;  %v1410_v62 = vadd.f32 %v1401_v59, %v4673_v41  ;;  %v1362_v42 = vpop.f32.mrb[49].mxu0  ;;  %v1403_v2 = vpop.f32.mrb[49].mxu1  ;;  %v4093_v58 = vld [vmem:[#allocation13 + $0xe4] ss:$16 sps:$4 sm:$0xff]   ;;  %v4096_v59 = vld [vmem:[#allocation13 + $0xec] ss:$16 sps:$4 sm:$0xff]  }
 0x57e   :  { %v1409_v1 = vadd.f32 %v1362_v42, %v4674_v44  ;;  %v1411_v3 = vadd.f32 %v1403_v2, %v4675_v45  ;;  %v1364_v46 = vpop.f32.mrb[50].mxu0  ;;  %v1405_v4 = vpop.f32.mrb[50].mxu1  ;;  %v4099_v60 = vld [vmem:[#allocation13 + $0xe0] ss:$16 sps:$4 sm:$0xff]   ;;  %v4676_v42 = vld [vmem:[#allocation30_spill] sm:$0xff] }
 0x57f   :  { %v1412_v47 = vmul.f32 0.5, %v1408_v63  ;;  %v1365_v5 = vpop.f32.mrb[51].mxu0  ;;  %v1406_v48 = vpop.f32.mrb[51].mxu1  ;;  %v4102_v63 = vld [vmem:[#allocation13 + $0xe8] ss:$16 sps:$4 sm:$0xff]   ;;  %v4677_v44 = vld [vmem:[#allocation31_spill] sm:$0xff] }
 0x580   :  { %v1416_v49 = vmul.f32 0.5, %v1409_v1  ;;  %v1421_v50 = vmul.f32 0.5, %v1411_v3  ;;  %v4678_v46 = vld [vmem:[#allocation32_spill] sm:$0xff] }
 0x581   :  { %2985 = vtanh.f32 %v1412_v47  ;;  %v4679_v47 = vld [vmem:[#allocation33_spill] sm:$0xff] }
 0x582   :  { %2987 = vtanh.f32 %v1416_v49 }
 0x583   :  { %2989 = vtanh.f32 %v1410_v62 }
 0x584   :  { %2991 = vtanh.f32 %v1421_v50 }
 0x58b   :  { %v2986_v51 = vpop.eup %2985 }
 0x58c   :  { %v2988_v53 = vpop.eup %2987  ;;  %v1414_v54 = vmul.f32 0.5, %v2986_v51 }
 0x58d   :  { %v1418_v55 = vmul.f32 0.5, %v2988_v53  ;;  %v2990_v57 = vpop.eup %2989 }
 0x58e   :  { %v1415_v56 = vadd.f32 0.5, %v1414_v54  ;;  %v2992_v25 = vpop.eup %2991 }
 0x58f   :  { %v1419_v9 = vadd.f32 0.5, %v1418_v55  ;;  %v1423_v26 = vmul.f32 0.5, %v2992_v25 }
 0x590   :  { %v1426_v14 = vmul.f32 %v2990_v57, %v1415_v56 }
 0x591   :  { %v1425_v18 = vmul.f32 %v1419_v9, %v3968_v15  ;;  %v1424_v7 = vadd.f32 0.5, %v1423_v26  ;;  %v4075_v15 = vld [vmem:[#allocation13 + $0xa0] ss:$16 sps:$4 sm:$0xff]  }
 0x593   :  { %v4050_v22 = vadd.f32 %v1426_v14, %v1425_v18 }
 0x595   :  { %2993 = vtanh.f32 %v4050_v22 }
 0x59f   :  { %v2994_v11 = vpop.eup %2993 }
 0x5a0   :  { %v1429_v28 = vmul.f32 %v2994_v11, %v1424_v7 }
 0x5a2   :  { %1431 = vst [vmem:[#allocation14 + $0x20] sm:$0xff] %v1429_v28  ;;  %v1439_v30 = vpack.c.bf16 %v1429_v28, %v1429_v28 }
 0x5a4   :  { %1473 = vmatmul.mubr.bf16.vlgmr.msra.gmra.mrb[52].mxu0 %v1439_v30  ;;  %1514 = vmatmul.mubr.bf16.vlgmr.msra.gmra.mrb[52].mxu1 %v1439_v30 }
 0x5a5   :  { %1555 = vmatpush1.bf16.msra.mxu0 %v3971_v34  ;;  %1596 = vmatpush1.bf16.msra.mxu1 %v3974_v31 }
 0x5a6   :  { %1556 = vmatprep.subr.bf16.mxu0 %v3977_v6  ;;  %1597 = vmatprep.subr.bf16.mxu1 %v3980_v32 }
 0x5a7   :  { %1586 = vmatprep.mubr.bf16.mxu0 %v4668_v13  ;;  %1627 = vmatprep.mubr.bf16.mxu1 %v4668_v13 }
 0x5a9   :  { %1557 = vmatpush1.bf16.msra.mxu0 %v3985_v8  ;;  %1598 = vmatpush1.bf16.msra.mxu1 %v3988_v61 }
 0x5aa   :  { %1558 = vmatprep.subr.bf16.mxu0 %v3991_v35  ;;  %1599 = vmatprep.subr.bf16.mxu1 %v3994_v10 }
 0x5ad   :  { %1559 = vmatpush1.bf16.msra.mxu0 %v3997_v0  ;;  %1600 = vmatpush1.bf16.msra.mxu1 %v4000_v12 }
 0x5ae   :  { %1560 = vmatprep.subr.bf16.mxu0 %v4003_v43  ;;  %1601 = vmatprep.subr.bf16.mxu1 %v4006_v17 }
 0x5b1   :  { %1561 = vmatpush1.bf16.msra.mxu0 %v4009_v20  ;;  %1602 = vmatpush1.bf16.msra.mxu1 %v4012_v23 }
 0x5b2   :  { %1562 = vmatprep.subr.bf16.mxu0 %v4015_v19  ;;  %1603 = vmatprep.subr.bf16.mxu1 %v4018_v21 }
 0x5b5   :  { %1563 = vmatpush1.bf16.msra.mxu0 %v4021_v24  ;;  %1604 = vmatpush1.bf16.msra.mxu1 %v4024_v38 }
 0x5b6   :  { %1564 = vmatprep.subr.bf16.mxu0 %v4027_v39  ;;  %1605 = vmatprep.subr.bf16.mxu1 %v4030_v40 }
 0x5b9   :  { %1565 = vmatpush1.bf16.msra.mxu0 %v4075_v15  ;;  %1606 = vmatpush1.bf16.msra.mxu1 %v4078_v27 }
 0x5ba   :  { %1566 = vmatprep.subr.bf16.mxu0 %v4081_v16  ;;  %1607 = vmatprep.subr.bf16.mxu1 %v4084_v29 }
 0x5bd   :  { %1567 = vmatpush1.bf16.msra.mxu0 %v4087_v52  ;;  %1608 = vmatpush1.bf16.msra.mxu1 %v4090_v33 }
 0x5be   :  { %1568 = vmatprep.subr.bf16.mxu0 %v4093_v58  ;;  %1609 = vmatprep.subr.bf16.mxu1 %v4096_v59 }
 0x5c1   :  { %1569 = vmatpush1.bf16.msra.mxu0 %v4099_v60  ;;  %1610 = vmatpush1.bf16.msra.mxu1 %v4102_v63 }
 0x5c2   :  { %1668 = vmatprep.subr.bf16.mxu0 %v3957_v36  ;;  %1709 = vmatprep.subr.bf16.mxu1 %v3960_v37 }
 0x677   :  { %v1474_v41 = vpop.f32.mrb[52].mxu0  ;;  %v1515_v62 = vpop.f32.mrb[52].mxu1 }
 0x678   :  { %v1522_v2 = vadd.f32 %v1474_v41, %v4676_v42  ;;  %v1524_v1 = vadd.f32 %v1515_v62, %v4677_v44  ;;  %v1476_v45 = vpop.f32.mrb[53].mxu0  ;;  %v1517_v3 = vpop.f32.mrb[53].mxu1 }
 0x679   :  { %v1523_v4 = vadd.f32 %v1476_v45, %v4678_v46  ;;  %v1525_v5 = vadd.f32 %v1517_v3, %v4679_v47  ;;  %v1478_v48 = vpop.f32.mrb[54].mxu0  ;;  %v1519_v49 = vpop.f32.mrb[54].mxu1  ;;  %v4680_v45 = vld [vmem:[#allocation34_spill] sm:$0xff]  ;;  %v4681_v46 = vld [vmem:[#allocation35_spill] sm:$0xff] }
 0x67a   :  { %v1526_v50 = vmul.f32 0.5, %v1522_v2  ;;  %v1479_v51 = vpop.f32.mrb[55].mxu0  ;;  %v1520_v53 = vpop.f32.mrb[55].mxu1  ;;  %v4682_v48 = vld [vmem:[#allocation36_spill] sm:$0xff] }
 0x67b   :  { %v1530_v54 = vmul.f32 0.5, %v1523_v4  ;;  %v1535_v55 = vmul.f32 0.5, %v1525_v5 }
 0x67c   :  { %2995 = vtanh.f32 %v1526_v50  ;;  %v4683_v50 = vld [vmem:[#allocation37_spill] sm:$0xff] }
 0x67d   :  { %2997 = vtanh.f32 %v1530_v54 }
 0x67e   :  { %2999 = vtanh.f32 %v1524_v1 }
 0x67f   :  { %3001 = vtanh.f32 %v1535_v55 }
 0x686   :  { %v2996_v56 = vpop.eup %2995 }
 0x687   :  { %v2998_v57 = vpop.eup %2997  ;;  %v1528_v9 = vmul.f32 0.5, %v2996_v56 }
 0x688   :  { %v1532_v14 = vmul.f32 0.5, %v2998_v57  ;;  %v3000_v25 = vpop.eup %2999 }
 0x689   :  { %v1529_v18 = vadd.f32 0.5, %v1528_v9  ;;  %v3002_v30 = vpop.eup %3001 }
 0x68a   :  { %v1533_v26 = vadd.f32 0.5, %v1532_v14  ;;  %v1537_v41 = vmul.f32 0.5, %v3002_v30 }
 0x68b   :  { %v1540_v7 = vmul.f32 %v3000_v25, %v1529_v18 }
 0x68c   :  { %v1539_v11 = vmul.f32 %v1533_v26, %v4050_v22  ;;  %v1538_v62 = vadd.f32 0.5, %v1537_v41 }
 0x68e   :  { %v4112_v28 = vadd.f32 %v1540_v7, %v1539_v11 }
 0x690   :  { %3003 = vtanh.f32 %v4112_v28 }
 0x69a   :  { %v3004_v42 = vpop.eup %3003 }
 0x69b   :  { %v1543_v2 = vmul.f32 %v3004_v42, %v1538_v62 }
 0x69d   :  { %1545 = vst [vmem:[#allocation14 + $0x28] sm:$0xff] %v1543_v2  ;;  %v1553_v44 = vpack.c.bf16 %v1543_v2, %v1543_v2 }
 0x69f   :  { %1587 = vmatmul.mubr.bf16.vlgmr.msra.gmra.mrb[56].mxu0 %v1553_v44  ;;  %1628 = vmatmul.mubr.bf16.vlgmr.msra.gmra.mrb[56].mxu1 %v1553_v44 }
 0x6a0   :  { %1669 = vmatpush1.bf16.msra.mxu0 %v3971_v34  ;;  %1710 = vmatpush1.bf16.msra.mxu1 %v3974_v31 }
 0x6a1   :  { %1670 = vmatprep.subr.bf16.mxu0 %v3977_v6  ;;  %1711 = vmatprep.subr.bf16.mxu1 %v3980_v32 }
 0x6a2   :  { %1700 = vmatprep.mubr.bf16.mxu0 %v4668_v13  ;;  %1741 = vmatprep.mubr.bf16.mxu1 %v4668_v13 }
 0x6a4   :  { %1671 = vmatpush1.bf16.msra.mxu0 %v3985_v8  ;;  %1712 = vmatpush1.bf16.msra.mxu1 %v3988_v61 }
 0x6a5   :  { %1672 = vmatprep.subr.bf16.mxu0 %v3991_v35  ;;  %1713 = vmatprep.subr.bf16.mxu1 %v3994_v10 }
 0x6a8   :  { %1673 = vmatpush1.bf16.msra.mxu0 %v3997_v0  ;;  %1714 = vmatpush1.bf16.msra.mxu1 %v4000_v12 }
 0x6a9   :  { %1674 = vmatprep.subr.bf16.mxu0 %v4003_v43  ;;  %1715 = vmatprep.subr.bf16.mxu1 %v4006_v17 }
 0x6ac   :  { %1675 = vmatpush1.bf16.msra.mxu0 %v4009_v20  ;;  %1716 = vmatpush1.bf16.msra.mxu1 %v4012_v23 }
 0x6ad   :  { %1676 = vmatprep.subr.bf16.mxu0 %v4015_v19  ;;  %1717 = vmatprep.subr.bf16.mxu1 %v4018_v21 }
 0x6b0   :  { %1677 = vmatpush1.bf16.msra.mxu0 %v4021_v24  ;;  %1718 = vmatpush1.bf16.msra.mxu1 %v4024_v38 }
 0x6b1   :  { %1678 = vmatprep.subr.bf16.mxu0 %v4027_v39  ;;  %1719 = vmatprep.subr.bf16.mxu1 %v4030_v40 }
 0x6b4   :  { %1679 = vmatpush1.bf16.msra.mxu0 %v4075_v15  ;;  %1720 = vmatpush1.bf16.msra.mxu1 %v4078_v27 }
 0x6b5   :  { %1680 = vmatprep.subr.bf16.mxu0 %v4081_v16  ;;  %1721 = vmatprep.subr.bf16.mxu1 %v4084_v29 }
 0x6b8   :  { %1681 = vmatpush1.bf16.msra.mxu0 %v4087_v52  ;;  %1722 = vmatpush1.bf16.msra.mxu1 %v4090_v33 }
 0x6b9   :  { %1682 = vmatprep.subr.bf16.mxu0 %v4093_v58  ;;  %1723 = vmatprep.subr.bf16.mxu1 %v4096_v59 }
 0x6bc   :  { %1683 = vmatpush1.bf16.msra.mxu0 %v4099_v60  ;;  %1724 = vmatpush1.bf16.msra.mxu1 %v4102_v63 }
 0x6bd   :  { %1782 = vmatprep.subr.bf16.mxu0 %v3957_v36  ;;  %1823 = vmatprep.subr.bf16.mxu1 %v3960_v37 }
 0x772   :  { %v1588_v22 = vpop.f32.mrb[56].mxu0  ;;  %v1629_v1 = vpop.f32.mrb[56].mxu1 }
 0x773   :  { %v1636_v3 = vadd.f32 %v1588_v22, %v4680_v45  ;;  %v1638_v4 = vadd.f32 %v1629_v1, %v4681_v46  ;;  %v1590_v47 = vpop.f32.mrb[57].mxu0  ;;  %v1631_v5 = vpop.f32.mrb[57].mxu1 }
 0x774   :  { %v1637_v49 = vadd.f32 %v1590_v47, %v4682_v48  ;;  %v1639_v51 = vadd.f32 %v1631_v5, %v4683_v50  ;;  %v1592_v53 = vpop.f32.mrb[58].mxu0  ;;  %v1633_v54 = vpop.f32.mrb[58].mxu1  ;;  %v4684_v47 = vld [vmem:[#allocation38_spill] sm:$0xff]  ;;  %v4685_v48 = vld [vmem:[#allocation39_spill] sm:$0xff] }
 0x775   :  { %v1640_v55 = vmul.f32 0.5, %v1636_v3  ;;  %v1593_v56 = vpop.f32.mrb[59].mxu0  ;;  %v1634_v57 = vpop.f32.mrb[59].mxu1  ;;  %v4686_v53 = vld [vmem:[#allocation40_spill] sm:$0xff] }
 0x776   :  { %v1644_v9 = vmul.f32 0.5, %v1637_v49  ;;  %v1649_v14 = vmul.f32 0.5, %v1639_v51 }
 0x777   :  { %3005 = vtanh.f32 %v1640_v55  ;;  %v4687_v55 = vld [vmem:[#allocation41_spill] sm:$0xff] }
 0x778   :  { %3007 = vtanh.f32 %v1644_v9 }
 0x779   :  { %3009 = vtanh.f32 %v1638_v4 }
 0x77a   :  { %3011 = vtanh.f32 %v1649_v14 }
 0x781   :  { %v3006_v18 = vpop.eup %3005 }
 0x782   :  { %v3008_v25 = vpop.eup %3007  ;;  %v1642_v26 = vmul.f32 0.5, %v3006_v18 }
 0x783   :  { %v1646_v7 = vmul.f32 0.5, %v3008_v25  ;;  %v3010_v30 = vpop.eup %3009 }
 0x784   :  { %v1643_v11 = vadd.f32 0.5, %v1642_v26  ;;  %v3012_v44 = vpop.eup %3011 }
 0x785   :  { %v1647_v41 = vadd.f32 0.5, %v1646_v7  ;;  %v1651_v22 = vmul.f32 0.5, %v3012_v44 }
 0x786   :  { %v1654_v62 = vmul.f32 %v3010_v30, %v1643_v11 }
 0x787   :  { %v1653_v42 = vmul.f32 %v1647_v41, %v4112_v28  ;;  %v1652_v1 = vadd.f32 0.5, %v1651_v22 }
 0x789   :  { %v4154_v2 = vadd.f32 %v1654_v62, %v1653_v42 }
 0x78b   :  { %3013 = vtanh.f32 %v4154_v2 }
 0x795   :  { %v3014_v45 = vpop.eup %3013 }
 0x796   :  { %v1657_v3 = vmul.f32 %v3014_v45, %v1652_v1 }
 0x798   :  { %1659 = vst [vmem:[#allocation14 + $0x30] sm:$0xff] %v1657_v3  ;;  %v1667_v46 = vpack.c.bf16 %v1657_v3, %v1657_v3 }
 0x79a   :  { %1701 = vmatmul.mubr.bf16.vlgmr.msra.gmra.mrb[60].mxu0 %v1667_v46  ;;  %1742 = vmatmul.mubr.bf16.vlgmr.msra.gmra.mrb[60].mxu1 %v1667_v46 }
 0x79b   :  { %1783 = vmatpush1.bf16.msra.mxu0 %v3971_v34  ;;  %1824 = vmatpush1.bf16.msra.mxu1 %v3974_v31 }
 0x79c   :  { %1784 = vmatprep.subr.bf16.mxu0 %v3977_v6  ;;  %1825 = vmatprep.subr.bf16.mxu1 %v3980_v32 }
 0x79d   :  { %1814 = vmatprep.mubr.bf16.mxu0 %v4668_v13  ;;  %1855 = vmatprep.mubr.bf16.mxu1 %v4668_v13 }
 0x79f   :  { %1785 = vmatpush1.bf16.msra.mxu0 %v3985_v8  ;;  %1826 = vmatpush1.bf16.msra.mxu1 %v3988_v61 }
 0x7a0   :  { %1786 = vmatprep.subr.bf16.mxu0 %v3991_v35  ;;  %1827 = vmatprep.subr.bf16.mxu1 %v3994_v10 }
 0x7a3   :  { %1787 = vmatpush1.bf16.msra.mxu0 %v3997_v0  ;;  %1828 = vmatpush1.bf16.msra.mxu1 %v4000_v12 }
 0x7a4   :  { %1788 = vmatprep.subr.bf16.mxu0 %v4003_v43  ;;  %1829 = vmatprep.subr.bf16.mxu1 %v4006_v17 }
 0x7a7   :  { %1789 = vmatpush1.bf16.msra.mxu0 %v4009_v20  ;;  %1830 = vmatpush1.bf16.msra.mxu1 %v4012_v23 }
 0x7a8   :  { %1790 = vmatprep.subr.bf16.mxu0 %v4015_v19  ;;  %1831 = vmatprep.subr.bf16.mxu1 %v4018_v21 }
 0x7ab   :  { %1791 = vmatpush1.bf16.msra.mxu0 %v4021_v24  ;;  %1832 = vmatpush1.bf16.msra.mxu1 %v4024_v38 }
 0x7ac   :  { %1792 = vmatprep.subr.bf16.mxu0 %v4027_v39  ;;  %1833 = vmatprep.subr.bf16.mxu1 %v4030_v40 }
 0x7af   :  { %1793 = vmatpush1.bf16.msra.mxu0 %v4075_v15  ;;  %1834 = vmatpush1.bf16.msra.mxu1 %v4078_v27 }
 0x7b0   :  { %1794 = vmatprep.subr.bf16.mxu0 %v4081_v16  ;;  %1835 = vmatprep.subr.bf16.mxu1 %v4084_v29 }
 0x7b3   :  { %1795 = vmatpush1.bf16.msra.mxu0 %v4087_v52  ;;  %1836 = vmatpush1.bf16.msra.mxu1 %v4090_v33 }
 0x7b4   :  { %1796 = vmatprep.subr.bf16.mxu0 %v4093_v58  ;;  %1837 = vmatprep.subr.bf16.mxu1 %v4096_v59 }
 0x7b7   :  { %1797 = vmatpush1.bf16.msra.mxu0 %v4099_v60  ;;  %1838 = vmatpush1.bf16.msra.mxu1 %v4102_v63 }
 0x7b8   :  { %1896 = vmatprep.subr.bf16.mxu0 %v3957_v36  ;;  %1937 = vmatprep.subr.bf16.mxu1 %v3960_v37 }
 0x86d   :  { %v1702_v28 = vpop.f32.mrb[60].mxu0  ;;  %v1743_v4 = vpop.f32.mrb[60].mxu1 }
 0x86e   :  { %v1750_v5 = vadd.f32 %v1702_v28, %v4684_v47  ;;  %v1752_v49 = vadd.f32 %v1743_v4, %v4685_v48  ;;  %v1704_v50 = vpop.f32.mrb[61].mxu0  ;;  %v1745_v51 = vpop.f32.mrb[61].mxu1 }
 0x86f   :  { %v1751_v54 = vadd.f32 %v1704_v50, %v4686_v53  ;;  %v1753_v56 = vadd.f32 %v1745_v51, %v4687_v55  ;;  %v1706_v57 = vpop.f32.mrb[62].mxu0  ;;  %v1747_v9 = vpop.f32.mrb[62].mxu1  ;;  %v4688_v50 = vld [vmem:[#allocation42_spill] sm:$0xff]  ;;  %v4689_v53 = vld [vmem:[#allocation43_spill] sm:$0xff] }
 0x870   :  { %v1754_v14 = vmul.f32 0.5, %v1750_v5  ;;  %v1707_v18 = vpop.f32.mrb[63].mxu0  ;;  %v1748_v25 = vpop.f32.mrb[63].mxu1  ;;  %v4690_v57 = vld [vmem:[#allocation44_spill] sm:$0xff] }
 0x871   :  { %v1758_v26 = vmul.f32 0.5, %v1751_v54  ;;  %v1763_v7 = vmul.f32 0.5, %v1753_v56 }
 0x872   :  { %3015 = vtanh.f32 %v1754_v14  ;;  %v4691_v14 = vld [vmem:[#allocation45_spill] sm:$0xff] }
 0x873   :  { %3017 = vtanh.f32 %v1758_v26 }
 0x874   :  { %3019 = vtanh.f32 %v1752_v49 }
 0x875   :  { %3021 = vtanh.f32 %v1763_v7 }
 0x87c   :  { %v3016_v11 = vpop.eup %3015 }
 0x87d   :  { %v3018_v30 = vpop.eup %3017  ;;  %v1756_v41 = vmul.f32 0.5, %v3016_v11 }
 0x87e   :  { %v1760_v62 = vmul.f32 0.5, %v3018_v30  ;;  %v3020_v44 = vpop.eup %3019 }
 0x87f   :  { %v1757_v42 = vadd.f32 0.5, %v1756_v41  ;;  %v3022_v46 = vpop.eup %3021 }
 0x880   :  { %v1761_v22 = vadd.f32 0.5, %v1760_v62  ;;  %v1765_v28 = vmul.f32 0.5, %v3022_v46 }
 0x881   :  { %v1768_v1 = vmul.f32 %v3020_v44, %v1757_v42 }
 0x882   :  { %v1767_v45 = vmul.f32 %v1761_v22, %v4154_v2  ;;  %v1766_v4 = vadd.f32 0.5, %v1765_v28 }
 0x884   :  { %v4196_v3 = vadd.f32 %v1768_v1, %v1767_v45 }
 0x886   :  { %3023 = vtanh.f32 %v4196_v3 }
 0x890   :  { %v3024_v47 = vpop.eup %3023 }
 0x891   :  { %v1771_v5 = vmul.f32 %v3024_v47, %v1766_v4 }
 0x893   :  { %1773 = vst [vmem:[#allocation14 + $0x38] sm:$0xff] %v1771_v5  ;;  %v1781_v48 = vpack.c.bf16 %v1771_v5, %v1771_v5 }
 0x895   :  { %1815 = vmatmul.mubr.bf16.vlgmr.msra.gmra.mrb[64].mxu0 %v1781_v48  ;;  %1856 = vmatmul.mubr.bf16.vlgmr.msra.gmra.mrb[64].mxu1 %v1781_v48 }
 0x896   :  { %1897 = vmatpush1.bf16.msra.mxu0 %v3971_v34  ;;  %1938 = vmatpush1.bf16.msra.mxu1 %v3974_v31 }
 0x897   :  { %1898 = vmatprep.subr.bf16.mxu0 %v3977_v6  ;;  %1939 = vmatprep.subr.bf16.mxu1 %v3980_v32 }
 0x898   :  { %1928 = vmatprep.mubr.bf16.mxu0 %v4668_v13  ;;  %1969 = vmatprep.mubr.bf16.mxu1 %v4668_v13 }
 0x89a   :  { %1899 = vmatpush1.bf16.msra.mxu0 %v3985_v8  ;;  %1940 = vmatpush1.bf16.msra.mxu1 %v3988_v61 }
 0x89b   :  { %1900 = vmatprep.subr.bf16.mxu0 %v3991_v35  ;;  %1941 = vmatprep.subr.bf16.mxu1 %v3994_v10 }
 0x89e   :  { %1901 = vmatpush1.bf16.msra.mxu0 %v3997_v0  ;;  %1942 = vmatpush1.bf16.msra.mxu1 %v4000_v12 }
 0x89f   :  { %1902 = vmatprep.subr.bf16.mxu0 %v4003_v43  ;;  %1943 = vmatprep.subr.bf16.mxu1 %v4006_v17 }
 0x8a2   :  { %1903 = vmatpush1.bf16.msra.mxu0 %v4009_v20  ;;  %1944 = vmatpush1.bf16.msra.mxu1 %v4012_v23 }
 0x8a3   :  { %1904 = vmatprep.subr.bf16.mxu0 %v4015_v19  ;;  %1945 = vmatprep.subr.bf16.mxu1 %v4018_v21 }
 0x8a6   :  { %1905 = vmatpush1.bf16.msra.mxu0 %v4021_v24  ;;  %1946 = vmatpush1.bf16.msra.mxu1 %v4024_v38 }
 0x8a7   :  { %1906 = vmatprep.subr.bf16.mxu0 %v4027_v39  ;;  %1947 = vmatprep.subr.bf16.mxu1 %v4030_v40 }
 0x8aa   :  { %1907 = vmatpush1.bf16.msra.mxu0 %v4075_v15  ;;  %1948 = vmatpush1.bf16.msra.mxu1 %v4078_v27 }
 0x8ab   :  { %1908 = vmatprep.subr.bf16.mxu0 %v4081_v16  ;;  %1949 = vmatprep.subr.bf16.mxu1 %v4084_v29 }
 0x8ae   :  { %1909 = vmatpush1.bf16.msra.mxu0 %v4087_v52  ;;  %1950 = vmatpush1.bf16.msra.mxu1 %v4090_v33 }
 0x8af   :  { %1910 = vmatprep.subr.bf16.mxu0 %v4093_v58  ;;  %1951 = vmatprep.subr.bf16.mxu1 %v4096_v59 }
 0x8b2   :  { %1911 = vmatpush1.bf16.msra.mxu0 %v4099_v60  ;;  %1952 = vmatpush1.bf16.msra.mxu1 %v4102_v63 }
 0x8b3   :  { %2010 = vmatprep.subr.bf16.mxu0 %v3957_v36  ;;  %2051 = vmatprep.subr.bf16.mxu1 %v3960_v37 }
 0x968   :  { %v1816_v2 = vpop.f32.mrb[64].mxu0  ;;  %v1857_v49 = vpop.f32.mrb[64].mxu1 }
 0x969   :  { %v1864_v51 = vadd.f32 %v1816_v2, %v4688_v50  ;;  %v1866_v54 = vadd.f32 %v1857_v49, %v4689_v53  ;;  %v1818_v55 = vpop.f32.mrb[65].mxu0  ;;  %v1859_v56 = vpop.f32.mrb[65].mxu1 }
 0x96a   :  { %v1865_v9 = vadd.f32 %v1818_v55, %v4690_v57  ;;  %v1867_v18 = vadd.f32 %v1859_v56, %v4691_v14  ;;  %v1820_v25 = vpop.f32.mrb[66].mxu0  ;;  %v1861_v26 = vpop.f32.mrb[66].mxu1  ;;  %v4692_v55 = vld [vmem:[#allocation46_spill] sm:$0xff]  ;;  %v4693_v57 = vld [vmem:[#allocation47_spill] sm:$0xff] }
 0x96b   :  { %v1868_v7 = vmul.f32 0.5, %v1864_v51  ;;  %v1821_v11 = vpop.f32.mrb[67].mxu0  ;;  %v1862_v30 = vpop.f32.mrb[67].mxu1  ;;  %v4694_v25 = vld [vmem:[#allocation48_spill] sm:$0xff] }
 0x96c   :  { %v1872_v41 = vmul.f32 0.5, %v1865_v9  ;;  %v1877_v62 = vmul.f32 0.5, %v1867_v18 }
 0x96d   :  { %3025 = vtanh.f32 %v1868_v7  ;;  %v4695_v7 = vld [vmem:[#allocation49_spill] sm:$0xff] }
 0x96e   :  { %3027 = vtanh.f32 %v1872_v41 }
 0x96f   :  { %3029 = vtanh.f32 %v1866_v54 }
 0x970   :  { %3031 = vtanh.f32 %v1877_v62 }
 0x977   :  { %v3026_v42 = vpop.eup %3025 }
 0x978   :  { %v3028_v44 = vpop.eup %3027  ;;  %v1870_v22 = vmul.f32 0.5, %v3026_v42 }
 0x979   :  { %v1874_v1 = vmul.f32 0.5, %v3028_v44  ;;  %v3030_v46 = vpop.eup %3029 }
 0x97a   :  { %v1871_v45 = vadd.f32 0.5, %v1870_v22  ;;  %v3032_v48 = vpop.eup %3031 }
 0x97b   :  { %v1875_v28 = vadd.f32 0.5, %v1874_v1  ;;  %v1879_v2 = vmul.f32 0.5, %v3032_v48 }
 0x97c   :  { %v1882_v4 = vmul.f32 %v3030_v46, %v1871_v45 }
 0x97d   :  { %v1881_v47 = vmul.f32 %v1875_v28, %v4196_v3  ;;  %v1880_v49 = vadd.f32 0.5, %v1879_v2 }
 0x97f   :  { %v4238_v5 = vadd.f32 %v1882_v4, %v1881_v47 }
 0x981   :  { %3033 = vtanh.f32 %v4238_v5 }
 0x98b   :  { %v3034_v50 = vpop.eup %3033 }
 0x98c   :  { %v1885_v51 = vmul.f32 %v3034_v50, %v1880_v49 }
 0x98e   :  { %1887 = vst [vmem:[#allocation14 + $0x40] sm:$0xff] %v1885_v51  ;;  %v1895_v53 = vpack.c.bf16 %v1885_v51, %v1885_v51 }
 0x990   :  { %1929 = vmatmul.mubr.bf16.vlgmr.msra.gmra.mrb[68].mxu0 %v1895_v53  ;;  %1970 = vmatmul.mubr.bf16.vlgmr.msra.gmra.mrb[68].mxu1 %v1895_v53 }
 0x991   :  { %2011 = vmatpush1.bf16.msra.mxu0 %v3971_v34  ;;  %2052 = vmatpush1.bf16.msra.mxu1 %v3974_v31 }
 0x992   :  { %2012 = vmatprep.subr.bf16.mxu0 %v3977_v6  ;;  %2053 = vmatprep.subr.bf16.mxu1 %v3980_v32 }
 0x993   :  { %2042 = vmatprep.mubr.bf16.mxu0 %v4668_v13  ;;  %2083 = vmatprep.mubr.bf16.mxu1 %v4668_v13 }
 0x995   :  { %2013 = vmatpush1.bf16.msra.mxu0 %v3985_v8  ;;  %2054 = vmatpush1.bf16.msra.mxu1 %v3988_v61 }
 0x996   :  { %2014 = vmatprep.subr.bf16.mxu0 %v3991_v35  ;;  %2055 = vmatprep.subr.bf16.mxu1 %v3994_v10 }
 0x999   :  { %2015 = vmatpush1.bf16.msra.mxu0 %v3997_v0  ;;  %2056 = vmatpush1.bf16.msra.mxu1 %v4000_v12 }
 0x99a   :  { %2016 = vmatprep.subr.bf16.mxu0 %v4003_v43  ;;  %2057 = vmatprep.subr.bf16.mxu1 %v4006_v17 }
 0x99d   :  { %2017 = vmatpush1.bf16.msra.mxu0 %v4009_v20  ;;  %2058 = vmatpush1.bf16.msra.mxu1 %v4012_v23 }
 0x99e   :  { %2018 = vmatprep.subr.bf16.mxu0 %v4015_v19  ;;  %2059 = vmatprep.subr.bf16.mxu1 %v4018_v21 }
 0x9a1   :  { %2019 = vmatpush1.bf16.msra.mxu0 %v4021_v24  ;;  %2060 = vmatpush1.bf16.msra.mxu1 %v4024_v38 }
 0x9a2   :  { %2020 = vmatprep.subr.bf16.mxu0 %v4027_v39  ;;  %2061 = vmatprep.subr.bf16.mxu1 %v4030_v40 }
 0x9a5   :  { %2021 = vmatpush1.bf16.msra.mxu0 %v4075_v15  ;;  %2062 = vmatpush1.bf16.msra.mxu1 %v4078_v27 }
 0x9a6   :  { %2022 = vmatprep.subr.bf16.mxu0 %v4081_v16  ;;  %2063 = vmatprep.subr.bf16.mxu1 %v4084_v29 }
 0x9a9   :  { %2023 = vmatpush1.bf16.msra.mxu0 %v4087_v52  ;;  %2064 = vmatpush1.bf16.msra.mxu1 %v4090_v33 }
 0x9aa   :  { %2024 = vmatprep.subr.bf16.mxu0 %v4093_v58  ;;  %2065 = vmatprep.subr.bf16.mxu1 %v4096_v59 }
 0x9ad   :  { %2025 = vmatpush1.bf16.msra.mxu0 %v4099_v60  ;;  %2066 = vmatpush1.bf16.msra.mxu1 %v4102_v63 }
 0x9ae   :  { %2124 = vmatprep.subr.bf16.mxu0 %v3957_v36  ;;  %2165 = vmatprep.subr.bf16.mxu1 %v3960_v37 }
 0xa63   :  { %v1930_v3 = vpop.f32.mrb[68].mxu0  ;;  %v1971_v54 = vpop.f32.mrb[68].mxu1 }
 0xa64   :  { %v1978_v56 = vadd.f32 %v1930_v3, %v4692_v55  ;;  %v1980_v9 = vadd.f32 %v1971_v54, %v4693_v57  ;;  %v1932_v14 = vpop.f32.mrb[69].mxu0  ;;  %v1973_v18 = vpop.f32.mrb[69].mxu1 }
 0xa65   :  { %v1979_v26 = vadd.f32 %v1932_v14, %v4694_v25  ;;  %v1981_v11 = vadd.f32 %v1973_v18, %v4695_v7  ;;  %v1934_v30 = vpop.f32.mrb[70].mxu0  ;;  %v1975_v41 = vpop.f32.mrb[70].mxu1  ;;  %v4696_v14 = vld [vmem:[#allocation50_spill] sm:$0xff]  ;;  %v4697_v25 = vld [vmem:[#allocation51_spill] sm:$0xff] }
 0xa66   :  { %v1982_v62 = vmul.f32 0.5, %v1978_v56  ;;  %v1935_v42 = vpop.f32.mrb[71].mxu0  ;;  %v1976_v44 = vpop.f32.mrb[71].mxu1  ;;  %v4698_v30 = vld [vmem:[#allocation52_spill] sm:$0xff] }
 0xa67   :  { %v1986_v22 = vmul.f32 0.5, %v1979_v26  ;;  %v1991_v1 = vmul.f32 0.5, %v1981_v11 }
 0xa68   :  { %3035 = vtanh.f32 %v1982_v62  ;;  %v4699_v62 = vld [vmem:[#allocation53_spill] sm:$0xff] }
 0xa69   :  { %3037 = vtanh.f32 %v1986_v22 }
 0xa6a   :  { %3039 = vtanh.f32 %v1980_v9 }
 0xa6b   :  { %3041 = vtanh.f32 %v1991_v1 }
 0xa72   :  { %v3036_v45 = vpop.eup %3035 }
 0xa73   :  { %v3038_v46 = vpop.eup %3037  ;;  %v1984_v28 = vmul.f32 0.5, %v3036_v45 }
 0xa74   :  { %v1988_v4 = vmul.f32 0.5, %v3038_v46  ;;  %v3040_v48 = vpop.eup %3039 }
 0xa75   :  { %v1985_v47 = vadd.f32 0.5, %v1984_v28  ;;  %v3042_v53 = vpop.eup %3041 }
 0xa76   :  { %v1989_v2 = vadd.f32 0.5, %v1988_v4  ;;  %v1993_v3 = vmul.f32 0.5, %v3042_v53 }
 0xa77   :  { %v1996_v49 = vmul.f32 %v3040_v48, %v1985_v47 }
 0xa78   :  { %v1995_v50 = vmul.f32 %v1989_v2, %v4238_v5  ;;  %v1994_v54 = vadd.f32 0.5, %v1993_v3 }
 0xa7a   :  { %v4280_v51 = vadd.f32 %v1996_v49, %v1995_v50 }
 0xa7c   :  { %3043 = vtanh.f32 %v4280_v51 }
 0xa86   :  { %v3044_v55 = vpop.eup %3043 }
 0xa87   :  { %v1999_v56 = vmul.f32 %v3044_v55, %v1994_v54 }
 0xa89   :  { %2001 = vst [vmem:[#allocation14 + $0x48] sm:$0xff] %v1999_v56  ;;  %v2009_v57 = vpack.c.bf16 %v1999_v56, %v1999_v56 }
 0xa8b   :  { %2043 = vmatmul.mubr.bf16.vlgmr.msra.gmra.mrb[72].mxu0 %v2009_v57  ;;  %2084 = vmatmul.mubr.bf16.vlgmr.msra.gmra.mrb[72].mxu1 %v2009_v57 }
 0xa8c   :  { %2125 = vmatpush1.bf16.msra.mxu0 %v3971_v34  ;;  %2166 = vmatpush1.bf16.msra.mxu1 %v3974_v31 }
 0xa8d   :  { %2126 = vmatprep.subr.bf16.mxu0 %v3977_v6  ;;  %2167 = vmatprep.subr.bf16.mxu1 %v3980_v32 }
 0xa8e   :  { %2156 = vmatprep.mubr.bf16.mxu0 %v4668_v13  ;;  %2197 = vmatprep.mubr.bf16.mxu1 %v4668_v13 }
 0xa90   :  { %2127 = vmatpush1.bf16.msra.mxu0 %v3985_v8  ;;  %2168 = vmatpush1.bf16.msra.mxu1 %v3988_v61 }
 0xa91   :  { %2128 = vmatprep.subr.bf16.mxu0 %v3991_v35  ;;  %2169 = vmatprep.subr.bf16.mxu1 %v3994_v10 }
 0xa94   :  { %2129 = vmatpush1.bf16.msra.mxu0 %v3997_v0  ;;  %2170 = vmatpush1.bf16.msra.mxu1 %v4000_v12 }
 0xa95   :  { %2130 = vmatprep.subr.bf16.mxu0 %v4003_v43  ;;  %2171 = vmatprep.subr.bf16.mxu1 %v4006_v17 }
 0xa98   :  { %2131 = vmatpush1.bf16.msra.mxu0 %v4009_v20  ;;  %2172 = vmatpush1.bf16.msra.mxu1 %v4012_v23 }
 0xa99   :  { %2132 = vmatprep.subr.bf16.mxu0 %v4015_v19  ;;  %2173 = vmatprep.subr.bf16.mxu1 %v4018_v21 }
 0xa9c   :  { %2133 = vmatpush1.bf16.msra.mxu0 %v4021_v24  ;;  %2174 = vmatpush1.bf16.msra.mxu1 %v4024_v38 }
 0xa9d   :  { %2134 = vmatprep.subr.bf16.mxu0 %v4027_v39  ;;  %2175 = vmatprep.subr.bf16.mxu1 %v4030_v40 }
 0xaa0   :  { %2135 = vmatpush1.bf16.msra.mxu0 %v4075_v15  ;;  %2176 = vmatpush1.bf16.msra.mxu1 %v4078_v27 }
 0xaa1   :  { %2136 = vmatprep.subr.bf16.mxu0 %v4081_v16  ;;  %2177 = vmatprep.subr.bf16.mxu1 %v4084_v29 }
 0xaa4   :  { %2137 = vmatpush1.bf16.msra.mxu0 %v4087_v52  ;;  %2178 = vmatpush1.bf16.msra.mxu1 %v4090_v33 }
 0xaa5   :  { %2138 = vmatprep.subr.bf16.mxu0 %v4093_v58  ;;  %2179 = vmatprep.subr.bf16.mxu1 %v4096_v59 }
 0xaa8   :  { %2139 = vmatpush1.bf16.msra.mxu0 %v4099_v60  ;;  %2180 = vmatpush1.bf16.msra.mxu1 %v4102_v63 }
 0xaa9   :  { %2238 = vmatprep.subr.bf16.mxu0 %v3957_v36  ;;  %2279 = vmatprep.subr.bf16.mxu1 %v3960_v37 }
 0xb5e   :  { %v2044_v5 = vpop.f32.mrb[72].mxu0  ;;  %v2085_v9 = vpop.f32.mrb[72].mxu1 }
 0xb5f   :  { %v2092_v18 = vadd.f32 %v2044_v5, %v4696_v14  ;;  %v2094_v26 = vadd.f32 %v2085_v9, %v4697_v25  ;;  %v2046_v7 = vpop.f32.mrb[73].mxu0  ;;  %v2087_v11 = vpop.f32.mrb[73].mxu1 }
 0xb60   :  { %v2093_v41 = vadd.f32 %v2046_v7, %v4698_v30  ;;  %v2095_v42 = vadd.f32 %v2087_v11, %v4699_v62  ;;  %v2048_v44 = vpop.f32.mrb[74].mxu0  ;;  %v2089_v22 = vpop.f32.mrb[74].mxu1 }
 0xb61   :  { %v2096_v1 = vmul.f32 0.5, %v2092_v18  ;;  %v2049_v45 = vpop.f32.mrb[75].mxu0  ;;  %v2090_v46 = vpop.f32.mrb[75].mxu1 }
 0xb62   :  { %v2100_v36 = vmul.f32 0.5, %v2093_v41  ;;  %v2105_v37 = vmul.f32 0.5, %v2095_v42 }
 0xb63   :  { %3045 = vtanh.f32 %v2096_v1 }
 0xb64   :  { %3047 = vtanh.f32 %v2100_v36 }
 0xb65   :  { %3049 = vtanh.f32 %v2094_v26 }
 0xb66   :  { %3051 = vtanh.f32 %v2105_v37 }
 0xb6d   :  { %v3046_v28 = vpop.eup %3045 }
 0xb6e   :  { %v3048_v4 = vpop.eup %3047  ;;  %v2098_v47 = vmul.f32 0.5, %v3046_v28  ;;  %v4371_v28 = vld [vmem:[#allocation13] ss:$16 sps:$4 sm:$0xff]  }
 0xb6f   :  { %v2102_v48 = vmul.f32 0.5, %v3048_v4  ;;  %v3050_v49 = vpop.eup %3049  ;;  %v4374_v4 = vld [vmem:[#allocation13 + $0x8] ss:$16 sps:$4 sm:$0xff]  }
 0xb70   :  { %v2099_v2 = vadd.f32 0.5, %v2098_v47  ;;  %v3052_v55 = vpop.eup %3051  ;;  %v4377_v47 = vld [vmem:[#allocation13 + $0x24] ss:$16 sps:$4 sm:$0xff]  }
 0xb71   :  { %v2103_v50 = vadd.f32 0.5, %v2102_v48  ;;  %v2107_v56 = vmul.f32 0.5, %v3052_v55  ;;  %v4380_v48 = vld [vmem:[#allocation13 + $0x2c] ss:$16 sps:$4 sm:$0xff]   ;;  %v4403_v55 = vld [vmem:[#allocation13 + $0x64] ss:$16 sps:$4 sm:$0xff]  }
 0xb72   :  { %v2110_v53 = vmul.f32 %v3050_v49, %v2099_v2  ;;  %v4385_v2 = vld [vmem:[#allocation13 + $0x20] ss:$16 sps:$4 sm:$0xff]   ;;  %v4388_v49 = vld [vmem:[#allocation13 + $0x28] ss:$16 sps:$4 sm:$0xff]  }
 0xb73   :  { %v2109_v3 = vmul.f32 %v2103_v50, %v4280_v51  ;;  %v2108_v57 = vadd.f32 0.5, %v2107_v56  ;;  %v4391_v50 = vld [vmem:[#allocation13 + $0x44] ss:$16 sps:$4 sm:$0xff]   ;;  %v4406_v56 = vld [vmem:[#allocation13 + $0x6c] ss:$16 sps:$4 sm:$0xff]  }
 0xb75   :  { %v4322_v54 = vadd.f32 %v2110_v53, %v2109_v3  ;;  %v4394_v53 = vld [vmem:[#allocation13 + $0x4c] ss:$16 sps:$4 sm:$0xff]   ;;  %v4397_v3 = vld [vmem:[#allocation13 + $0x40] ss:$16 sps:$4 sm:$0xff]  }
 0xb77   :  { %3053 = vtanh.f32 %v4322_v54 }
 0xb81   :  { %v3054_v5 = vpop.eup %3053 }
 0xb82   :  { %v2113_v9 = vmul.f32 %v3054_v5, %v2108_v57  ;;  %v4409_v57 = vld [vmem:[#allocation13 + $0x60] ss:$16 sps:$4 sm:$0xff]   ;;  %v4412_v5 = vld [vmem:[#allocation13 + $0x68] ss:$16 sps:$4 sm:$0xff]  }
 0xb84   :  { %2115 = vst [vmem:[#allocation14 + $0x50] sm:$0xff] %v2113_v9  ;;  %v2123_v14 = vpack.c.bf16 %v2113_v9, %v2113_v9  ;;  %v4415_v9 = vld [vmem:[#allocation13 + $0x84] ss:$16 sps:$4 sm:$0xff]  }
 0xb86   :  { %2157 = vmatmul.mubr.bf16.vlgmr.msra.gmra.mrb[76].mxu0 %v2123_v14  ;;  %2198 = vmatmul.mubr.bf16.vlgmr.msra.gmra.mrb[76].mxu1 %v2123_v14  ;;  %v4418_v14 = vld [vmem:[#allocation13 + $0x8c] ss:$16 sps:$4 sm:$0xff]  }
 0xb87   :  { %2239 = vmatpush1.bf16.msra.mxu0 %v3971_v34  ;;  %2280 = vmatpush1.bf16.msra.mxu1 %v3974_v31  ;;  %v4357_v34 = vld [vmem:[#allocation13 + $0x4] ss:$16 sps:$4 sm:$0xff]   ;;  %v4360_v31 = vld [vmem:[#allocation13 + $0xc] ss:$16 sps:$4 sm:$0xff]  }
 0xb88   :  { %2240 = vmatprep.subr.bf16.mxu0 %v3977_v6  ;;  %2281 = vmatprep.subr.bf16.mxu1 %v3980_v32 }
 0xb89   :  { %2270 = vmatprep.mubr.bf16.mxu0 %v4668_v13  ;;  %2311 = vmatprep.mubr.bf16.mxu1 %v4668_v13 }
 0xb8b   :  { %2241 = vmatpush1.bf16.msra.mxu0 %v3985_v8  ;;  %2282 = vmatpush1.bf16.msra.mxu1 %v3988_v61  ;;  %v4700_v8 = vld [vmem:[#allocation54_spill] sm:$0xff] }
 0xb8c   :  { %2242 = vmatprep.subr.bf16.mxu0 %v3991_v35  ;;  %2283 = vmatprep.subr.bf16.mxu1 %v3994_v10  ;;  %v4701_v35 = vld [vmem:[#allocation55_spill] sm:$0xff] }
 0xb8f   :  { %2243 = vmatpush1.bf16.msra.mxu0 %v3997_v0  ;;  %2284 = vmatpush1.bf16.msra.mxu1 %v4000_v12 }
 0xb90   :  { %2244 = vmatprep.subr.bf16.mxu0 %v4003_v43  ;;  %2285 = vmatprep.subr.bf16.mxu1 %v4006_v17  ;;  %v4702_v43 = vld [vmem:[#allocation56_spill] sm:$0xff] }
 0xb93   :  { %2245 = vmatpush1.bf16.msra.mxu0 %v4009_v20  ;;  %2286 = vmatpush1.bf16.msra.mxu1 %v4012_v23  ;;  %v4703_v20 = vld [vmem:[#allocation57_spill] sm:$0xff] }
 0xb94   :  { %2246 = vmatprep.subr.bf16.mxu0 %v4015_v19  ;;  %2287 = vmatprep.subr.bf16.mxu1 %v4018_v21 }
 0xb97   :  { %2247 = vmatpush1.bf16.msra.mxu0 %v4021_v24  ;;  %2288 = vmatpush1.bf16.msra.mxu1 %v4024_v38 }
 0xb98   :  { %2248 = vmatprep.subr.bf16.mxu0 %v4027_v39  ;;  %2289 = vmatprep.subr.bf16.mxu1 %v4030_v40 }
 0xb9b   :  { %2249 = vmatpush1.bf16.msra.mxu0 %v4075_v15  ;;  %2290 = vmatpush1.bf16.msra.mxu1 %v4078_v27 }
 0xb9c   :  { %2250 = vmatprep.subr.bf16.mxu0 %v4081_v16  ;;  %2291 = vmatprep.subr.bf16.mxu1 %v4084_v29 }
 0xb9f   :  { %2251 = vmatpush1.bf16.msra.mxu0 %v4087_v52  ;;  %2292 = vmatpush1.bf16.msra.mxu1 %v4090_v33 }
 0xba0   :  { %2252 = vmatprep.subr.bf16.mxu0 %v4093_v58  ;;  %2293 = vmatprep.subr.bf16.mxu1 %v4096_v59 }
 0xba3   :  { %2253 = vmatpush1.bf16.msra.mxu0 %v4099_v60  ;;  %2294 = vmatpush1.bf16.msra.mxu1 %v4102_v63 }
 0xba4   :  { %2352 = vmatprep.subr.bf16.mxu0 %v4357_v34  ;;  %2393 = vmatprep.subr.bf16.mxu1 %v4360_v31 }
 0xc59   :  { %v2158_v6 = vpop.f32.mrb[76].mxu0  ;;  %v2199_v32 = vpop.f32.mrb[76].mxu1 }
 0xc5a   :  { %v2206_v61 = vadd.f32 %v2158_v6, %v4700_v8  ;;  %v2208_v10 = vadd.f32 %v2199_v32, %v4701_v35  ;;  %v2160_v0 = vpop.f32.mrb[77].mxu0  ;;  %v2201_v12 = vpop.f32.mrb[77].mxu1  ;;  %v4421_v6 = vld [vmem:[#allocation13 + $0x80] ss:$16 sps:$4 sm:$0xff]   ;;  %v4424_v32 = vld [vmem:[#allocation13 + $0x88] ss:$16 sps:$4 sm:$0xff]  }
 0xc5b   :  { %v2207_v17 = vadd.f32 %v2160_v0, %v4702_v43  ;;  %v2209_v23 = vadd.f32 %v2201_v12, %v4703_v20  ;;  %v2162_v19 = vpop.f32.mrb[78].mxu0  ;;  %v2203_v21 = vpop.f32.mrb[78].mxu1  ;;  %v4427_v8 = vld [vmem:[#allocation13 + $0xa4] ss:$16 sps:$4 sm:$0xff]   ;;  %v4706_v0 = vld [vmem:[#allocation60_spill] sm:$0xff] }
 0xc5c   :  { %v2210_v24 = vmul.f32 0.5, %v2206_v61  ;;  %v2163_v38 = vpop.f32.mrb[79].mxu0  ;;  %v2204_v39 = vpop.f32.mrb[79].mxu1  ;;  %v4430_v61 = vld [vmem:[#allocation13 + $0xac] ss:$16 sps:$4 sm:$0xff]   ;;  %v4705_v35 = vld [vmem:[#allocation59_spill] sm:$0xff] }
 0xc5d   :  { %v2214_v40 = vmul.f32 0.5, %v2207_v17  ;;  %v2219_v51 = vmul.f32 0.5, %v2209_v23  ;;  %v4707_v12 = vld [vmem:[#allocation61_spill] sm:$0xff] }
 0xc5e   :  { %3055 = vtanh.f32 %v2210_v24 }
 0xc5f   :  { %3057 = vtanh.f32 %v2214_v40 }
 0xc60   :  { %3059 = vtanh.f32 %v2208_v10 }
 0xc61   :  { %3061 = vtanh.f32 %v2219_v51 }
 0xc68   :  { %v3056_v18 = vpop.eup %3055 }
 0xc69   :  { %v3058_v25 = vpop.eup %3057  ;;  %v2212_v26 = vmul.f32 0.5, %v3056_v18 }
 0xc6a   :  { %v2216_v7 = vmul.f32 0.5, %v3058_v25  ;;  %v3060_v30 = vpop.eup %3059 }
 0xc6b   :  { %v2213_v11 = vadd.f32 0.5, %v2212_v26  ;;  %v3062_v22 = vpop.eup %3061 }
 0xc6c   :  { %v2217_v41 = vadd.f32 0.5, %v2216_v7  ;;  %v2221_v1 = vmul.f32 0.5, %v3062_v22 }
 0xc6d   :  { %v2224_v62 = vmul.f32 %v3060_v30, %v2213_v11 }
 0xc6e   :  { %v2223_v42 = vmul.f32 %v2217_v41, %v4322_v54  ;;  %v2222_v45 = vadd.f32 0.5, %v2221_v1  ;;  %v4400_v54 = vld [vmem:[#allocation13 + $0x48] ss:$16 sps:$4 sm:$0xff]  }
 0xc6f   :  { %v4478_v1 = vld [vmem:[#allocation13 + $0xa8] ss:$16 sps:$4 sm:$0xff]  }
 0xc70   :  { %v4368_v44 = vadd.f32 %v2224_v62, %v2223_v42 }
 0xc72   :  { %3063 = vtanh.f32 %v4368_v44 }
 0xc7c   :  { %v3064_v46 = vpop.eup %3063 }
 0xc7d   :  { %v2227_v36 = vmul.f32 %v3064_v46, %v2222_v45  ;;  %v4481_v45 = vld [vmem:[#allocation13 + $0xc4] ss:$16 sps:$4 sm:$0xff]   ;;  %v4484_v46 = vld [vmem:[#allocation13 + $0xcc] ss:$16 sps:$4 sm:$0xff]  }
 0xc7f   :  { %2229 = vst [vmem:[#allocation14 + $0x58] sm:$0xff] %v2227_v36  ;;  %v2237_v37 = vpack.c.bf16 %v2227_v36, %v2227_v36  ;;  %v4487_v36 = vld [vmem:[#allocation13 + $0xc0] ss:$16 sps:$4 sm:$0xff]  }
 0xc81   :  { %2271 = vmatmul.mubr.bf16.vlgmr.msra.gmra.mrb[80].mxu0 %v2237_v37  ;;  %2312 = vmatmul.mubr.bf16.vlgmr.msra.gmra.mrb[80].mxu1 %v2237_v37  ;;  %v4490_v37 = vld [vmem:[#allocation13 + $0xc8] ss:$16 sps:$4 sm:$0xff]  }
 0xc82   :  { %2353 = vmatpush1.bf16.msra.mxu0 %v4371_v28  ;;  %2394 = vmatpush1.bf16.msra.mxu1 %v4374_v4 }
 0xc83   :  { %2354 = vmatprep.subr.bf16.mxu0 %v4377_v47  ;;  %2395 = vmatprep.subr.bf16.mxu1 %v4380_v48 }
 0xc84   :  { %2384 = vmatprep.mubr.bf16.mxu0 %v4668_v13  ;;  %2425 = vmatprep.mubr.bf16.mxu1 %v4668_v13 }
 0xc86   :  { %2355 = vmatpush1.bf16.msra.mxu0 %v4385_v2  ;;  %2396 = vmatpush1.bf16.msra.mxu1 %v4388_v49 }
 0xc87   :  { %2356 = vmatprep.subr.bf16.mxu0 %v4391_v50  ;;  %2397 = vmatprep.subr.bf16.mxu1 %v4394_v53 }
 0xc8a   :  { %2357 = vmatpush1.bf16.msra.mxu0 %v4397_v3  ;;  %2398 = vmatpush1.bf16.msra.mxu1 %v4400_v54 }
 0xc8b   :  { %2358 = vmatprep.subr.bf16.mxu0 %v4403_v55  ;;  %2399 = vmatprep.subr.bf16.mxu1 %v4406_v56 }
 0xc8e   :  { %2359 = vmatpush1.bf16.msra.mxu0 %v4409_v57  ;;  %2400 = vmatpush1.bf16.msra.mxu1 %v4412_v5 }
 0xc8f   :  { %2360 = vmatprep.subr.bf16.mxu0 %v4415_v9  ;;  %2401 = vmatprep.subr.bf16.mxu1 %v4418_v14 }
 0xc92   :  { %2361 = vmatpush1.bf16.msra.mxu0 %v4421_v6  ;;  %2402 = vmatpush1.bf16.msra.mxu1 %v4424_v32 }
 0xc93   :  { %2362 = vmatprep.subr.bf16.mxu0 %v4427_v8  ;;  %2403 = vmatprep.subr.bf16.mxu1 %v4430_v61 }
 0xc96   :  { %2363 = vmatpush1.bf16.msra.mxu0 %v4075_v15  ;;  %2404 = vmatpush1.bf16.msra.mxu1 %v4078_v27 }
 0xc97   :  { %2364 = vmatprep.subr.bf16.mxu0 %v4081_v16  ;;  %2405 = vmatprep.subr.bf16.mxu1 %v4084_v29  ;;  %v4704_v16 = vld [vmem:[#allocation58_spill] sm:$0xff] }
 0xc9a   :  { %2365 = vmatpush1.bf16.msra.mxu0 %v4087_v52  ;;  %2406 = vmatpush1.bf16.msra.mxu1 %v4090_v33 }
 0xc9b   :  { %2366 = vmatprep.subr.bf16.mxu0 %v4093_v58  ;;  %2407 = vmatprep.subr.bf16.mxu1 %v4096_v59 }
 0xc9e   :  { %2367 = vmatpush1.bf16.msra.mxu0 %v4099_v60  ;;  %2408 = vmatpush1.bf16.msra.mxu1 %v4102_v63 }
 0xc9f   :  { %2466 = vmatprep.subr.bf16.mxu0 %v4357_v34  ;;  %2507 = vmatprep.subr.bf16.mxu1 %v4360_v31 }
 0xd54   :  { %v2272_v15 = vpop.f32.mrb[80].mxu0  ;;  %v2313_v27 = vpop.f32.mrb[80].mxu1 }
 0xd55   :  { %v2320_v29 = vadd.f32 %v2272_v15, %v4704_v16  ;;  %v2322_v52 = vadd.f32 %v2313_v27, %v4705_v35  ;;  %v2274_v10 = vpop.f32.mrb[81].mxu0  ;;  %v2315_v33 = vpop.f32.mrb[81].mxu1  ;;  %v4493_v15 = vld [vmem:[#allocation13 + $0xe4] ss:$16 sps:$4 sm:$0xff]   ;;  %v4496_v27 = vld [vmem:[#allocation13 + $0xec] ss:$16 sps:$4 sm:$0xff]  }
 0xd56   :  { %v2321_v58 = vadd.f32 %v2274_v10, %v4706_v0  ;;  %v2323_v59 = vadd.f32 %v2315_v33, %v4707_v12  ;;  %v2276_v43 = vpop.f32.mrb[82].mxu0  ;;  %v2317_v60 = vpop.f32.mrb[82].mxu1  ;;  %v4499_v16 = vld [vmem:[#allocation13 + $0xe0] ss:$16 sps:$4 sm:$0xff]   ;;  %v4708_v10 = vld [vmem:[#allocation62_spill] sm:$0xff] }
 0xd57   :  { %v2324_v17 = vmul.f32 0.5, %v2320_v29  ;;  %v2277_v63 = vpop.f32.mrb[83].mxu0  ;;  %v2318_v20 = vpop.f32.mrb[83].mxu1  ;;  %v4502_v29 = vld [vmem:[#allocation13 + $0xe8] ss:$16 sps:$4 sm:$0xff]   ;;  %v4709_v0 = vld [vmem:[#allocation63_spill] sm:$0xff] }
 0xd58   :  { %v2328_v23 = vmul.f32 0.5, %v2321_v58  ;;  %v2333_v19 = vmul.f32 0.5, %v2323_v59  ;;  %v4710_v43 = vld [vmem:[#allocation64_spill] sm:$0xff] }
 0xd59   :  { %3065 = vtanh.f32 %v2324_v17  ;;  %v4711_v17 = vld [vmem:[#allocation65_spill] sm:$0xff] }
 0xd5a   :  { %3067 = vtanh.f32 %v2328_v23 }
 0xd5b   :  { %3069 = vtanh.f32 %v2322_v52 }
 0xd5c   :  { %3071 = vtanh.f32 %v2333_v19 }
 0xd63   :  { %v3066_v21 = vpop.eup %3065 }
 0xd64   :  { %v3068_v24 = vpop.eup %3067  ;;  %v2326_v38 = vmul.f32 0.5, %v3066_v21 }
 0xd65   :  { %v2330_v39 = vmul.f32 0.5, %v3068_v24  ;;  %v3070_v51 = vpop.eup %3069 }
 0xd66   :  { %v2327_v40 = vadd.f32 0.5, %v2326_v38  ;;  %v3072_v11 = vpop.eup %3071 }
 0xd67   :  { %v2331_v18 = vadd.f32 0.5, %v2330_v39  ;;  %v2335_v30 = vmul.f32 0.5, %v3072_v11 }
 0xd68   :  { %v2338_v25 = vmul.f32 %v3070_v51, %v2327_v40 }
 0xd69   :  { %v2337_v26 = vmul.f32 %v2331_v18, %v4368_v44  ;;  %v2336_v41 = vadd.f32 0.5, %v2335_v30  ;;  %v4475_v44 = vld [vmem:[#allocation13 + $0xa0] ss:$16 sps:$4 sm:$0xff]  }
 0xd6b   :  { %v4450_v7 = vadd.f32 %v2338_v25, %v2337_v26 }
 0xd6d   :  { %3073 = vtanh.f32 %v4450_v7 }
 0xd77   :  { %v3074_v62 = vpop.eup %3073 }
 0xd78   :  { %v2341_v42 = vmul.f32 %v3074_v62, %v2336_v41 }
 0xd7a   :  { %2343 = vst [vmem:[#allocation14 + $0x60] sm:$0xff] %v2341_v42  ;;  %v2351_v22 = vpack.c.bf16 %v2341_v42, %v2341_v42 }
 0xd7c   :  { %2385 = vmatmul.mubr.bf16.vlgmr.msra.gmra.mrb[84].mxu0 %v2351_v22  ;;  %2426 = vmatmul.mubr.bf16.vlgmr.msra.gmra.mrb[84].mxu1 %v2351_v22 }
 0xd7d   :  { %2467 = vmatpush1.bf16.msra.mxu0 %v4371_v28  ;;  %2508 = vmatpush1.bf16.msra.mxu1 %v4374_v4 }
 0xd7e   :  { %2468 = vmatprep.subr.bf16.mxu0 %v4377_v47  ;;  %2509 = vmatprep.subr.bf16.mxu1 %v4380_v48 }
 0xd7f   :  { %2498 = vmatprep.mubr.bf16.mxu0 %v4668_v13  ;;  %2539 = vmatprep.mubr.bf16.mxu1 %v4668_v13 }
 0xd81   :  { %2469 = vmatpush1.bf16.msra.mxu0 %v4385_v2  ;;  %2510 = vmatpush1.bf16.msra.mxu1 %v4388_v49 }
 0xd82   :  { %2470 = vmatprep.subr.bf16.mxu0 %v4391_v50  ;;  %2511 = vmatprep.subr.bf16.mxu1 %v4394_v53 }
 0xd85   :  { %2471 = vmatpush1.bf16.msra.mxu0 %v4397_v3  ;;  %2512 = vmatpush1.bf16.msra.mxu1 %v4400_v54 }
 0xd86   :  { %2472 = vmatprep.subr.bf16.mxu0 %v4403_v55  ;;  %2513 = vmatprep.subr.bf16.mxu1 %v4406_v56 }
 0xd89   :  { %2473 = vmatpush1.bf16.msra.mxu0 %v4409_v57  ;;  %2514 = vmatpush1.bf16.msra.mxu1 %v4412_v5 }
 0xd8a   :  { %2474 = vmatprep.subr.bf16.mxu0 %v4415_v9  ;;  %2515 = vmatprep.subr.bf16.mxu1 %v4418_v14 }
 0xd8d   :  { %2475 = vmatpush1.bf16.msra.mxu0 %v4421_v6  ;;  %2516 = vmatpush1.bf16.msra.mxu1 %v4424_v32 }
 0xd8e   :  { %2476 = vmatprep.subr.bf16.mxu0 %v4427_v8  ;;  %2517 = vmatprep.subr.bf16.mxu1 %v4430_v61 }
 0xd91   :  { %2477 = vmatpush1.bf16.msra.mxu0 %v4475_v44  ;;  %2518 = vmatpush1.bf16.msra.mxu1 %v4478_v1 }
 0xd92   :  { %2478 = vmatprep.subr.bf16.mxu0 %v4481_v45  ;;  %2519 = vmatprep.subr.bf16.mxu1 %v4484_v46 }
 0xd95   :  { %2479 = vmatpush1.bf16.msra.mxu0 %v4487_v36  ;;  %2520 = vmatpush1.bf16.msra.mxu1 %v4490_v37 }
 0xd96   :  { %2480 = vmatprep.subr.bf16.mxu0 %v4493_v15  ;;  %2521 = vmatprep.subr.bf16.mxu1 %v4496_v27 }
 0xd99   :  { %2481 = vmatpush1.bf16.msra.mxu0 %v4499_v16  ;;  %2522 = vmatpush1.bf16.msra.mxu1 %v4502_v29 }
 0xd9a   :  { %2580 = vmatprep.subr.bf16.mxu0 %v4357_v34  ;;  %2621 = vmatprep.subr.bf16.mxu1 %v4360_v31 }
 0xe4f   :  { %v2386_v35 = vpop.f32.mrb[84].mxu0  ;;  %v2427_v52 = vpop.f32.mrb[84].mxu1 }
 0xe50   :  { %v2434_v33 = vadd.f32 %v2386_v35, %v4708_v10  ;;  %v2436_v58 = vadd.f32 %v2427_v52, %v4709_v0  ;;  %v2388_v12 = vpop.f32.mrb[85].mxu0  ;;  %v2429_v59 = vpop.f32.mrb[85].mxu1 }
 0xe51   :  { %v2435_v60 = vadd.f32 %v2388_v12, %v4710_v43  ;;  %v2437_v63 = vadd.f32 %v2429_v59, %v4711_v17  ;;  %v2390_v20 = vpop.f32.mrb[86].mxu0  ;;  %v2431_v23 = vpop.f32.mrb[86].mxu1  ;;  %v4716_v43 = vld [vmem:[#allocation70_spill] sm:$0xff]  ;;  %v4717_v17 = vld [vmem:[#allocation71_spill] sm:$0xff] }
 0xe52   :  { %v2438_v19 = vmul.f32 0.5, %v2434_v33  ;;  %v2391_v21 = vpop.f32.mrb[87].mxu0  ;;  %v2432_v24 = vpop.f32.mrb[87].mxu1 }
 0xe53   :  { %v2442_v34 = vmul.f32 0.5, %v2435_v60  ;;  %v2447_v31 = vmul.f32 0.5, %v2437_v63  ;;  %v4719_v24 = vld [vmem:[#allocation73_spill] sm:$0xff] }
 0xe54   :  { %3075 = vtanh.f32 %v2438_v19  ;;  %v4718_v19 = vld [vmem:[#allocation72_spill] sm:$0xff] }
 0xe55   :  { %3077 = vtanh.f32 %v2442_v34 }
 0xe56   :  { %3079 = vtanh.f32 %v2436_v58 }
 0xe57   :  { %3081 = vtanh.f32 %v2447_v31 }
 0xe5e   :  { %v3076_v38 = vpop.eup %3075 }
 0xe5f   :  { %v3078_v39 = vpop.eup %3077  ;;  %v2440_v40 = vmul.f32 0.5, %v3076_v38 }
 0xe60   :  { %v2444_v51 = vmul.f32 0.5, %v3078_v39  ;;  %v3080_v25 = vpop.eup %3079 }
 0xe61   :  { %v2441_v18 = vadd.f32 0.5, %v2440_v40  ;;  %v3082_v62 = vpop.eup %3081 }
 0xe62   :  { %v2445_v26 = vadd.f32 0.5, %v2444_v51  ;;  %v2449_v42 = vmul.f32 0.5, %v3082_v62 }
 0xe63   :  { %v2452_v11 = vmul.f32 %v3080_v25, %v2441_v18 }
 0xe64   :  { %v2451_v30 = vmul.f32 %v2445_v26, %v4450_v7  ;;  %v2450_v22 = vadd.f32 0.5, %v2449_v42 }
 0xe66   :  { %v4512_v41 = vadd.f32 %v2452_v11, %v2451_v30 }
 0xe68   :  { %3083 = vtanh.f32 %v4512_v41 }
 0xe72   :  { %v3084_v35 = vpop.eup %3083 }
 0xe73   :  { %v2455_v52 = vmul.f32 %v3084_v35, %v2450_v22 }
 0xe75   :  { %2457 = vst [vmem:[#allocation14 + $0x68] sm:$0xff] %v2455_v52  ;;  %v2465_v10 = vpack.c.bf16 %v2455_v52, %v2455_v52 }
 0xe77   :  { %2499 = vmatmul.mubr.bf16.vlgmr.msra.gmra.mrb[88].mxu0 %v2465_v10  ;;  %2540 = vmatmul.mubr.bf16.vlgmr.msra.gmra.mrb[88].mxu1 %v2465_v10 }
 0xe78   :  { %2581 = vmatpush1.bf16.msra.mxu0 %v4371_v28  ;;  %2622 = vmatpush1.bf16.msra.mxu1 %v4374_v4  ;;  %v4712_v4 = vld [vmem:[#allocation66_spill] sm:$0xff] }
 0xe79   :  { %2582 = vmatprep.subr.bf16.mxu0 %v4377_v47  ;;  %2623 = vmatprep.subr.bf16.mxu1 %v4380_v48  ;;  %v4713_v48 = vld [vmem:[#allocation67_spill] sm:$0xff] }
 0xe7a   :  { %2612 = vmatprep.mubr.bf16.mxu0 %v4668_v13  ;;  %2653 = vmatprep.mubr.bf16.mxu1 %v4668_v13 }
 0xe7c   :  { %2583 = vmatpush1.bf16.msra.mxu0 %v4385_v2  ;;  %2624 = vmatpush1.bf16.msra.mxu1 %v4388_v49 }
 0xe7d   :  { %2584 = vmatprep.subr.bf16.mxu0 %v4391_v50  ;;  %2625 = vmatprep.subr.bf16.mxu1 %v4394_v53  ;;  %v4714_v53 = vld [vmem:[#allocation68_spill] sm:$0xff] }
 0xe80   :  { %2585 = vmatpush1.bf16.msra.mxu0 %v4397_v3  ;;  %2626 = vmatpush1.bf16.msra.mxu1 %v4400_v54  ;;  %v4715_v54 = vld [vmem:[#allocation69_spill] sm:$0xff] }
 0xe81   :  { %2586 = vmatprep.subr.bf16.mxu0 %v4403_v55  ;;  %2627 = vmatprep.subr.bf16.mxu1 %v4406_v56 }
 0xe84   :  { %2587 = vmatpush1.bf16.msra.mxu0 %v4409_v57  ;;  %2628 = vmatpush1.bf16.msra.mxu1 %v4412_v5 }
 0xe85   :  { %2588 = vmatprep.subr.bf16.mxu0 %v4415_v9  ;;  %2629 = vmatprep.subr.bf16.mxu1 %v4418_v14 }
 0xe88   :  { %2589 = vmatpush1.bf16.msra.mxu0 %v4421_v6  ;;  %2630 = vmatpush1.bf16.msra.mxu1 %v4424_v32 }
 0xe89   :  { %2590 = vmatprep.subr.bf16.mxu0 %v4427_v8  ;;  %2631 = vmatprep.subr.bf16.mxu1 %v4430_v61 }
 0xe8c   :  { %2591 = vmatpush1.bf16.msra.mxu0 %v4475_v44  ;;  %2632 = vmatpush1.bf16.msra.mxu1 %v4478_v1 }
 0xe8d   :  { %2592 = vmatprep.subr.bf16.mxu0 %v4481_v45  ;;  %2633 = vmatprep.subr.bf16.mxu1 %v4484_v46 }
 0xe90   :  { %2593 = vmatpush1.bf16.msra.mxu0 %v4487_v36  ;;  %2634 = vmatpush1.bf16.msra.mxu1 %v4490_v37 }
 0xe91   :  { %2594 = vmatprep.subr.bf16.mxu0 %v4493_v15  ;;  %2635 = vmatprep.subr.bf16.mxu1 %v4496_v27 }
 0xe94   :  { %2595 = vmatpush1.bf16.msra.mxu0 %v4499_v16  ;;  %2636 = vmatpush1.bf16.msra.mxu1 %v4502_v29 }
 0xf4a   :  { %v2500_v13 = vpop.f32.mrb[88].mxu0  ;;  %v2541_v28 = vpop.f32.mrb[88].mxu1 }
 0xf4b   :  { %v2548_v47 = vadd.f32 %v2500_v13, %v4712_v4  ;;  %v2550_v2 = vadd.f32 %v2541_v28, %v4713_v48  ;;  %v2502_v49 = vpop.f32.mrb[89].mxu0  ;;  %v2543_v50 = vpop.f32.mrb[89].mxu1 }
 0xf4c   :  { %v2549_v3 = vadd.f32 %v2502_v49, %v4714_v53  ;;  %v2551_v55 = vadd.f32 %v2543_v50, %v4715_v54  ;;  %v2504_v56 = vpop.f32.mrb[90].mxu0  ;;  %v2545_v57 = vpop.f32.mrb[90].mxu1 }
 0xf4d   :  { %v2552_v5 = vmul.f32 0.5, %v2548_v47  ;;  %v2505_v9 = vpop.f32.mrb[91].mxu0  ;;  %v2546_v14 = vpop.f32.mrb[91].mxu1 }
 0xf4e   :  { %v2556_v6 = vmul.f32 0.5, %v2549_v3  ;;  %v2561_v32 = vmul.f32 0.5, %v2551_v55 }
 0xf4f   :  { %3085 = vtanh.f32 %v2552_v5 }
 0xf50   :  { %3087 = vtanh.f32 %v2556_v6 }
 0xf51   :  { %3089 = vtanh.f32 %v2550_v2 }
 0xf52   :  { %3091 = vtanh.f32 %v2561_v32 }
 0xf59   :  { %v3086_v8 = vpop.eup %3085 }
 0xf5a   :  { %v3088_v61 = vpop.eup %3087  ;;  %v2554_v7 = vmul.f32 0.5, %v3086_v8 }
 0xf5b   :  { %v2558_v44 = vmul.f32 0.5, %v3088_v61  ;;  %v3090_v45 = vpop.eup %3089 }
 0xf5c   :  { %v2555_v1 = vadd.f32 0.5, %v2554_v7  ;;  %v3092_v27 = vpop.eup %3091 }
 0xf5d   :  { %v2559_v46 = vadd.f32 0.5, %v2558_v44  ;;  %v2563_v16 = vmul.f32 0.5, %v3092_v27 }
 0xf5e   :  { %v2566_v36 = vmul.f32 %v3090_v45, %v2555_v1 }
 0xf5f   :  { %v2565_v37 = vmul.f32 %v2559_v46, %v4512_v41  ;;  %v2564_v29 = vadd.f32 0.5, %v2563_v16 }
 0xf61   :  { %v2567_v15 = vadd.f32 %v2566_v36, %v2565_v37 }
 0xf63   :  { %3093 = vtanh.f32 %v2567_v15 }
 0xf6d   :  { %v3094_v33 = vpop.eup %3093 }
 0xf6e   :  { %v2569_v0 = vmul.f32 %v3094_v33, %v2564_v29 }
 0xf70   :  { %2571 = vst [vmem:[#allocation14 + $0x70] sm:$0xff] %v2569_v0  ;;  %v2579_v58 = vpack.c.bf16 %v2569_v0, %v2569_v0 }
 0xf72   :  { %2613 = vmatmul.mubr.bf16.vlgmr.msra.gmra.mrb[92].mxu0 %v2579_v58  ;;  %2654 = vmatmul.mubr.bf16.vlgmr.msra.gmra.mrb[92].mxu1 %v2579_v58 }
0x1045   :  { %v2614_v12 = vpop.f32.mrb[92].mxu0  ;;  %v2655_v59 = vpop.f32.mrb[92].mxu1 }
0x1046   :  { %v2662_v60 = vadd.f32 %v2614_v12, %v4716_v43  ;;  %v2664_v63 = vadd.f32 %v2655_v59, %v4717_v17  ;;  %v2616_v20 = vpop.f32.mrb[93].mxu0  ;;  %v2657_v23 = vpop.f32.mrb[93].mxu1 }
0x1047   :  { %v2663_v21 = vadd.f32 %v2616_v20, %v4718_v19  ;;  %v2665_v34 = vadd.f32 %v2657_v23, %v4719_v24  ;;  %v2618_v31 = vpop.f32.mrb[94].mxu0  ;;  %v2659_v38 = vpop.f32.mrb[94].mxu1 }
0x1048   :  { %v2666_v39 = vmul.f32 0.5, %v2662_v60  ;;  %v2619_v40 = vpop.f32.mrb[95].mxu0  ;;  %v2660_v51 = vpop.f32.mrb[95].mxu1 }
0x1049   :  { %v2670_v18 = vmul.f32 0.5, %v2663_v21  ;;  %v2675_v25 = vmul.f32 0.5, %v2665_v34 }
0x104a   :  { %3095 = vtanh.f32 %v2666_v39 }
0x104b   :  { %3097 = vtanh.f32 %v2670_v18 }
0x104c   :  { %3099 = vtanh.f32 %v2664_v63 }
0x104d   :  { %3101 = vtanh.f32 %v2675_v25 }
0x1054   :  { %v3096_v26 = vpop.eup %3095 }
0x1055   :  { %v3098_v11 = vpop.eup %3097  ;;  %v2668_v30 = vmul.f32 0.5, %v3096_v26 }
0x1056   :  { %v2672_v41 = vmul.f32 0.5, %v3098_v11  ;;  %v3100_v42 = vpop.eup %3099 }
0x1057   :  { %v2669_v62 = vadd.f32 0.5, %v2668_v30  ;;  %v3102_v13 = vpop.eup %3101 }
0x1058   :  { %v2673_v22 = vadd.f32 0.5, %v2672_v41  ;;  %v2677_v28 = vmul.f32 0.5, %v3102_v13 }
0x1059   :  { %v2680_v35 = vmul.f32 %v3100_v42, %v2669_v62 }
0x105a   :  { %v2679_v52 = vmul.f32 %v2673_v22, %v2567_v15  ;;  %v2678_v4 = vadd.f32 0.5, %v2677_v28 }
0x105c   :  { %v2681_v10 = vadd.f32 %v2680_v35, %v2679_v52 }
0x105e   :  { %3103 = vtanh.f32 %v2681_v10  ;;  %2692 = vst [vmem:[#allocation17] sm:$0xff] %v2681_v10 }
0x1068   :  { %v3104_v47 = vpop.eup %3103 }
0x1069   :  { %v2683_v48 = vmul.f32 %v3104_v47, %v2678_v4 }
0x106b   :  { %2685 = vst [vmem:[#allocation14 + $0x78] sm:$0xff] %v2683_v48  ;;  %2691 = vst [vmem:[#allocation15] sm:$0xff] %v2683_v48 }
0x106c   :  { %3290 = shalt.err (!%p3287_p2)
}
0x106d   :  { %s3291_s28 = scalar_lea.hbm %s4613_s7, 128 }
0x106e   :  { %p3292_p3 = scmp.ne.s32.totalorder %s4613_s7, %s3291_s28  ;;  %p3295_p4 = scmp.lt.u32.totalorder %s3291_s28, %s4613_s7 }
0x1070   :  { %p3297_p5 = pnand %p3295_p4, %p3292_p3 }
0x1072   :  { %3300 = shalt.err (!%p3297_p5)
}
0x1073   :  { %2714 = dma.vmem_to_hbm [thread:$0]  %s2712_s16, 128, %s4613_s7, [#allocation16]  }
0x1074   :  { %s3301_s13 = scalar_lea.vmem %s4556_s25, 2048  ;;  %p3306_p7 = scmp.lt.s32.totalorder %s4556_s25, %s4556_s25 }
0x1075   :  { %p3302_p6 = scmp.ne.s32.totalorder %s4556_s25, %s3301_s13  ;;  %p3307_p8 = scmp.lt.s32.totalorder %s3301_s13, %s3301_s13 }
0x1077   :  { %p3308_p9 = por %p3307_p8, %p3306_p7 }
0x1079   :  { %p3309_p10 = pnand %p3308_p9, %p3302_p6 }
0x107b   :  { %3312 = shalt.err (!%p3309_p10)
}
0x107c   :  { %s3313_s18 = scalar_lea.hbm %s4612_s6, 2048 }
0x107d   :  { %p3314_p11 = scmp.ne.s32.totalorder %s4612_s6, %s3313_s18  ;;  %p3317_p12 = scmp.lt.u32.totalorder %s3313_s18, %s4612_s6 }
0x107f   :  { %p3319_p13 = pnand %p3317_p12, %p3314_p11 }
0x1081   :  { %3322 = shalt.err (!%p3319_p13)
}
0x1082   :  { %s3368_s7 = smov 128   ;;  %s3369_s2 = smov 8  }
0x1083   :  { %2704 = dma.vmem_to_hbm [thread:$0]  %s4556_s25, 2048, %s4612_s6, [#allocation7], %s3368_s7, %s3368_s7, %s3369_s2  }
0x1084   :  { %s3323_s15 = scalar_lea.vmem %s4558_s27, 128  ;;  %p3328_p1 = scmp.lt.s32.totalorder %s4558_s27, %s4558_s27 }
0x1085   :  { %p3324_p0 = scmp.ne.s32.totalorder %s4558_s27, %s3323_s15  ;;  %p3329_p2 = scmp.lt.s32.totalorder %s3323_s15, %s3323_s15 }
0x1087   :  { %p3330_p3 = por %p3329_p2, %p3328_p1 }
0x1089   :  { %p3331_p4 = pnand %p3330_p3, %p3324_p0 }
0x108b   :  { %3334 = shalt.err (!%p3331_p4)
}
0x108c   :  { %s3335_s24 = scalar_lea.hbm %s4614_s8, 128 }
0x108d   :  { %p3336_p5 = scmp.ne.s32.totalorder %s4614_s8, %s3335_s24  ;;  %p3339_p6 = scmp.lt.u32.totalorder %s3335_s24, %s4614_s8 }
0x108f   :  { %p3341_p7 = pnand %p3339_p6, %p3336_p5 }
0x1091   :  { %3344 = shalt.err (!%p3341_p7)
}
0x1092   :  { %2724 = dma.vmem_to_hbm [thread:$0]  %s4558_s27, 128, %s4614_s8, [#allocation16]  }
0x1093   :  { %3351 = dma.done.wait [#allocation7], 2048  }
0x1094   :  { %3352 = vsyncadd [#allocation7], 4294965248 }
0x1095   :  { %3353 = dma.done.wait [#allocation16], 256  }
0x1096   :  { %3354 = vsyncadd [#allocation16], 4294967040 }
0x1097   :  { %2734 = vsyncpa [#allocation6], 1 }
0x1098   :  { %2735 = vsyncpa [#allocation9], 1 }
0x1099   :  { %2736 = vsyncpa [#allocation12], 1 }
0x109a   :  { %2737 = vsyncpa [#allocation7], 1 }
0x109b   :  { %2738 = vsyncpa [#allocation16], 1 }

</bundles_post_ra>
